<compile_context>
chip_gen: v6e
topology: v6e:2x2x1
jax: 0.10.0
libtpu: 0.0.40
codegen_flags: <defaults>
</compile_context>

<pallas_src>
import jax
import jax.numpy as jnp
from jax.experimental import pallas as pl
from jax.experimental.pallas import tpu as pltpu

HIDDEN_DIM = 128
NUM_CLASSES = 128
N_STEPS = 5
N_ETYPES = 1  # only the single-etype fast path is implemented
N_LAYERS = 2


def _ggsnn_kernel(h_ref, adj_ref, wcat_ref, bmsg_ref, bcat_ref,
                  fcw_ref, fcb_ref, out_ref):
    """Forward pass for one graph (one grid step); everything VMEM-resident."""
    H = HIDDEN_DIM
    h = h_ref[...]          # (N, H) float32
    adj = adj_ref[...]      # (N, N) float32, adj[dst, src]

    # in-degree of each destination node; constant across layers/steps
    rowdeg = jnp.sum(adj, axis=1, keepdims=True)          # (N, 1)

    for layer in range(N_LAYERS):                         # static unroll (2)
        w_cat = wcat_ref[layer]                           # (2H, 4H)
        # Per-layer bias hoisted out of the step loop:
        #   [a@wi_r bias + bi_r + bh_r | ... z ... | a@wi_n bias + bi_n | bh_n]
        bias = rowdeg * bmsg_ref[layer] + bcat_ref[layer]  # (N, 4H)

        for _ in range(N_STEPS):                          # static unroll (5)
            # graph aggregation of the (folded) message linear
            p = jnp.dot(adj, h, preferred_element_type=jnp.float32)   # (N, H)
            # single fused gate matmul: K = 2H = 256, N_out = 4H = 512
            x = jnp.concatenate([p, h], axis=-1)                      # (N, 2H)
            g = jnp.dot(x, w_cat, preferred_element_type=jnp.float32) + bias

            r = jax.nn.sigmoid(g[:, 0 * H:1 * H])   # a@wi_r + h@wh_r + b_r
            z = jax.nn.sigmoid(g[:, 1 * H:2 * H])   # a@wi_z + h@wh_z + b_z
            n = jnp.tanh(g[:, 2 * H:3 * H]          # a@wi_n + bi_n
                         + r * g[:, 3 * H:4 * H])   # r * (h@wh_n + bh_n)
            h = (1.0 - z) * n + z * h

    out_ref[...] = (jnp.dot(h, fcw_ref[...], preferred_element_type=jnp.float32)
                    + fcb_ref[...])


def pack_params(params):
    """Pack per-gate weights into the fused block-matmul form used by the kernel.

    Per layer l:
      W_cat (2H,4H) = [[msg_w@wi_r, msg_w@wi_z, msg_w@wi_n, 0   ],
                       [wh_r,       wh_z,       0,          wh_n]]
      bmsg_cat (1,4H) = [msg_b@wi_r, msg_b@wi_z, msg_b@wi_n, 0]
      b_cat    (1,4H) = [bi_r+bh_r,  bi_z+bh_z,  bi_n,       bh_n]
    """
    H = HIDDEN_DIM
    zero_hh = jnp.zeros((H, H), jnp.float32)
    zero_1h = jnp.zeros((1, H), jnp.float32)
    w_cat, bmsg_cat, b_cat = [], [], []
    for l in range(N_LAYERS):
        msg_w, msg_b = params["msg_w"][l], params["msg_b"][l]
        top = jnp.concatenate([msg_w @ params["wi_r"][l],
                               msg_w @ params["wi_z"][l],
                               msg_w @ params["wi_n"][l],
                               zero_hh], axis=1)
        bot = jnp.concatenate([params["wh_r"][l], params["wh_z"][l],
                               zero_hh, params["wh_n"][l]], axis=1)
        w_cat.append(jnp.concatenate([top, bot], axis=0))
        bmsg_cat.append(jnp.concatenate([msg_b @ params["wi_r"][l],
                                         msg_b @ params["wi_z"][l],
                                         msg_b @ params["wi_n"][l],
                                         zero_1h], axis=1))
        b_cat.append(jnp.concatenate(
            [params["bi_r"][l] + params["bh_r"][l],
             params["bi_z"][l] + params["bh_z"][l],
             params["bi_n"][l],
             params["bh_n"][l]], axis=1))
    return {
        "w_cat": jnp.stack(w_cat),        # (L, 2H, 4H)
        "bmsg_cat": jnp.stack(bmsg_cat),  # (L, 1, 4H)
        "b_cat": jnp.stack(b_cat),        # (L, 1, 4H)
        "fc_w": params["fc_w"],           # (H, C)
        "fc_b": params["fc_b"],           # (1, C)
    }


def ggsnn_forward(features, adj, packed):
    """features: (B, N, in_dim) f32; adj: (B, N, N) f32 with adj[b,dst,src]=1."""
    B, N, in_dim = features.shape
    H = HIDDEN_DIM
    C = packed["fc_w"].shape[1]

    # DGL GatedGraphConv zero-pads the input features up to hidden_dim (glue).
    h0 = jnp.zeros((B, N, H), jnp.float32).at[:, :, :in_dim].set(features)

    def batched(shape):
        nd = len(shape)
        return pl.BlockSpec((None,) + tuple(shape[1:]),
                            lambda b, _nd=nd: (b,) + (0,) * (_nd - 1))

    def shared(shape):
        nd = len(shape)
        return pl.BlockSpec(tuple(shape), lambda b, _nd=nd: (0,) * _nd)

    in_specs = [
        batched(h0.shape),                 # per-graph node features
        batched(adj.shape),                # per-graph adjacency
        shared(packed["w_cat"].shape),     # weights: constant index_map ->
        shared(packed["bmsg_cat"].shape),  # DMA'd once, VMEM-resident across
        shared(packed["b_cat"].shape),     # the whole batch grid
        shared(packed["fc_w"].shape),
        shared(packed["fc_b"].shape),
    ]
    out_spec = pl.BlockSpec((None, N, C), lambda b: (b, 0, 0))

    return pl.pallas_call(
        _ggsnn_kernel,
        out_shape=jax.ShapeDtypeStruct((B, N, C), jnp.float32),
        grid=(B,),
        in_specs=in_specs,
        out_specs=out_spec,
        compiler_params=pltpu.CompilerParams(
            dimension_semantics=("parallel",)),
    )(h0, adj, packed["w_cat"], packed["bmsg_cat"], packed["b_cat"],
      packed["fc_w"], packed["fc_b"])


def ggsnn_reference(features, adj, params):
    """Pure-JAX reference with the ORIGINAL (unfused) math, for validation."""
    B, N, in_dim = features.shape
    h = jnp.zeros((B, N, HIDDEN_DIM), jnp.float32).at[:, :, :in_dim].set(features)
    for l in range(N_LAYERS):
        for _ in range(N_STEPS):
            m = h @ params["msg_w"][l] + params["msg_b"][l]
            a = jnp.einsum("bij,bjh->bih", adj, m)
            r = jax.nn.sigmoid(a @ params["wi_r"][l] + params["bi_r"][l]
                               + h @ params["wh_r"][l] + params["bh_r"][l])
            z = jax.nn.sigmoid(a @ params["wi_z"][l] + params["bi_z"][l]
                               + h @ params["wh_z"][l] + params["bh_z"][l])
            n = jnp.tanh(a @ params["wi_n"][l] + params["bi_n"][l]
                         + r * (h @ params["wh_n"][l] + params["bh_n"][l]))
            h = (1.0 - z) * n + z * h
    return h @ params["fc_w"] + params["fc_b"]


def init_params(key, hidden, num_classes):
    """Deterministic synthetic parameters (shapes from the PyTorch module).

    Weights are stored pre-transposed so the math computes x @ W.
    Per GatedGraphConv layer: one message Linear(H,H) and a GRUCell(H,H)
    (weight_ih / weight_hh split into r, z, n gates)."""
    names_2d = ["msg_w", "wi_r", "wi_z", "wi_n", "wh_r", "wh_z", "wh_n"]
    names_1d = ["msg_b", "bi_r", "bi_z", "bi_n", "bh_r", "bh_z", "bh_n"]
    keys = jax.random.split(key, N_LAYERS * (len(names_2d) + len(names_1d)) + 2)
    ki = iter(range(len(keys)))
    scale = 0.1
    params = {}
    for name in names_2d:
        params[name] = jnp.stack([
            scale * jax.random.normal(keys[next(ki)], (hidden, hidden), jnp.float32)
            for _ in range(N_LAYERS)])
    for name in names_1d:
        params[name] = jnp.stack([
            scale * jax.random.normal(keys[next(ki)], (1, hidden), jnp.float32)
            for _ in range(N_LAYERS)])
    params["fc_w"] = scale * jax.random.normal(
        keys[next(ki)], (hidden, num_classes), jnp.float32)
    params["fc_b"] = scale * jax.random.normal(
        keys[next(ki)], (1, num_classes), jnp.float32)
    return params


if __name__ == "__main__":
    key = jax.random.PRNGKey(0)
    k_feat, k_adj, k_param = jax.random.split(key, 3)

    batch = 4         # graphs per pallas_call (grid axis, "parallel")
    n_nodes = 16      # small graph
    in_dim = 32       # raw node-feature dim (< hidden_dim, gets zero-padded)

    features = jax.random.normal(k_feat, (batch, n_nodes, in_dim), jnp.float32)
    adj = (jax.random.uniform(k_adj, (batch, n_nodes, n_nodes)) < 0.3
           ).astype(jnp.float32)

    params = init_params(k_param, HIDDEN_DIM, NUM_CLASSES)
    packed = pack_params(params)

    out = ggsnn_forward(features, adj, packed)
    out = jax.block_until_ready(out)

    ref = jax.block_until_ready(ggsnn_reference(features, adj, params))
    assert out.shape == (batch, n_nodes, NUM_CLASSES)
    # Algebraically identical to the PyTorch forward; tolerance absorbs the f32
    # re-association from folding msg_w into the gate weights over 10 GRU steps.
    assert jnp.allclose(out, ref, rtol=1e-3, atol=1e-3), "mismatch vs JAX reference"

    print("KERNEL_OK")
</pallas_src>

<mosaic_0001>
module attributes {stable_mosaic.version = 11 : i64} {
  func.func @_ggsnn_kernel(%arg0: i32, %arg1: memref<1x16x128xf32, #tpu.memory_space<vmem>>, %arg2: memref<1x16x16xf32, #tpu.memory_space<vmem>>, %arg3: memref<2x256x512xf32, #tpu.memory_space<vmem>>, %arg4: memref<2x1x512xf32, #tpu.memory_space<vmem>>, %arg5: memref<2x1x512xf32, #tpu.memory_space<vmem>>, %arg6: memref<128x128xf32, #tpu.memory_space<vmem>>, %arg7: memref<1x128xf32, #tpu.memory_space<vmem>>, %arg8: memref<1x16x128xf32, #tpu.memory_space<vmem>>) attributes {dimension_semantics = [#tpu.dimension_semantics<parallel>], iteration_bounds = array<i64: 4>, scalar_prefetch = 0 : i64, scratch_operands = 0 : i64, tpu.core_type = #tpu.core_type<tc>, window_params = [{transform_indices = @transform_0, window_bounds = array<i64: 1, 16, 128>}, {transform_indices = @transform_1, window_bounds = array<i64: 1, 16, 16>}, {pipeline_mode = #tpu.pipeline_mode<synchronous>, transform_indices = @transform_2, window_bounds = array<i64: 2, 256, 512>}, {pipeline_mode = #tpu.pipeline_mode<synchronous>, transform_indices = @transform_3, window_bounds = array<i64: 2, 1, 512>}, {pipeline_mode = #tpu.pipeline_mode<synchronous>, transform_indices = @transform_4, window_bounds = array<i64: 2, 1, 512>}, {pipeline_mode = #tpu.pipeline_mode<synchronous>, transform_indices = @transform_5, window_bounds = array<i64: 128, 128>}, {pipeline_mode = #tpu.pipeline_mode<synchronous>, transform_indices = @transform_6, window_bounds = array<i64: 1, 128>}, {transform_indices = @transform_7, window_bounds = array<i64: 1, 16, 128>}]} {
    %c0 = arith.constant 0 : index
    %c0_0 = arith.constant 0 : index
    %c0_1 = arith.constant 0 : index
    %0 = vector.load %arg1[%c0, %c0_0, %c0_1] : memref<1x16x128xf32, #tpu.memory_space<vmem>>, vector<1x16x128xf32>
    %1 = vector.shape_cast %0 : vector<1x16x128xf32> to vector<16x128xf32>
    %c0_2 = arith.constant 0 : index
    %c0_3 = arith.constant 0 : index
    %c0_4 = arith.constant 0 : index
    %2 = vector.load %arg2[%c0_2, %c0_3, %c0_4] : memref<1x16x16xf32, #tpu.memory_space<vmem>>, vector<1x16x16xf32>
    %3 = vector.shape_cast %2 : vector<1x16x16xf32> to vector<16x16xf32>
    %cst = arith.constant dense<0.000000e+00> : vector<16xf32>
    %4 = vector.multi_reduction <add>, %3, %cst [1] : vector<16x16xf32> to vector<16xf32>
    %5 = vector.shape_cast %4 : vector<16xf32> to vector<16x1xf32>
    %c0_5 = arith.constant 0 : index
    %c0_6 = arith.constant 0 : index
    %c0_7 = arith.constant 0 : index
    %6 = vector.load %arg3[%c0_5, %c0_6, %c0_7] : memref<2x256x512xf32, #tpu.memory_space<vmem>>, vector<1x256x512xf32>
    %7 = vector.shape_cast %6 : vector<1x256x512xf32> to vector<256x512xf32>
    %c0_8 = arith.constant 0 : index
    %c0_9 = arith.constant 0 : index
    %c0_10 = arith.constant 0 : index
    %8 = vector.load %arg4[%c0_8, %c0_9, %c0_10] : memref<2x1x512xf32, #tpu.memory_space<vmem>>, vector<1x1x512xf32>
    %9 = vector.shape_cast %8 : vector<1x1x512xf32> to vector<1x512xf32>
    %10 = vector.broadcast %5 : vector<16x1xf32> to vector<16x512xf32>
    %11 = vector.broadcast %9 : vector<1x512xf32> to vector<16x512xf32>
    %12 = arith.mulf %10, %11 : vector<16x512xf32>
    %c0_11 = arith.constant 0 : index
    %c0_12 = arith.constant 0 : index
    %c0_13 = arith.constant 0 : index
    %13 = vector.load %arg5[%c0_11, %c0_12, %c0_13] : memref<2x1x512xf32, #tpu.memory_space<vmem>>, vector<1x1x512xf32>
    %14 = vector.shape_cast %13 : vector<1x1x512xf32> to vector<1x512xf32>
    %15 = vector.broadcast %14 : vector<1x512xf32> to vector<16x512xf32>
    %16 = arith.addf %12, %15 : vector<16x512xf32>
    %cst_14 = arith.constant dense<0.000000e+00> : vector<16x128xf32>
    %17 = tpu.matmul %3, %1, %cst_14 {dimension_numbers = #tpu.dot_dimension_numbers<[1], [0], [0], [1], [0, 0, 1, 1], [], []>} : vector<16x16xf32>, vector<16x128xf32>, vector<16x128xf32> -> vector<16x128xf32>
    %18 = tpu.concatenate %17, %1 in 1 : vector<16x128xf32>, vector<16x128xf32> -> vector<16x256xf32>
    %cst_15 = arith.constant dense<0.000000e+00> : vector<16x512xf32>
    %19 = tpu.matmul %18, %7, %cst_15 {dimension_numbers = #tpu.dot_dimension_numbers<[1], [0], [0], [1], [0, 0, 1, 1], [], []>} : vector<16x256xf32>, vector<256x512xf32>, vector<16x512xf32> -> vector<16x512xf32>
    %20 = arith.addf %19, %16 : vector<16x512xf32>
    %21 = vector.extract_strided_slice %20 {offsets = [0, 0], sizes = [16, 128], strides = [1, 1]} : vector<16x512xf32> to vector<16x128xf32>
    %22 = arith.negf %21 : vector<16x128xf32>
    %23 = math.exp %22 : vector<16x128xf32>
    %cst_16 = arith.constant 1.000000e+00 : f32
    %24 = vector.broadcast %cst_16 : f32 to vector<16x128xf32>
    %25 = arith.addf %24, %23 : vector<16x128xf32>
    %26 = arith.divf %24, %25 : vector<16x128xf32>
    %27 = vector.extract_strided_slice %20 {offsets = [0, 128], sizes = [16, 128], strides = [1, 1]} : vector<16x512xf32> to vector<16x128xf32>
    %28 = arith.negf %27 : vector<16x128xf32>
    %29 = math.exp %28 : vector<16x128xf32>
    %cst_17 = arith.constant 1.000000e+00 : f32
    %30 = vector.broadcast %cst_17 : f32 to vector<16x128xf32>
    %31 = arith.addf %30, %29 : vector<16x128xf32>
    %32 = arith.divf %30, %31 : vector<16x128xf32>
    %33 = vector.extract_strided_slice %20 {offsets = [0, 256], sizes = [16, 128], strides = [1, 1]} : vector<16x512xf32> to vector<16x128xf32>
    %34 = vector.extract_strided_slice %20 {offsets = [0, 384], sizes = [16, 128], strides = [1, 1]} : vector<16x512xf32> to vector<16x128xf32>
    %35 = arith.mulf %26, %34 : vector<16x128xf32>
    %36 = arith.addf %33, %35 : vector<16x128xf32>
    %37 = math.tanh %36 : vector<16x128xf32>
    %cst_18 = arith.constant 1.000000e+00 : f32
    %38 = vector.broadcast %cst_18 : f32 to vector<16x128xf32>
    %39 = arith.subf %38, %32 : vector<16x128xf32>
    %40 = arith.mulf %39, %37 : vector<16x128xf32>
    %41 = arith.mulf %32, %1 : vector<16x128xf32>
    %42 = arith.addf %40, %41 : vector<16x128xf32>
    %cst_19 = arith.constant dense<0.000000e+00> : vector<16x128xf32>
    %43 = tpu.matmul %3, %42, %cst_19 {dimension_numbers = #tpu.dot_dimension_numbers<[1], [0], [0], [1], [0, 0, 1, 1], [], []>} : vector<16x16xf32>, vector<16x128xf32>, vector<16x128xf32> -> vector<16x128xf32>
    %44 = tpu.concatenate %43, %42 in 1 : vector<16x128xf32>, vector<16x128xf32> -> vector<16x256xf32>
    %cst_20 = arith.constant dense<0.000000e+00> : vector<16x512xf32>
    %45 = tpu.matmul %44, %7, %cst_20 {dimension_numbers = #tpu.dot_dimension_numbers<[1], [0], [0], [1], [0, 0, 1, 1], [], []>} : vector<16x256xf32>, vector<256x512xf32>, vector<16x512xf32> -> vector<16x512xf32>
    %46 = arith.addf %45, %16 : vector<16x512xf32>
    %47 = vector.extract_strided_slice %46 {offsets = [0, 0], sizes = [16, 128], strides = [1, 1]} : vector<16x512xf32> to vector<16x128xf32>
    %48 = arith.negf %47 : vector<16x128xf32>
    %49 = math.exp %48 : vector<16x128xf32>
    %cst_21 = arith.constant 1.000000e+00 : f32
    %50 = vector.broadcast %cst_21 : f32 to vector<16x128xf32>
    %51 = arith.addf %50, %49 : vector<16x128xf32>
    %52 = arith.divf %50, %51 : vector<16x128xf32>
    %53 = vector.extract_strided_slice %46 {offsets = [0, 128], sizes = [16, 128], strides = [1, 1]} : vector<16x512xf32> to vector<16x128xf32>
    %54 = arith.negf %53 : vector<16x128xf32>
    %55 = math.exp %54 : vector<16x128xf32>
    %cst_22 = arith.constant 1.000000e+00 : f32
    %56 = vector.broadcast %cst_22 : f32 to vector<16x128xf32>
    %57 = arith.addf %56, %55 : vector<16x128xf32>
    %58 = arith.divf %56, %57 : vector<16x128xf32>
    %59 = vector.extract_strided_slice %46 {offsets = [0, 256], sizes = [16, 128], strides = [1, 1]} : vector<16x512xf32> to vector<16x128xf32>
    %60 = vector.extract_strided_slice %46 {offsets = [0, 384], sizes = [16, 128], strides = [1, 1]} : vector<16x512xf32> to vector<16x128xf32>
    %61 = arith.mulf %52, %60 : vector<16x128xf32>
    %62 = arith.addf %59, %61 : vector<16x128xf32>
    %63 = math.tanh %62 : vector<16x128xf32>
    %cst_23 = arith.constant 1.000000e+00 : f32
    %64 = vector.broadcast %cst_23 : f32 to vector<16x128xf32>
    %65 = arith.subf %64, %58 : vector<16x128xf32>
    %66 = arith.mulf %65, %63 : vector<16x128xf32>
    %67 = arith.mulf %58, %42 : vector<16x128xf32>
    %68 = arith.addf %66, %67 : vector<16x128xf32>
    %cst_24 = arith.constant dense<0.000000e+00> : vector<16x128xf32>
    %69 = tpu.matmul %3, %68, %cst_24 {dimension_numbers = #tpu.dot_dimension_numbers<[1], [0], [0], [1], [0, 0, 1, 1], [], []>} : vector<16x16xf32>, vector<16x128xf32>, vector<16x128xf32> -> vector<16x128xf32>
    %70 = tpu.concatenate %69, %68 in 1 : vector<16x128xf32>, vector<16x128xf32> -> vector<16x256xf32>
    %cst_25 = arith.constant dense<0.000000e+00> : vector<16x512xf32>
    %71 = tpu.matmul %70, %7, %cst_25 {dimension_numbers = #tpu.dot_dimension_numbers<[1], [0], [0], [1], [0, 0, 1, 1], [], []>} : vector<16x256xf32>, vector<256x512xf32>, vector<16x512xf32> -> vector<16x512xf32>
    %72 = arith.addf %71, %16 : vector<16x512xf32>
    %73 = vector.extract_strided_slice %72 {offsets = [0, 0], sizes = [16, 128], strides = [1, 1]} : vector<16x512xf32> to vector<16x128xf32>
    %74 = arith.negf %73 : vector<16x128xf32>
    %75 = math.exp %74 : vector<16x128xf32>
    %cst_26 = arith.constant 1.000000e+00 : f32
    %76 = vector.broadcast %cst_26 : f32 to vector<16x128xf32>
    %77 = arith.addf %76, %75 : vector<16x128xf32>
    %78 = arith.divf %76, %77 : vector<16x128xf32>
    %79 = vector.extract_strided_slice %72 {offsets = [0, 128], sizes = [16, 128], strides = [1, 1]} : vector<16x512xf32> to vector<16x128xf32>
    %80 = arith.negf %79 : vector<16x128xf32>
    %81 = math.exp %80 : vector<16x128xf32>
    %cst_27 = arith.constant 1.000000e+00 : f32
    %82 = vector.broadcast %cst_27 : f32 to vector<16x128xf32>
    %83 = arith.addf %82, %81 : vector<16x128xf32>
    %84 = arith.divf %82, %83 : vector<16x128xf32>
    %85 = vector.extract_strided_slice %72 {offsets = [0, 256], sizes = [16, 128], strides = [1, 1]} : vector<16x512xf32> to vector<16x128xf32>
    %86 = vector.extract_strided_slice %72 {offsets = [0, 384], sizes = [16, 128], strides = [1, 1]} : vector<16x512xf32> to vector<16x128xf32>
    %87 = arith.mulf %78, %86 : vector<16x128xf32>
    %88 = arith.addf %85, %87 : vector<16x128xf32>
    %89 = math.tanh %88 : vector<16x128xf32>
    %cst_28 = arith.constant 1.000000e+00 : f32
    %90 = vector.broadcast %cst_28 : f32 to vector<16x128xf32>
    %91 = arith.subf %90, %84 : vector<16x128xf32>
    %92 = arith.mulf %91, %89 : vector<16x128xf32>
    %93 = arith.mulf %84, %68 : vector<16x128xf32>
    %94 = arith.addf %92, %93 : vector<16x128xf32>
    %cst_29 = arith.constant dense<0.000000e+00> : vector<16x128xf32>
    %95 = tpu.matmul %3, %94, %cst_29 {dimension_numbers = #tpu.dot_dimension_numbers<[1], [0], [0], [1], [0, 0, 1, 1], [], []>} : vector<16x16xf32>, vector<16x128xf32>, vector<16x128xf32> -> vector<16x128xf32>
    %96 = tpu.concatenate %95, %94 in 1 : vector<16x128xf32>, vector<16x128xf32> -> vector<16x256xf32>
    %cst_30 = arith.constant dense<0.000000e+00> : vector<16x512xf32>
    %97 = tpu.matmul %96, %7, %cst_30 {dimension_numbers = #tpu.dot_dimension_numbers<[1], [0], [0], [1], [0, 0, 1, 1], [], []>} : vector<16x256xf32>, vector<256x512xf32>, vector<16x512xf32> -> vector<16x512xf32>
    %98 = arith.addf %97, %16 : vector<16x512xf32>
    %99 = vector.extract_strided_slice %98 {offsets = [0, 0], sizes = [16, 128], strides = [1, 1]} : vector<16x512xf32> to vector<16x128xf32>
    %100 = arith.negf %99 : vector<16x128xf32>
    %101 = math.exp %100 : vector<16x128xf32>
    %cst_31 = arith.constant 1.000000e+00 : f32
    %102 = vector.broadcast %cst_31 : f32 to vector<16x128xf32>
    %103 = arith.addf %102, %101 : vector<16x128xf32>
    %104 = arith.divf %102, %103 : vector<16x128xf32>
    %105 = vector.extract_strided_slice %98 {offsets = [0, 128], sizes = [16, 128], strides = [1, 1]} : vector<16x512xf32> to vector<16x128xf32>
    %106 = arith.negf %105 : vector<16x128xf32>
    %107 = math.exp %106 : vector<16x128xf32>
    %cst_32 = arith.constant 1.000000e+00 : f32
    %108 = vector.broadcast %cst_32 : f32 to vector<16x128xf32>
    %109 = arith.addf %108, %107 : vector<16x128xf32>
    %110 = arith.divf %108, %109 : vector<16x128xf32>
    %111 = vector.extract_strided_slice %98 {offsets = [0, 256], sizes = [16, 128], strides = [1, 1]} : vector<16x512xf32> to vector<16x128xf32>
    %112 = vector.extract_strided_slice %98 {offsets = [0, 384], sizes = [16, 128], strides = [1, 1]} : vector<16x512xf32> to vector<16x128xf32>
    %113 = arith.mulf %104, %112 : vector<16x128xf32>
    %114 = arith.addf %111, %113 : vector<16x128xf32>
    %115 = math.tanh %114 : vector<16x128xf32>
    %cst_33 = arith.constant 1.000000e+00 : f32
    %116 = vector.broadcast %cst_33 : f32 to vector<16x128xf32>
    %117 = arith.subf %116, %110 : vector<16x128xf32>
    %118 = arith.mulf %117, %115 : vector<16x128xf32>
    %119 = arith.mulf %110, %94 : vector<16x128xf32>
    %120 = arith.addf %118, %119 : vector<16x128xf32>
    %cst_34 = arith.constant dense<0.000000e+00> : vector<16x128xf32>
    %121 = tpu.matmul %3, %120, %cst_34 {dimension_numbers = #tpu.dot_dimension_numbers<[1], [0], [0], [1], [0, 0, 1, 1], [], []>} : vector<16x16xf32>, vector<16x128xf32>, vector<16x128xf32> -> vector<16x128xf32>
    %122 = tpu.concatenate %121, %120 in 1 : vector<16x128xf32>, vector<16x128xf32> -> vector<16x256xf32>
    %cst_35 = arith.constant dense<0.000000e+00> : vector<16x512xf32>
    %123 = tpu.matmul %122, %7, %cst_35 {dimension_numbers = #tpu.dot_dimension_numbers<[1], [0], [0], [1], [0, 0, 1, 1], [], []>} : vector<16x256xf32>, vector<256x512xf32>, vector<16x512xf32> -> vector<16x512xf32>
    %124 = arith.addf %123, %16 : vector<16x512xf32>
    %125 = vector.extract_strided_slice %124 {offsets = [0, 0], sizes = [16, 128], strides = [1, 1]} : vector<16x512xf32> to vector<16x128xf32>
    %126 = arith.negf %125 : vector<16x128xf32>
    %127 = math.exp %126 : vector<16x128xf32>
    %cst_36 = arith.constant 1.000000e+00 : f32
    %128 = vector.broadcast %cst_36 : f32 to vector<16x128xf32>
    %129 = arith.addf %128, %127 : vector<16x128xf32>
    %130 = arith.divf %128, %129 : vector<16x128xf32>
    %131 = vector.extract_strided_slice %124 {offsets = [0, 128], sizes = [16, 128], strides = [1, 1]} : vector<16x512xf32> to vector<16x128xf32>
    %132 = arith.negf %131 : vector<16x128xf32>
    %133 = math.exp %132 : vector<16x128xf32>
    %cst_37 = arith.constant 1.000000e+00 : f32
    %134 = vector.broadcast %cst_37 : f32 to vector<16x128xf32>
    %135 = arith.addf %134, %133 : vector<16x128xf32>
    %136 = arith.divf %134, %135 : vector<16x128xf32>
    %137 = vector.extract_strided_slice %124 {offsets = [0, 256], sizes = [16, 128], strides = [1, 1]} : vector<16x512xf32> to vector<16x128xf32>
    %138 = vector.extract_strided_slice %124 {offsets = [0, 384], sizes = [16, 128], strides = [1, 1]} : vector<16x512xf32> to vector<16x128xf32>
    %139 = arith.mulf %130, %138 : vector<16x128xf32>
    %140 = arith.addf %137, %139 : vector<16x128xf32>
    %141 = math.tanh %140 : vector<16x128xf32>
    %cst_38 = arith.constant 1.000000e+00 : f32
    %142 = vector.broadcast %cst_38 : f32 to vector<16x128xf32>
    %143 = arith.subf %142, %136 : vector<16x128xf32>
    %144 = arith.mulf %143, %141 : vector<16x128xf32>
    %145 = arith.mulf %136, %120 : vector<16x128xf32>
    %146 = arith.addf %144, %145 : vector<16x128xf32>
    %c1 = arith.constant 1 : index
    %c0_39 = arith.constant 0 : index
    %c0_40 = arith.constant 0 : index
    %147 = vector.load %arg3[%c1, %c0_39, %c0_40] : memref<2x256x512xf32, #tpu.memory_space<vmem>>, vector<1x256x512xf32>
    %148 = vector.shape_cast %147 : vector<1x256x512xf32> to vector<256x512xf32>
    %c1_41 = arith.constant 1 : index
    %c0_42 = arith.constant 0 : index
    %c0_43 = arith.constant 0 : index
    %149 = vector.load %arg4[%c1_41, %c0_42, %c0_43] : memref<2x1x512xf32, #tpu.memory_space<vmem>>, vector<1x1x512xf32>
    %150 = vector.shape_cast %149 : vector<1x1x512xf32> to vector<1x512xf32>
    %151 = vector.broadcast %5 : vector<16x1xf32> to vector<16x512xf32>
    %152 = vector.broadcast %150 : vector<1x512xf32> to vector<16x512xf32>
    %153 = arith.mulf %151, %152 : vector<16x512xf32>
    %c1_44 = arith.constant 1 : index
    %c0_45 = arith.constant 0 : index
    %c0_46 = arith.constant 0 : index
    %154 = vector.load %arg5[%c1_44, %c0_45, %c0_46] : memref<2x1x512xf32, #tpu.memory_space<vmem>>, vector<1x1x512xf32>
    %155 = vector.shape_cast %154 : vector<1x1x512xf32> to vector<1x512xf32>
    %156 = vector.broadcast %155 : vector<1x512xf32> to vector<16x512xf32>
    %157 = arith.addf %153, %156 : vector<16x512xf32>
    %cst_47 = arith.constant dense<0.000000e+00> : vector<16x128xf32>
    %158 = tpu.matmul %3, %146, %cst_47 {dimension_numbers = #tpu.dot_dimension_numbers<[1], [0], [0], [1], [0, 0, 1, 1], [], []>} : vector<16x16xf32>, vector<16x128xf32>, vector<16x128xf32> -> vector<16x128xf32>
    %159 = tpu.concatenate %158, %146 in 1 : vector<16x128xf32>, vector<16x128xf32> -> vector<16x256xf32>
    %cst_48 = arith.constant dense<0.000000e+00> : vector<16x512xf32>
    %160 = tpu.matmul %159, %148, %cst_48 {dimension_numbers = #tpu.dot_dimension_numbers<[1], [0], [0], [1], [0, 0, 1, 1], [], []>} : vector<16x256xf32>, vector<256x512xf32>, vector<16x512xf32> -> vector<16x512xf32>
    %161 = arith.addf %160, %157 : vector<16x512xf32>
    %162 = vector.extract_strided_slice %161 {offsets = [0, 0], sizes = [16, 128], strides = [1, 1]} : vector<16x512xf32> to vector<16x128xf32>
    %163 = arith.negf %162 : vector<16x128xf32>
    %164 = math.exp %163 : vector<16x128xf32>
    %cst_49 = arith.constant 1.000000e+00 : f32
    %165 = vector.broadcast %cst_49 : f32 to vector<16x128xf32>
    %166 = arith.addf %165, %164 : vector<16x128xf32>
    %167 = arith.divf %165, %166 : vector<16x128xf32>
    %168 = vector.extract_strided_slice %161 {offsets = [0, 128], sizes = [16, 128], strides = [1, 1]} : vector<16x512xf32> to vector<16x128xf32>
    %169 = arith.negf %168 : vector<16x128xf32>
    %170 = math.exp %169 : vector<16x128xf32>
    %cst_50 = arith.constant 1.000000e+00 : f32
    %171 = vector.broadcast %cst_50 : f32 to vector<16x128xf32>
    %172 = arith.addf %171, %170 : vector<16x128xf32>
    %173 = arith.divf %171, %172 : vector<16x128xf32>
    %174 = vector.extract_strided_slice %161 {offsets = [0, 256], sizes = [16, 128], strides = [1, 1]} : vector<16x512xf32> to vector<16x128xf32>
    %175 = vector.extract_strided_slice %161 {offsets = [0, 384], sizes = [16, 128], strides = [1, 1]} : vector<16x512xf32> to vector<16x128xf32>
    %176 = arith.mulf %167, %175 : vector<16x128xf32>
    %177 = arith.addf %174, %176 : vector<16x128xf32>
    %178 = math.tanh %177 : vector<16x128xf32>
    %cst_51 = arith.constant 1.000000e+00 : f32
    %179 = vector.broadcast %cst_51 : f32 to vector<16x128xf32>
    %180 = arith.subf %179, %173 : vector<16x128xf32>
    %181 = arith.mulf %180, %178 : vector<16x128xf32>
    %182 = arith.mulf %173, %146 : vector<16x128xf32>
    %183 = arith.addf %181, %182 : vector<16x128xf32>
    %cst_52 = arith.constant dense<0.000000e+00> : vector<16x128xf32>
    %184 = tpu.matmul %3, %183, %cst_52 {dimension_numbers = #tpu.dot_dimension_numbers<[1], [0], [0], [1], [0, 0, 1, 1], [], []>} : vector<16x16xf32>, vector<16x128xf32>, vector<16x128xf32> -> vector<16x128xf32>
    %185 = tpu.concatenate %184, %183 in 1 : vector<16x128xf32>, vector<16x128xf32> -> vector<16x256xf32>
    %cst_53 = arith.constant dense<0.000000e+00> : vector<16x512xf32>
    %186 = tpu.matmul %185, %148, %cst_53 {dimension_numbers = #tpu.dot_dimension_numbers<[1], [0], [0], [1], [0, 0, 1, 1], [], []>} : vector<16x256xf32>, vector<256x512xf32>, vector<16x512xf32> -> vector<16x512xf32>
    %187 = arith.addf %186, %157 : vector<16x512xf32>
    %188 = vector.extract_strided_slice %187 {offsets = [0, 0], sizes = [16, 128], strides = [1, 1]} : vector<16x512xf32> to vector<16x128xf32>
    %189 = arith.negf %188 : vector<16x128xf32>
    %190 = math.exp %189 : vector<16x128xf32>
    %cst_54 = arith.constant 1.000000e+00 : f32
    %191 = vector.broadcast %cst_54 : f32 to vector<16x128xf32>
    %192 = arith.addf %191, %190 : vector<16x128xf32>
    %193 = arith.divf %191, %192 : vector<16x128xf32>
    %194 = vector.extract_strided_slice %187 {offsets = [0, 128], sizes = [16, 128], strides = [1, 1]} : vector<16x512xf32> to vector<16x128xf32>
    %195 = arith.negf %194 : vector<16x128xf32>
    %196 = math.exp %195 : vector<16x128xf32>
    %cst_55 = arith.constant 1.000000e+00 : f32
    %197 = vector.broadcast %cst_55 : f32 to vector<16x128xf32>
    %198 = arith.addf %197, %196 : vector<16x128xf32>
    %199 = arith.divf %197, %198 : vector<16x128xf32>
    %200 = vector.extract_strided_slice %187 {offsets = [0, 256], sizes = [16, 128], strides = [1, 1]} : vector<16x512xf32> to vector<16x128xf32>
    %201 = vector.extract_strided_slice %187 {offsets = [0, 384], sizes = [16, 128], strides = [1, 1]} : vector<16x512xf32> to vector<16x128xf32>
    %202 = arith.mulf %193, %201 : vector<16x128xf32>
    %203 = arith.addf %200, %202 : vector<16x128xf32>
    %204 = math.tanh %203 : vector<16x128xf32>
    %cst_56 = arith.constant 1.000000e+00 : f32
    %205 = vector.broadcast %cst_56 : f32 to vector<16x128xf32>
    %206 = arith.subf %205, %199 : vector<16x128xf32>
    %207 = arith.mulf %206, %204 : vector<16x128xf32>
    %208 = arith.mulf %199, %183 : vector<16x128xf32>
    %209 = arith.addf %207, %208 : vector<16x128xf32>
    %cst_57 = arith.constant dense<0.000000e+00> : vector<16x128xf32>
    %210 = tpu.matmul %3, %209, %cst_57 {dimension_numbers = #tpu.dot_dimension_numbers<[1], [0], [0], [1], [0, 0, 1, 1], [], []>} : vector<16x16xf32>, vector<16x128xf32>, vector<16x128xf32> -> vector<16x128xf32>
    %211 = tpu.concatenate %210, %209 in 1 : vector<16x128xf32>, vector<16x128xf32> -> vector<16x256xf32>
    %cst_58 = arith.constant dense<0.000000e+00> : vector<16x512xf32>
    %212 = tpu.matmul %211, %148, %cst_58 {dimension_numbers = #tpu.dot_dimension_numbers<[1], [0], [0], [1], [0, 0, 1, 1], [], []>} : vector<16x256xf32>, vector<256x512xf32>, vector<16x512xf32> -> vector<16x512xf32>
    %213 = arith.addf %212, %157 : vector<16x512xf32>
    %214 = vector.extract_strided_slice %213 {offsets = [0, 0], sizes = [16, 128], strides = [1, 1]} : vector<16x512xf32> to vector<16x128xf32>
    %215 = arith.negf %214 : vector<16x128xf32>
    %216 = math.exp %215 : vector<16x128xf32>
    %cst_59 = arith.constant 1.000000e+00 : f32
    %217 = vector.broadcast %cst_59 : f32 to vector<16x128xf32>
    %218 = arith.addf %217, %216 : vector<16x128xf32>
    %219 = arith.divf %217, %218 : vector<16x128xf32>
    %220 = vector.extract_strided_slice %213 {offsets = [0, 128], sizes = [16, 128], strides = [1, 1]} : vector<16x512xf32> to vector<16x128xf32>
    %221 = arith.negf %220 : vector<16x128xf32>
    %222 = math.exp %221 : vector<16x128xf32>
    %cst_60 = arith.constant 1.000000e+00 : f32
    %223 = vector.broadcast %cst_60 : f32 to vector<16x128xf32>
    %224 = arith.addf %223, %222 : vector<16x128xf32>
    %225 = arith.divf %223, %224 : vector<16x128xf32>
    %226 = vector.extract_strided_slice %213 {offsets = [0, 256], sizes = [16, 128], strides = [1, 1]} : vector<16x512xf32> to vector<16x128xf32>
    %227 = vector.extract_strided_slice %213 {offsets = [0, 384], sizes = [16, 128], strides = [1, 1]} : vector<16x512xf32> to vector<16x128xf32>
    %228 = arith.mulf %219, %227 : vector<16x128xf32>
    %229 = arith.addf %226, %228 : vector<16x128xf32>
    %230 = math.tanh %229 : vector<16x128xf32>
    %cst_61 = arith.constant 1.000000e+00 : f32
    %231 = vector.broadcast %cst_61 : f32 to vector<16x128xf32>
    %232 = arith.subf %231, %225 : vector<16x128xf32>
    %233 = arith.mulf %232, %230 : vector<16x128xf32>
    %234 = arith.mulf %225, %209 : vector<16x128xf32>
    %235 = arith.addf %233, %234 : vector<16x128xf32>
    %cst_62 = arith.constant dense<0.000000e+00> : vector<16x128xf32>
    %236 = tpu.matmul %3, %235, %cst_62 {dimension_numbers = #tpu.dot_dimension_numbers<[1], [0], [0], [1], [0, 0, 1, 1], [], []>} : vector<16x16xf32>, vector<16x128xf32>, vector<16x128xf32> -> vector<16x128xf32>
    %237 = tpu.concatenate %236, %235 in 1 : vector<16x128xf32>, vector<16x128xf32> -> vector<16x256xf32>
    %cst_63 = arith.constant dense<0.000000e+00> : vector<16x512xf32>
    %238 = tpu.matmul %237, %148, %cst_63 {dimension_numbers = #tpu.dot_dimension_numbers<[1], [0], [0], [1], [0, 0, 1, 1], [], []>} : vector<16x256xf32>, vector<256x512xf32>, vector<16x512xf32> -> vector<16x512xf32>
    %239 = arith.addf %238, %157 : vector<16x512xf32>
    %240 = vector.extract_strided_slice %239 {offsets = [0, 0], sizes = [16, 128], strides = [1, 1]} : vector<16x512xf32> to vector<16x128xf32>
    %241 = arith.negf %240 : vector<16x128xf32>
    %242 = math.exp %241 : vector<16x128xf32>
    %cst_64 = arith.constant 1.000000e+00 : f32
    %243 = vector.broadcast %cst_64 : f32 to vector<16x128xf32>
    %244 = arith.addf %243, %242 : vector<16x128xf32>
    %245 = arith.divf %243, %244 : vector<16x128xf32>
    %246 = vector.extract_strided_slice %239 {offsets = [0, 128], sizes = [16, 128], strides = [1, 1]} : vector<16x512xf32> to vector<16x128xf32>
    %247 = arith.negf %246 : vector<16x128xf32>
    %248 = math.exp %247 : vector<16x128xf32>
    %cst_65 = arith.constant 1.000000e+00 : f32
    %249 = vector.broadcast %cst_65 : f32 to vector<16x128xf32>
    %250 = arith.addf %249, %248 : vector<16x128xf32>
    %251 = arith.divf %249, %250 : vector<16x128xf32>
    %252 = vector.extract_strided_slice %239 {offsets = [0, 256], sizes = [16, 128], strides = [1, 1]} : vector<16x512xf32> to vector<16x128xf32>
    %253 = vector.extract_strided_slice %239 {offsets = [0, 384], sizes = [16, 128], strides = [1, 1]} : vector<16x512xf32> to vector<16x128xf32>
    %254 = arith.mulf %245, %253 : vector<16x128xf32>
    %255 = arith.addf %252, %254 : vector<16x128xf32>
    %256 = math.tanh %255 : vector<16x128xf32>
    %cst_66 = arith.constant 1.000000e+00 : f32
    %257 = vector.broadcast %cst_66 : f32 to vector<16x128xf32>
    %258 = arith.subf %257, %251 : vector<16x128xf32>
    %259 = arith.mulf %258, %256 : vector<16x128xf32>
    %260 = arith.mulf %251, %235 : vector<16x128xf32>
    %261 = arith.addf %259, %260 : vector<16x128xf32>
    %cst_67 = arith.constant dense<0.000000e+00> : vector<16x128xf32>
    %262 = tpu.matmul %3, %261, %cst_67 {dimension_numbers = #tpu.dot_dimension_numbers<[1], [0], [0], [1], [0, 0, 1, 1], [], []>} : vector<16x16xf32>, vector<16x128xf32>, vector<16x128xf32> -> vector<16x128xf32>
    %263 = tpu.concatenate %262, %261 in 1 : vector<16x128xf32>, vector<16x128xf32> -> vector<16x256xf32>
    %cst_68 = arith.constant dense<0.000000e+00> : vector<16x512xf32>
    %264 = tpu.matmul %263, %148, %cst_68 {dimension_numbers = #tpu.dot_dimension_numbers<[1], [0], [0], [1], [0, 0, 1, 1], [], []>} : vector<16x256xf32>, vector<256x512xf32>, vector<16x512xf32> -> vector<16x512xf32>
    %265 = arith.addf %264, %157 : vector<16x512xf32>
    %266 = vector.extract_strided_slice %265 {offsets = [0, 0], sizes = [16, 128], strides = [1, 1]} : vector<16x512xf32> to vector<16x128xf32>
    %267 = arith.negf %266 : vector<16x128xf32>
    %268 = math.exp %267 : vector<16x128xf32>
    %cst_69 = arith.constant 1.000000e+00 : f32
    %269 = vector.broadcast %cst_69 : f32 to vector<16x128xf32>
    %270 = arith.addf %269, %268 : vector<16x128xf32>
    %271 = arith.divf %269, %270 : vector<16x128xf32>
    %272 = vector.extract_strided_slice %265 {offsets = [0, 128], sizes = [16, 128], strides = [1, 1]} : vector<16x512xf32> to vector<16x128xf32>
    %273 = arith.negf %272 : vector<16x128xf32>
    %274 = math.exp %273 : vector<16x128xf32>
    %cst_70 = arith.constant 1.000000e+00 : f32
    %275 = vector.broadcast %cst_70 : f32 to vector<16x128xf32>
    %276 = arith.addf %275, %274 : vector<16x128xf32>
    %277 = arith.divf %275, %276 : vector<16x128xf32>
    %278 = vector.extract_strided_slice %265 {offsets = [0, 256], sizes = [16, 128], strides = [1, 1]} : vector<16x512xf32> to vector<16x128xf32>
    %279 = vector.extract_strided_slice %265 {offsets = [0, 384], sizes = [16, 128], strides = [1, 1]} : vector<16x512xf32> to vector<16x128xf32>
    %280 = arith.mulf %271, %279 : vector<16x128xf32>
    %281 = arith.addf %278, %280 : vector<16x128xf32>
    %282 = math.tanh %281 : vector<16x128xf32>
    %cst_71 = arith.constant 1.000000e+00 : f32
    %283 = vector.broadcast %cst_71 : f32 to vector<16x128xf32>
    %284 = arith.subf %283, %277 : vector<16x128xf32>
    %285 = arith.mulf %284, %282 : vector<16x128xf32>
    %286 = arith.mulf %277, %261 : vector<16x128xf32>
    %287 = arith.addf %285, %286 : vector<16x128xf32>
    %c0_72 = arith.constant 0 : index
    %c0_73 = arith.constant 0 : index
    %288 = vector.load %arg6[%c0_72, %c0_73] : memref<128x128xf32, #tpu.memory_space<vmem>>, vector<128x128xf32>
    %cst_74 = arith.constant dense<0.000000e+00> : vector<16x128xf32>
    %289 = tpu.matmul %287, %288, %cst_74 {dimension_numbers = #tpu.dot_dimension_numbers<[1], [0], [0], [1], [0, 0, 1, 1], [], []>} : vector<16x128xf32>, vector<128x128xf32>, vector<16x128xf32> -> vector<16x128xf32>
    %c0_75 = arith.constant 0 : index
    %c0_76 = arith.constant 0 : index
    %290 = vector.load %arg7[%c0_75, %c0_76] : memref<1x128xf32, #tpu.memory_space<vmem>>, vector<1x128xf32>
    %291 = vector.broadcast %290 : vector<1x128xf32> to vector<16x128xf32>
    %292 = arith.addf %289, %291 : vector<16x128xf32>
    %c0_77 = arith.constant 0 : index
    %c0_78 = arith.constant 0 : index
    %c0_79 = arith.constant 0 : index
    %293 = vector.load %arg8[%c0_77, %c0_78, %c0_79] : memref<1x16x128xf32, #tpu.memory_space<vmem>>, vector<1x16x128xf32>
    %294 = vector.shape_cast %293 : vector<1x16x128xf32> to vector<16x128xf32>
    %295 = vector.shape_cast %292 : vector<16x128xf32> to vector<1x16x128xf32>
    tpu.vector_store %arg8[%c0_77, %c0_78, %c0_79], %295 {strides = array<i32>} : memref<1x16x128xf32, #tpu.memory_space<vmem>>, vector<1x16x128xf32>,
    return
  }
  func.func @transform_0(%arg0: i32) -> (i32, i32, i32) {
    %c0_i32 = arith.constant 0 : i32
    %c0_i32_0 = arith.constant 0 : i32
    %c0_i32_1 = arith.constant 0 : i32
    return %arg0, %c0_i32, %c0_i32_0 : i32, i32, i32
  }
  func.func @transform_1(%arg0: i32) -> (i32, i32, i32) {
    %c0_i32 = arith.constant 0 : i32
    %c0_i32_0 = arith.constant 0 : i32
    %c0_i32_1 = arith.constant 0 : i32
    return %arg0, %c0_i32, %c0_i32_0 : i32, i32, i32
  }
  func.func @transform_2(%arg0: i32) -> (i32, i32, i32) {
    %c0_i32 = arith.constant 0 : i32
    %c0_i32_0 = arith.constant 0 : i32
    %c0_i32_1 = arith.constant 0 : i32
    %c0_i32_2 = arith.constant 0 : i32
    return %c0_i32, %c0_i32_0, %c0_i32_1 : i32, i32, i32
  }
  func.func @transform_3(%arg0: i32) -> (i32, i32, i32) {
    %c0_i32 = arith.constant 0 : i32
    %c0_i32_0 = arith.constant 0 : i32
    %c0_i32_1 = arith.constant 0 : i32
    %c0_i32_2 = arith.constant 0 : i32
    return %c0_i32, %c0_i32_0, %c0_i32_1 : i32, i32, i32
  }
  func.func @transform_4(%arg0: i32) -> (i32, i32, i32) {
    %c0_i32 = arith.constant 0 : i32
    %c0_i32_0 = arith.constant 0 : i32
    %c0_i32_1 = arith.constant 0 : i32
    %c0_i32_2 = arith.constant 0 : i32
    return %c0_i32, %c0_i32_0, %c0_i32_1 : i32, i32, i32
  }
  func.func @transform_5(%arg0: i32) -> (i32, i32) {
    %c0_i32 = arith.constant 0 : i32
    %c0_i32_0 = arith.constant 0 : i32
    %c0_i32_1 = arith.constant 0 : i32
    return %c0_i32, %c0_i32_0 : i32, i32
  }
  func.func @transform_6(%arg0: i32) -> (i32, i32) {
    %c0_i32 = arith.constant 0 : i32
    %c0_i32_0 = arith.constant 0 : i32
    %c0_i32_1 = arith.constant 0 : i32
    return %c0_i32, %c0_i32_0 : i32, i32
  }
  func.func @transform_7(%arg0: i32) -> (i32, i32, i32) {
    %c0_i32 = arith.constant 0 : i32
    %c0_i32_0 = arith.constant 0 : i32
    %c0_i32_1 = arith.constant 0 : i32
    return %arg0, %c0_i32, %c0_i32_0 : i32, i32, i32
  }
}

</mosaic_0001>

<bundles_post_ra>
// kernel: tpu_custom_call.1
= control target key start
LH: loop header
LB: loop body
LE: loop exit
PB: predicated region body
PF: predicated region fallthrough
CT: control target
= control target key end

     0   :  { %s7749_s0 = inlined_call_operand.hbm [shape: f32[4,16,128], index: 0, kind: input, shape index: {}]   ;;  %s7750_s1 = inlined_call_operand.hbm [shape: f32[4,16,16], index: 1, kind: input, shape index: {}]   ;;  %s7751_s2 = inlined_call_operand.hbm [shape: f32[2,256,512], index: 2, kind: input, shape index: {}]   ;;  %s7752_s3 = inlined_call_operand.hbm [shape: f32[2,1,512], index: 3, kind: input, shape index: {}]   ;;  %s7753_s4 = inlined_call_operand.hbm [shape: f32[2,1,512], index: 4, kind: input, shape index: {}]   ;;  %s7754_s5 = inlined_call_operand.hbm [shape: f32[128,128], index: 5, kind: input, shape index: {}]   ;;  %s7755_s6 = inlined_call_operand.vmem [shape: f32[1,128], index: 6, kind: input, shape index: {}]   ;;  %s7756_s7 = inlined_call_operand.hbm [shape: f32[4,16,128], index: 7, kind: output, shape index: {}]  }
   0x1   :  { %8279 = sst [smem:[#allocation117_spill]] %s7749_s0 }
   0x2   :  { %8280 = sst [smem:[#allocation118_spill]] %s7751_s2 }
   0x3   :  { %8281 = sst [smem:[#allocation119_spill]] %s7752_s3 }
   0x4   :  { %8282 = sst [smem:[#allocation120_spill]] %s7753_s4 }
   0x5   :  { %12 = vsyncpa [#allocation3], 0 }
   0x6   :  { %14 = vsyncpa [#allocation3 + $0x1], 0 }
   0x7   :  { %15 = vsyncpa [#allocation6], 0 }
   0x8   :  { %17 = vsyncpa [#allocation6 + $0x1], 0 }
   0x9   :  { %18 = vsyncpa [#allocation9], 0 }
   0xa   :  { %19 = vsyncpa [#allocation12], 0 }
   0xb   :  { %20 = vsyncpa [#allocation4], 0 }
   0xc   :  { %22 = vsyncpa [#allocation4 + $0x1], 0  ;;  %s4829_s24 = smov 0   ;;  %s4831_s25 = smov 0  }
   0xd   :  { %s4833_s26 = smov 0   ;;  %s4835_s27 = smov 0  }
   0xe LB: > { %s4850_s28 = sadd.s32 4294967295, %s4772_s27   ;;  %s3709_s29 = sadd.s32 4294967294, %s4772_s27   ;;  %s4772_s27 = sphi %s4835_s27, %s9069_s27   ;;  %s4768_s26 = sphi %s4833_s26, %s9068_s26   ;;  %s4764_s25 = sphi %s4831_s25, %s9067_s25   ;;  %s4760_s24 = sphi %s4829_s24, %s9066_s24  }
   0xf   : > { %p48_p0 = scmp.ne.s32.totalorder %s4764_s25, %s4760_s24  ;;  %p7757_p1 = scmp.eq.s32.totalorder %s4850_s28, 0 }
  0x10   : > { %p209_p3 = scmp.eq.s32.totalorder %s3709_s29, 3  ;;  %p3710_p5 = scmp.ge.s32.totalorder %s4772_s27, 1 }
  0x11   : > { %p4859_p4 = por %p7757_p1, %p48_p0  ;;  %p216_p7 = scmp.lt.s32.totalorder %s4772_s27, 5 }
  0x12   : > { %p4864_p6 = por %p209_p3, %p48_p0  ;;  %s4774_s10 = smov [#allocation7]  }
  0x13   : > { %s8283_s30 = scalar_select %p4859_p4, 1, 0 }
  0x14   : > { %s8284_s8 = scalar_select %p4864_p6, 1, 0 }
  0x15   : > { %p4869_p8 = pnand %p3710_p5, %p216_p7  ;;  %s228_s11 = sshll.u32 %s4774_s10, 4  ;;  %s229_s11 = int_to_ptr.vmem [resolvable:$true] %s228_s11 }
  0x16   : > { %s4775_s13 = smov [#allocation8]   ;;  %s4543_s15 = scalar_lea.vmem %s229_s11, 32768 }
  0x17   : > { %s8285_s9 = scalar_select %p4869_p8, 1, 0 }
  0x18   : > { %p3984_p9 = pneg %p4869_p8  ;;  %s241_s14 = sshll.u32 %s4775_s13, 4  ;;  %s242_s14 = int_to_ptr.vmem [resolvable:$true] %s241_s14 }
  0x19   : > { %p4544_p12 = scmp.ne.s32.totalorder %s229_s11, %s4543_s15  ;;  %p4551_p3 = scmp.lt.s32.totalorder %s229_s11, %s229_s11 }
  0x1a   : > { %p4877_p10 = pnand %p3984_p9, %p7757_p1  ;;  %p4552_p5 = scmp.lt.s32.totalorder %s4543_s15, %s4543_s15 }
  0x1c   : > { %p4534_p11 = pneg %p4877_p10  ;;  %p4553_p7 = por %p4552_p5, %p4551_p3 }
  0x1e   : > { %p4546_p13 = pnand %p4544_p12, %p4534_p11 }
  0x20   : > { %p4547_p0 = pneg %p4546_p13 }
  0x22   : > { %p4554_p9 = pnand %p4553_p7, %p4547_p0 }
  0x24   : > { %4557 = shalt.err (!%p4554_p9)
}
  0x25   : > { %s4776_s16 = smov 512   ;;  %s4777_s17 = smov 32  }
  0x26   : > { %s8287_s2 = sld [smem:[#allocation118_spill]]  ;;  %s4569_s20 = scalar_lea.vmem %s242_s14, 128 }
  0x27   : > { %p4570_p1 = scmp.ne.s32.totalorder %s242_s14, %s4569_s20  ;;  %p4577_p2 = scmp.lt.s32.totalorder %s242_s14, %s242_s14 }
  0x28   : > { %p4578_p6 = scmp.lt.s32.totalorder %s4569_s20, %s4569_s20 }
  0x29   : > { %p4572_p12 = pnand %p4570_p1, %p4534_p11 }
  0x2a   : > { %p4579_p3 = por %p4578_p6, %p4577_p2 }
  0x2b   : > { %p4573_p13 = pneg %p4572_p12 }
  0x2c   : > { %3987 = dma.hbm_to_vmem [thread:$0]  (!%p4877_p10), %s8287_s2, 32768, %s229_s11, [#allocation6], %s4776_s16, %s4776_s16, %s4777_s17  }
  0x2d   : > { %p4580_p0 = pnand %p4579_p3, %p4573_p13 }
  0x2f   : > { %4583 = shalt.err (!%p4580_p0)
}
  0x30   : > { %s4778_s21 = smov 64   ;;  %s4779_s22 = smov 4  }
  0x31   : > { %s8288_s3 = sld [smem:[#allocation119_spill]]  ;;  %s4780_s10 = smov [#allocation10]  }
  0x32   : > { %s254_s11 = sshll.u32 %s4780_s10, 4  ;;  %s4781_s13 = smov [#allocation11]   ;;  %s255_s11 = int_to_ptr.vmem [resolvable:$true] %s254_s11 }
  0x33   : > { %s267_s15 = sshll.u32 %s4781_s13, 4  ;;  %s4595_s16 = scalar_lea.vmem %s255_s11, 128  ;;  %s268_s15 = int_to_ptr.vmem [resolvable:$true] %s267_s15 }
  0x34   : > { %p4596_p1 = scmp.ne.s32.totalorder %s255_s11, %s4595_s16  ;;  %p4603_p5 = scmp.lt.s32.totalorder %s255_s11, %s255_s11 }
  0x35   : > { %p4604_p7 = scmp.lt.s32.totalorder %s4595_s16, %s4595_s16 }
  0x36   : > { %p4598_p2 = pnand %p4596_p1, %p4534_p11 }
  0x37   : > { %3990 = dma.hbm_to_vmem [thread:$0]  (!%p4877_p10), %s8288_s3, 128, %s242_s14, [#allocation9], %s4778_s21, %s4778_s21, %s4779_s22  }
  0x38   : > { %p4599_p6 = pneg %p4598_p2  ;;  %p4605_p9 = por %p4604_p7, %p4603_p5 }
  0x3a   : > { %p4606_p12 = pnand %p4605_p9, %p4599_p6 }
  0x3c   : > { %4609 = shalt.err (!%p4606_p12)
}
  0x3d   : > { %s8289_s4 = sld [smem:[#allocation120_spill]]  ;;  %s4621_s18 = scalar_lea.vmem %s268_s15, 2048 }
  0x3e   : > { %p4622_p13 = scmp.ne.s32.totalorder %s268_s15, %s4621_s18  ;;  %p4629_p1 = scmp.lt.s32.totalorder %s268_s15, %s268_s15 }
  0x3f   : > { %p4630_p2 = scmp.lt.s32.totalorder %s4621_s18, %s4621_s18 }
  0x40   : > { %p4624_p3 = pnand %p4622_p13, %p4534_p11 }
  0x41   : > { %p4631_p4 = por %p4630_p2, %p4629_p1 }
  0x42   : > { %p4625_p0 = pneg %p4624_p3 }
  0x43   : > { %3993 = dma.hbm_to_vmem [thread:$0]  (!%p4877_p10), %s8289_s4, 128, %s255_s11, [#allocation9], %s4778_s21, %s4778_s21, %s4779_s22  }
  0x44   : > { %p4632_p8 = pnand %p4631_p4, %p4625_p0 }
  0x46   : > { %4635 = shalt.err (!%p4632_p8)
}
  0x47   : > { %s7760_s19 = smov 128   ;;  %s7762_s20 = smov 8  }
  0x48   : > { %3996 = dma.hbm_to_vmem [thread:$0]  (!%p4877_p10), %s7754_s5, 2048, %s268_s15, [#allocation12], %s7760_s19, %s7760_s19, %s7762_s20  }
  0x49   : > { %s4919_s23 = sadd.s32 1, %s4772_s27   ;;  %s35_s10 = sadd.s32 1, %s4768_s26 }
  0x4a   : > { %s32_s29 = ssub.s32 %s4772_s27, %s4919_s23  ;;  %p42_p8 = scmp.ne.s32.totalorder %s4768_s26, %s4764_s25 }
  0x4b   : > { %p33_p4 = scmp.eq.s32.totalorder %s32_s29, 0  ;;  %p43_p11 = scmp.eq.s32.totalorder %s4772_s27, 0 }
  0x4c   : > { %p8290_p5 = scmp.eq.s32.totalorder %s4850_s28, 3  ;;  %p4012_p9 = scmp.lt.s32.totalorder %s4772_s27, 4 }
  0x4d   : > { %s4928_s11 = scalar_select %p33_p4, %s4768_s26, %s35_s10  }
  0x4e   : > { %p44_p6 = por %p43_p11, %p42_p8  ;;  %p4932_p7 = por %p8290_p5, %p42_p8 }
  0x4f   : > { %s284_s13 = sand.u32 1, %s4768_s26   ;;  %s3796_s15 = sshll.u32 %s4772_s27, 8 }
  0x50   : > { %s3716_s16 = sshll.u32 %s284_s13, 4  ;;  %s8292_s0 = sld [smem:[#allocation117_spill]] }
  0x51   : > { %s288_s21 = scalar_lea.vmem [#allocation2], %s3716_s16  ;;  %p4946_p10 = pnand %p4012_p9, %p44_p6 }
  0x52   : > { %s295_s22 = sshll.u32 %s288_s21, 4  ;;  %s4953_s20 = scalar_lea.hbm %s7750_s1, %s3796_s15  ;;  %s4944_s22 = int_to_ptr.vmem [resolvable:$true] %s295_s22 }
  0x53   : > { %s309_s14 = scalar_lea.vmem [#allocation5], %s3716_s16  ;;  %s4957_s2 = scalar_lea.sflag [#allocation3], %s284_s13 }
  0x54   : > { %s4955_s17 = sshll.u32 %s309_s14, 4  ;;  %p4638_p13 = pneg %p4946_p10  ;;  %s4988_s17 = int_to_ptr.vmem [resolvable:$true] %s4955_s17 }
  0x56   : > { %s4942_s18 = scalar_lea.hbm %s8292_s0, %s3796_s15  ;;  %s4641_s19 = scalar_lea.hbm %s8292_s0, 1024 }
  0x57   : > { %s4636_s3 = scalar_lea.hbm %s4942_s18, 256  ;;  %p4642_p1 = scmp.lt.s32.totalorder %s4942_s18, %s8292_s0 }
  0x58   : > { %p4637_p12 = scmp.ne.s32.totalorder %s4942_s18, %s4636_s3  ;;  %p4643_p2 = scmp.lt.s32.totalorder %s4641_s19, %s4636_s3 }
  0x5a   : > { %p4639_p3 = pnand %p4638_p13, %p4637_p12  ;;  %p4644_p4 = por %p4643_p2, %p4642_p1 }
  0x5c   : > { %p4640_p0 = pneg %p4639_p3 }
  0x5e   : > { %p4645_p8 = pnand %p4644_p4, %p4640_p0 }
  0x60   : > { %4648 = shalt.err (!%p4645_p8)
}
  0x61   : > { %s4649_s13 = scalar_lea.vmem %s4944_s22, 256  ;;  %s4784_s4 = smov [#allocation2]  }
  0x62   : > { %p4650_p11 = scmp.ne.s32.totalorder %s4944_s22, %s4649_s13  ;;  %s4654_s16 = sshll.u32 %s4784_s4, 4  ;;  %s4655_s16 = int_to_ptr.vmem [resolvable:$false] %s4654_s16 }
  0x63   : > { %s4656_s14 = scalar_lea.vmem %s4655_s16, 512  ;;  %p4657_p9 = scmp.lt.s32.totalorder %s4944_s22, %s4655_s16 }
  0x64   : > { %p4652_p6 = pnand %p4650_p11, %p4638_p13  ;;  %p4658_p12 = scmp.lt.s32.totalorder %s4656_s14, %s4649_s13 }
  0x66   : > { %p4653_p5 = pneg %p4652_p6  ;;  %p4659_p3 = por %p4658_p12, %p4657_p9 }
  0x68   : > { %p4660_p1 = pnand %p4659_p3, %p4653_p5 }
  0x6a   : > { %4663 = shalt.err (!%p4660_p1)
}
  0x6b   : > { %s8294_s3 = smov 8   ;;  %s8295_s21 = smov 128  }
  0x6c   : > { %4000 = dma.hbm_to_vmem [thread:$0]  (!%p4946_p10), %s4942_s18, 256, %s4944_s22, %s4957_s2, %s8295_s21, %s8295_s21, %s8294_s3  }
  0x6d   : > { %s305_s19 = sand.u32 1, %s4772_s27   ;;  %s4664_s15 = scalar_lea.hbm %s4953_s20, 256 }
  0x6e   : > { %s306_s10 = scalar_lea.sflag [#allocation6], %s305_s19  ;;  %p4665_p0 = scmp.ne.s32.totalorder %s4953_s20, %s4664_s15 }
  0x6f   : > { %s4669_s16 = scalar_lea.hbm %s7750_s1, 1024  ;;  %p4670_p8 = scmp.lt.s32.totalorder %s4953_s20, %s7750_s1 }
  0x70   : > { %p4667_p2 = pnand %p4665_p0, %p4638_p13  ;;  %p4671_p11 = scmp.lt.s32.totalorder %s4669_s16, %s4664_s15 }
  0x72   : > { %p4668_p4 = pneg %p4667_p2  ;;  %p4672_p6 = por %p4671_p11, %p4670_p8 }
  0x74   : > { %p4673_p5 = pnand %p4672_p6, %p4668_p4 }
  0x76   : > { %4676 = shalt.err (!%p4673_p5)
}
  0x77   : > { %s4677_s2 = scalar_lea.vmem %s4988_s17, 256  ;;  %s4785_s18 = smov [#allocation5]  }
  0x78   : > { %p4678_p9 = scmp.ne.s32.totalorder %s4988_s17, %s4677_s2  ;;  %s4682_s22 = sshll.u32 %s4785_s18, 4  ;;  %s4683_s22 = int_to_ptr.vmem [resolvable:$false] %s4682_s22 }
  0x79   : > { %s4684_s19 = scalar_lea.vmem %s4683_s22, 512  ;;  %p4685_p1 = scmp.lt.s32.totalorder %s4988_s17, %s4683_s22 }
  0x7a   : > { %p4680_p12 = pnand %p4678_p9, %p4638_p13  ;;  %p4686_p0 = scmp.lt.s32.totalorder %s4684_s19, %s4677_s2 }
  0x7c   : > { %p4681_p3 = pneg %p4680_p12  ;;  %p4687_p2 = por %p4686_p0, %p4685_p1 }
  0x7e   : > { %p4688_p8 = pnand %p4687_p2, %p4681_p3 }
  0x80   : > { %4691 = shalt.err (!%p4688_p8)
}
  0x81   : > { %4003 = dma.hbm_to_vmem [thread:$0]  (!%p4946_p10), %s4953_s20, 256, %s4988_s17, %s306_s10, %s8295_s21, %s8295_s21, %s8294_s3  }
  0x82   : > { %p8296_p13 = scmp.ne.s32.totalorder %s8285_s9, 0 }
  0x84   : > { %328 = sbr.rel (%p8296_p13) target bundleno = 4886 (0x1316), region = 48 }
  0x89   : > { %s5019_s0 = sand.u32 1, %s4764_s25   ;;  %p8297_p4 = scmp.ne.s32.totalorder %s8283_s30, 0 }
  0x8a   : > { %s5022_s15 = sshll.u32 %s5019_s0, 4  ;;  %s331_s13 = scalar_lea.sflag [#allocation3], %s5019_s0 }
  0x8b   : > { %s334_s29 = scalar_lea.vmem [#allocation2], %s5022_s15 }
  0x8c   : > { %4735 = dma.done.wait (%p8297_p4), %s331_s13, 256  }
  0x8d   : > { %4737 = vsyncadd (%p8297_p4), %s331_s13, 4294967040  ;;  %s339_s9 = sand.u32 1, %s4850_s28   ;;  %s5032_s17 = scalar_lea.vmem [#allocation5], %s5022_s15 }
  0x8e   : > { %s340_s20 = scalar_lea.sflag [#allocation6], %s339_s9 }
  0x8f   : > { %4739 = dma.done.wait (%p8297_p4), %s340_s20, 256  }
  0x90   : > { %4741 = vsyncadd (%p8297_p4), %s340_s20, 4294967040  ;;  %p8298_p10 = scmp.eq.s32.totalorder %s4850_s28, 0 }
  0x92   : > { %4743 = dma.done.wait (%p8298_p10), [#allocation6], 32768   ;;  %p8299_p11 = pmov %p8298_p10 }
  0x93   : > { %p8300_p6 = pmov %p8298_p10 }
  0x94   : > { %4745 = vsyncadd (%p8299_p11), [#allocation6], 4294934528 }
  0x95   : > { %4747 = dma.done.wait (%p8300_p6), [#allocation9], 256   ;;  %p8301_p5 = pmov %p8300_p6 }
  0x97   : > { %4749 = vsyncadd (%p8301_p5), [#allocation9], 4294967040  ;;  %p8302_p9 = pmov %p8301_p5 }
  0x98   : > { %p8303_p12 = pmov %p8301_p5 }
  0x99   : > { %4751 = dma.done.wait (%p8302_p9), [#allocation12], 2048  }
  0x9a   : > { %4753 = vsyncadd (%p8303_p12), [#allocation12], 4294965248  ;;  %vm399_vm0 = vcmask 130048   ;;  %v5050_v0 = vld [vmem:[%s334_s29 + $0x8] sm:$0xff]  ;;  %v5052_v1 = vld [vmem:[%s334_s29] sm:$0xff]  ;;  %s394_s21 = scalar_lea.vmem [#allocation13], %s5022_s15 }
  0x9b   : > { %8304 = vst [vmem:[#allocation20_spill] sm:$0xff] %v5052_v1  ;;  %v5055_v2 = vld [vmem:[%s5032_s17] sm:$0xff]  ;;  %3857 = vmatprep.subr.mxu1 %v5050_v0  ;;  %v5060_v3 = vld [vmem:[#allocation7 + $0x1f8] sm:$0xff]  ;;  %v5066_v5 = vld [vmem:[#allocation7 + $0x1e8] sm:$0xff]  ;;  %816 = vmatprep.mubr.f32.mxu0 %v5052_v1  ;;  %s3575_s10 = sshll.u32 %s394_s21, 4  ;;  %s3798_s4 = sshll.u32 %s4850_s28, 8  ;;  %s7702_s10 = int_to_ptr.vmem [resolvable:$true] %s3575_s10 }
  0x9c   : > { %3861 = vmatprep.mubr.msk.f32.mxu1 %vm399_vm0, %v5055_v2  ;;  %8305 = vst [vmem:[#allocation21_spill] sm:$0xff] %v5060_v3  ;;  %3858 = vmatpush3.msra.mxu1 %v5050_v0  ;;  %v5064_v4 = vld [vmem:[%s5032_s17 + $0x8] sm:$0xff]  ;;  %v5069_v6 = vld [vmem:[#allocation7 + $0x1f0] sm:$0xff]  ;;  %v5072_v7 = vld [vmem:[#allocation7 + $0x1e0] sm:$0xff]  ;;  %s7707_s2 = scalar_lea.hbm %s7756_s7, %s3798_s4  ;;  %s3562_s18 = scalar_lea.sflag [#allocation4], %s5019_s0 }
  0x9d   : > { %752 = vmatprep.subr.mxu0 %v5060_v3  ;;  %8306 = vst [vmem:[#allocation22_spill] sm:$0xff] %v5069_v6  ;;  %3859 = vmatprep.subr.mxu1 %v5052_v1  ;;  %v5075_v8 = vld [vmem:[#allocation7 + $0x1d8] sm:$0xff]  ;;  %v5077_v9 = vld [vmem:[#allocation7 + $0x1d0] sm:$0xff]  ;;  %v5080_v10 = vld [vmem:[#allocation7 + $0x1c8] sm:$0xff]  ;;  %s4692_s22 = scalar_lea.vmem %s7702_s10, 256  ;;  %s4786_s28 = smov [#allocation13]  }
  0x9e   : > { %753 = vmatpush1.msra.mxu0 %v5069_v6  ;;  %8307 = vst [vmem:[#allocation23_spill] sm:$0xff] %v5075_v8  ;;  %8308 = vst [vmem:[#allocation24_spill] sm:$0xff] %v5077_v9  ;;  %3860 = vmatpush3.msra.mxu1 %v5052_v1  ;;  %v5083_v11 = vld [vmem:[#allocation7 + $0x1b8] sm:$0xff]  ;;  %v5088_v12 = vld [vmem:[#allocation7 + $0x1c0] sm:$0xff]  ;;  %p4693_p3 = scmp.ne.s32.totalorder %s7702_s10, %s4692_s22  ;;  %s4696_s19 = sshll.u32 %s4786_s28, 4  ;;  %s4697_s19 = int_to_ptr.vmem [resolvable:$false] %s4696_s19 }
  0x9f   : > { %754 = vmatprep.subr.mxu0 %v5075_v8  ;;  %8309 = vst [vmem:[#allocation25_spill] sm:$0xff] %v5083_v11  ;;  %3862 = vmatmul.mubr.msk.f32.vlgmr.msra.gmra.mxu1 %vm399_vm0, %v5064_v4  ;;  %v5090_v13 = vld [vmem:[#allocation7 + $0x1b0] sm:$0xff]  ;;  %v5094_v14 = vld [vmem:[#allocation7 + $0x1a8] sm:$0xff]  ;;  %v5096_v15 = vld [vmem:[#allocation7 + $0x198] sm:$0xff]  ;;  %s4698_s15 = scalar_lea.vmem %s4697_s19, 512  ;;  %p4699_p2 = scmp.lt.s32.totalorder %s7702_s10, %s4697_s19 }
  0xa0   : > { %675 = vmatprep.subr.mxu1 %v5066_v5  ;;  %8310 = vst [vmem:[#allocation26_spill] sm:$0xff] %v5090_v13  ;;  %755 = vmatpush1.msra.mxu0 %v5077_v9  ;;  %8311 = vst [vmem:[#allocation27_spill] sm:$0xff] %v5096_v15  ;;  %v5100_v16 = vld [vmem:[#allocation7 + $0x1a0] sm:$0xff]  ;;  %v5102_v17 = vld [vmem:[#allocation7 + $0x190] sm:$0xff]  ;;  %p4694_p1 = pnand %p4693_p3, %p4932_p7  ;;  %p4700_p8 = scmp.lt.s32.totalorder %s4698_s15, %s4692_s22 }
  0xa1   : > { %676 = vmatpush1.msra.mxu1 %v5072_v7  ;;  %756 = vmatprep.subr.mxu0 %v5083_v11  ;;  %8312 = vst [vmem:[#allocation28_spill] sm:$0xff] %v5102_v17  ;;  %v5106_v18 = vld [vmem:[#allocation7 + $0x188] sm:$0xff]  ;;  %v5108_v19 = vld [vmem:[#allocation7 + $0x178] sm:$0xff]  ;;  %v5112_v20 = vld [vmem:[#allocation7 + $0x180] sm:$0xff] }
  0xa2   : > { %677 = vmatprep.subr.mxu1 %v5080_v10  ;;  %757 = vmatpush1.msra.mxu0 %v5090_v13  ;;  %8313 = vst [vmem:[#allocation29_spill] sm:$0xff] %v5108_v19  ;;  %v5114_v21 = vld [vmem:[#allocation7 + $0x170] sm:$0xff]  ;;  %v5118_v22 = vld [vmem:[#allocation7 + $0x168] sm:$0xff]  ;;  %v5120_v23 = vld [vmem:[#allocation7 + $0x158] sm:$0xff]  ;;  %p4695_p0 = pneg %p4694_p1  ;;  %p4701_p13 = por %p4700_p8, %p4699_p2 }
  0xa3   : > { %678 = vmatpush1.msra.mxu1 %v5088_v12  ;;  %758 = vmatprep.subr.mxu0 %v5096_v15  ;;  %8314 = vst [vmem:[#allocation30_spill] sm:$0xff] %v5114_v21  ;;  %8315 = vst [vmem:[#allocation31_spill] sm:$0xff] %v5120_v23  ;;  %v5124_v24 = vld [vmem:[#allocation7 + $0x160] sm:$0xff]  ;;  %v5126_v25 = vld [vmem:[#allocation7 + $0x150] sm:$0xff] }
  0xa4   : > { %679 = vmatprep.subr.mxu1 %v5094_v14  ;;  %759 = vmatpush1.msra.mxu0 %v5102_v17  ;;  %8316 = vst [vmem:[#allocation32_spill] sm:$0xff] %v5126_v25  ;;  %v5130_v26 = vld [vmem:[#allocation7 + $0x148] sm:$0xff]  ;;  %v5132_v27 = vld [vmem:[#allocation7 + $0x138] sm:$0xff]  ;;  %v5136_v28 = vld [vmem:[#allocation7 + $0x140] sm:$0xff]  ;;  %p4702_p4 = pnand %p4701_p13, %p4695_p0 }
  0xa5   : > { %680 = vmatpush1.msra.mxu1 %v5100_v16  ;;  %760 = vmatprep.subr.mxu0 %v5108_v19  ;;  %8317 = vst [vmem:[#allocation33_spill] sm:$0xff] %v5132_v27  ;;  %v5138_v29 = vld [vmem:[#allocation7 + $0x130] sm:$0xff]  ;;  %v5142_v30 = vld [vmem:[#allocation7 + $0x128] sm:$0xff]  ;;  %v5144_v31 = vld [vmem:[#allocation7 + $0x118] sm:$0xff] }
  0xa6   : > { %681 = vmatprep.subr.mxu1 %v5106_v18  ;;  %761 = vmatpush1.msra.mxu0 %v5114_v21  ;;  %8318 = vst [vmem:[#allocation34_spill] sm:$0xff] %v5138_v29  ;;  %8319 = vst [vmem:[#allocation35_spill] sm:$0xff] %v5144_v31  ;;  %v5148_v32 = vld [vmem:[#allocation7 + $0x120] sm:$0xff]  ;;  %v5150_v33 = vld [vmem:[#allocation7 + $0x110] sm:$0xff] }
  0xa7   : > { %682 = vmatpush1.msra.mxu1 %v5112_v20  ;;  %762 = vmatprep.subr.mxu0 %v5120_v23  ;;  %8320 = vst [vmem:[#allocation36_spill] sm:$0xff] %v5150_v33  ;;  %v5154_v34 = vld [vmem:[#allocation7 + $0x108] sm:$0xff]  ;;  %v5156_v35 = vld [vmem:[#allocation7 + $0xf8] sm:$0xff]  ;;  %v5160_v36 = vld [vmem:[#allocation7 + $0x100] sm:$0xff] }
  0xa8   : > { %683 = vmatprep.subr.mxu1 %v5118_v22  ;;  %763 = vmatpush1.msra.mxu0 %v5126_v25  ;;  %8321 = vst [vmem:[#allocation37_spill] sm:$0xff] %v5156_v35  ;;  %v5162_v37 = vld [vmem:[#allocation7 + $0xf0] sm:$0xff]  ;;  %v5166_v38 = vld [vmem:[#allocation7 + $0xe8] sm:$0xff]  ;;  %v5168_v39 = vld [vmem:[#allocation7 + $0xd8] sm:$0xff] }
  0xa9   : > { %684 = vmatpush1.msra.mxu1 %v5124_v24  ;;  %764 = vmatprep.subr.mxu0 %v5132_v27  ;;  %8322 = vst [vmem:[#allocation38_spill] sm:$0xff] %v5162_v37  ;;  %8323 = vst [vmem:[#allocation39_spill] sm:$0xff] %v5168_v39  ;;  %v5172_v40 = vld [vmem:[#allocation7 + $0xe0] sm:$0xff]  ;;  %v5174_v41 = vld [vmem:[#allocation7 + $0xd0] sm:$0xff] }
  0xaa   : > { %685 = vmatprep.subr.mxu1 %v5130_v26  ;;  %765 = vmatpush1.msra.mxu0 %v5138_v29  ;;  %8324 = vst [vmem:[#allocation40_spill] sm:$0xff] %v5174_v41  ;;  %v5178_v42 = vld [vmem:[#allocation7 + $0xc8] sm:$0xff]  ;;  %v5180_v43 = vld [vmem:[#allocation7 + $0xb8] sm:$0xff]  ;;  %v5184_v44 = vld [vmem:[#allocation7 + $0xc0] sm:$0xff] }
  0xab   : > { %686 = vmatpush1.msra.mxu1 %v5136_v28  ;;  %766 = vmatprep.subr.mxu0 %v5144_v31  ;;  %8325 = vst [vmem:[#allocation41_spill] sm:$0xff] %v5180_v43  ;;  %v5186_v45 = vld [vmem:[#allocation7 + $0xb0] sm:$0xff]  ;;  %v5190_v46 = vld [vmem:[#allocation7 + $0xa8] sm:$0xff]  ;;  %v5192_v47 = vld [vmem:[#allocation7 + $0x98] sm:$0xff] }
  0xac   : > { %687 = vmatprep.subr.mxu1 %v5142_v30  ;;  %767 = vmatpush1.msra.mxu0 %v5150_v33  ;;  %8326 = vst [vmem:[#allocation42_spill] sm:$0xff] %v5186_v45  ;;  %8327 = vst [vmem:[#allocation43_spill] sm:$0xff] %v5192_v47  ;;  %v5196_v48 = vld [vmem:[#allocation7 + $0xa0] sm:$0xff]  ;;  %v5198_v49 = vld [vmem:[#allocation7 + $0x90] sm:$0xff] }
  0xad   : > { %688 = vmatpush1.msra.mxu1 %v5148_v32  ;;  %768 = vmatprep.subr.mxu0 %v5156_v35  ;;  %8328 = vst [vmem:[#allocation44_spill] sm:$0xff] %v5198_v49  ;;  %v5202_v50 = vld [vmem:[#allocation7 + $0x88] sm:$0xff]  ;;  %v5204_v51 = vld [vmem:[#allocation7 + $0x78] sm:$0xff]  ;;  %v5208_v52 = vld [vmem:[#allocation7 + $0x80] sm:$0xff] }
  0xae   : > { %689 = vmatprep.subr.mxu1 %v5154_v34  ;;  %769 = vmatpush1.msra.mxu0 %v5162_v37  ;;  %8329 = vst [vmem:[#allocation45_spill] sm:$0xff] %v5204_v51  ;;  %v5210_v53 = vld [vmem:[#allocation7 + $0x70] sm:$0xff]  ;;  %v5214_v54 = vld [vmem:[#allocation7 + $0x68] sm:$0xff]  ;;  %v5216_v55 = vld [vmem:[#allocation7 + $0x58] sm:$0xff] }
  0xaf   : > { %690 = vmatpush1.msra.mxu1 %v5160_v36  ;;  %770 = vmatprep.subr.mxu0 %v5168_v39  ;;  %8330 = vst [vmem:[#allocation46_spill] sm:$0xff] %v5210_v53  ;;  %8331 = vst [vmem:[#allocation47_spill] sm:$0xff] %v5216_v55  ;;  %v5220_v56 = vld [vmem:[#allocation7 + $0x60] sm:$0xff]  ;;  %v5222_v57 = vld [vmem:[#allocation7 + $0x50] sm:$0xff] }
  0xb0   : > { %691 = vmatprep.subr.mxu1 %v5166_v38  ;;  %771 = vmatpush1.msra.mxu0 %v5174_v41  ;;  %8332 = vst [vmem:[#allocation48_spill] sm:$0xff] %v5222_v57  ;;  %v5226_v58 = vld [vmem:[#allocation7 + $0x48] sm:$0xff]  ;;  %v5228_v59 = vld [vmem:[#allocation7 + $0x38] sm:$0xff]  ;;  %v5232_v60 = vld [vmem:[#allocation7 + $0x40] sm:$0xff] }
  0xb1   : > { %692 = vmatpush1.msra.mxu1 %v5172_v40  ;;  %772 = vmatprep.subr.mxu0 %v5180_v43  ;;  %8333 = vst [vmem:[#allocation49_spill] sm:$0xff] %v5228_v59  ;;  %v5234_v61 = vld [vmem:[#allocation7 + $0x30] sm:$0xff]  ;;  %v5238_v62 = vld [vmem:[#allocation7 + $0x28] sm:$0xff]  ;;  %v5240_v63 = vld [vmem:[#allocation7 + $0x18] sm:$0xff] }
  0xb2   : > { %693 = vmatprep.subr.mxu1 %v5178_v42  ;;  %773 = vmatpush1.msra.mxu0 %v5186_v45  ;;  %8334 = vst [vmem:[#allocation50_spill] sm:$0xff] %v5234_v61  ;;  %8335 = vst [vmem:[#allocation51_spill] sm:$0xff] %v5240_v63  ;;  %v5264_v45 = vld [vmem:[#allocation7 + $0x3d8] sm:$0xff]  ;;  %v5270_v43 = vld [vmem:[#allocation7 + $0x3d0] sm:$0xff] }
  0xb3   : > { %694 = vmatpush1.msra.mxu1 %v5184_v44  ;;  %774 = vmatprep.subr.mxu0 %v5192_v47  ;;  %v5258_v47 = vld [vmem:[#allocation7 + $0x3f0] sm:$0xff]  ;;  %8339 = vst [vmem:[#allocation55_spill] sm:$0xff] %v5264_v45  ;;  %8340 = vst [vmem:[#allocation56_spill] sm:$0xff] %v5270_v43  ;;  %v5276_v41 = vld [vmem:[#allocation7 + $0x3b8] sm:$0xff] }
  0xb4   : > { %695 = vmatprep.subr.mxu1 %v5190_v46  ;;  %775 = vmatpush1.msra.mxu0 %v5198_v49  ;;  %v5252_v49 = vld [vmem:[#allocation7 + $0x3f8] sm:$0xff]  ;;  %8338 = vst [vmem:[#allocation54_spill] sm:$0xff] %v5258_v47  ;;  %8341 = vst [vmem:[#allocation57_spill] sm:$0xff] %v5276_v41  ;;  %v5282_v39 = vld [vmem:[#allocation7 + $0x3b0] sm:$0xff] }
  0xb5   : > { %696 = vmatpush1.msra.mxu1 %v5196_v48  ;;  %776 = vmatprep.subr.mxu0 %v5204_v51  ;;  %v5246_v51 = vld [vmem:[#allocation7 + $0x10] sm:$0xff]  ;;  %8337 = vst [vmem:[#allocation53_spill] sm:$0xff] %v5252_v49  ;;  %8342 = vst [vmem:[#allocation58_spill] sm:$0xff] %v5282_v39  ;;  %v5288_v37 = vld [vmem:[#allocation7 + $0x398] sm:$0xff] }
  0xb6   : > { %697 = vmatprep.subr.mxu1 %v5202_v50  ;;  %777 = vmatpush1.msra.mxu0 %v5210_v53  ;;  %v5244_v53 = vld [vmem:[#allocation7 + $0x20] sm:$0xff]  ;;  %8336 = vst [vmem:[#allocation52_spill] sm:$0xff] %v5246_v51  ;;  %8343 = vst [vmem:[#allocation59_spill] sm:$0xff] %v5288_v37  ;;  %v5294_v35 = vld [vmem:[#allocation7 + $0x390] sm:$0xff] }
  0xb7   : > { %698 = vmatpush1.msra.mxu1 %v5208_v52  ;;  %778 = vmatprep.subr.mxu0 %v5216_v55  ;;  %v5250_v55 = vld [vmem:[#allocation7 + $0x8] sm:$0xff]  ;;  %8344 = vst [vmem:[#allocation60_spill] sm:$0xff] %v5294_v35  ;;  %v5300_v33 = vld [vmem:[#allocation7 + $0x378] sm:$0xff]  ;;  %v5306_v31 = vld [vmem:[#allocation7 + $0x370] sm:$0xff] }
  0xb8   : > { %699 = vmatprep.subr.mxu1 %v5214_v54  ;;  %779 = vmatpush1.msra.mxu0 %v5222_v57  ;;  %v5256_v57 = vld [vmem:[#allocation7] sm:$0xff]  ;;  %8345 = vst [vmem:[#allocation61_spill] sm:$0xff] %v5300_v33  ;;  %8346 = vst [vmem:[#allocation62_spill] sm:$0xff] %v5306_v31  ;;  %v5312_v29 = vld [vmem:[#allocation7 + $0x358] sm:$0xff] }
  0xb9   : > { %700 = vmatpush1.msra.mxu1 %v5220_v56  ;;  %780 = vmatprep.subr.mxu0 %v5228_v59  ;;  %v5262_v59 = vld [vmem:[#allocation7 + $0x3e8] sm:$0xff]  ;;  %8347 = vst [vmem:[#allocation63_spill] sm:$0xff] %v5312_v29  ;;  %v5318_v27 = vld [vmem:[#allocation7 + $0x350] sm:$0xff]  ;;  %v5324_v25 = vld [vmem:[#allocation7 + $0x338] sm:$0xff] }
  0xba   : > { %701 = vmatprep.subr.mxu1 %v5226_v58  ;;  %781 = vmatpush1.msra.mxu0 %v5234_v61  ;;  %v5268_v61 = vld [vmem:[#allocation7 + $0x3e0] sm:$0xff]  ;;  %8348 = vst [vmem:[#allocation64_spill] sm:$0xff] %v5318_v27  ;;  %8349 = vst [vmem:[#allocation65_spill] sm:$0xff] %v5324_v25  ;;  %v5330_v23 = vld [vmem:[#allocation7 + $0x330] sm:$0xff] }
  0xbb   : > { %702 = vmatpush1.msra.mxu1 %v5232_v60  ;;  %782 = vmatprep.subr.mxu0 %v5240_v63  ;;  %v5274_v63 = vld [vmem:[#allocation7 + $0x3c8] sm:$0xff]  ;;  %8350 = vst [vmem:[#allocation66_spill] sm:$0xff] %v5330_v23  ;;  %v5336_v21 = vld [vmem:[#allocation7 + $0x318] sm:$0xff]  ;;  %v5342_v19 = vld [vmem:[#allocation7 + $0x310] sm:$0xff] }
  0xbc   : > { %703 = vmatprep.subr.mxu1 %v5238_v62  ;;  %783 = vmatpush1.msra.mxu0 %v5246_v51  ;;  %v5280_v51 = vld [vmem:[#allocation7 + $0x3c0] sm:$0xff]  ;;  %8351 = vst [vmem:[#allocation67_spill] sm:$0xff] %v5336_v21  ;;  %8352 = vst [vmem:[#allocation68_spill] sm:$0xff] %v5342_v19  ;;  %v5348_v17 = vld [vmem:[#allocation7 + $0x2f8] sm:$0xff] }
  0xbd   : > { %704 = vmatpush1.msra.mxu1 %v5244_v53  ;;  %784 = vmatprep.subr.mxu0 %v5252_v49  ;;  %v5286_v49 = vld [vmem:[#allocation7 + $0x3a8] sm:$0xff]  ;;  %8353 = vst [vmem:[#allocation69_spill] sm:$0xff] %v5348_v17  ;;  %v5354_v15 = vld [vmem:[#allocation7 + $0x2f0] sm:$0xff]  ;;  %v5360_v13 = vld [vmem:[#allocation7 + $0x2d8] sm:$0xff] }
  0xbe   : > { %705 = vmatprep.subr.mxu1 %v5250_v55  ;;  %785 = vmatpush2.msra.mxu0 %v5258_v47  ;;  %v5292_v47 = vld [vmem:[#allocation7 + $0x3a0] sm:$0xff]  ;;  %8354 = vst [vmem:[#allocation70_spill] sm:$0xff] %v5354_v15  ;;  %8356 = vst [vmem:[#allocation72_spill] sm:$0xff] %v5360_v13  ;;  %v5366_v11 = vld [vmem:[#allocation7 + $0x2d0] sm:$0xff] }
  0xbf   : > { %706 = vmatpush1.msra.mxu1 %v5256_v57  ;;  %786 = vmatprep.subr.mxu0 %v5264_v45  ;;  %v5298_v45 = vld [vmem:[#allocation7 + $0x388] sm:$0xff]  ;;  %8358 = vst [vmem:[#allocation74_spill] sm:$0xff] %v5366_v11  ;;  %v5372_v9 = vld [vmem:[#allocation7 + $0x2b8] sm:$0xff]  ;;  %v5378_v8 = vld [vmem:[#allocation7 + $0x2b0] sm:$0xff] }
  0xc0   : > { %707 = vmatprep.subr.mxu1 %v5262_v59  ;;  %787 = vmatpush2.msra.mxu0 %v5270_v43  ;;  %v5304_v43 = vld [vmem:[#allocation7 + $0x380] sm:$0xff]  ;;  %8360 = vst [vmem:[#allocation76_spill] sm:$0xff] %v5372_v9  ;;  %8362 = vst [vmem:[#allocation78_spill] sm:$0xff] %v5378_v8  ;;  %v5384_v6 = vld [vmem:[#allocation7 + $0x298] sm:$0xff] }
  0xc1   : > { %708 = vmatpush2.msra.mxu1 %v5268_v61  ;;  %788 = vmatprep.subr.mxu0 %v5276_v41  ;;  %v5310_v41 = vld [vmem:[#allocation7 + $0x368] sm:$0xff]  ;;  %8364 = vst [vmem:[#allocation80_spill] sm:$0xff] %v5384_v6  ;;  %v5390_v3 = vld [vmem:[#allocation7 + $0x290] sm:$0xff] }
  0xc2   : > { %709 = vmatprep.subr.mxu1 %v5274_v63  ;;  %789 = vmatpush2.msra.mxu0 %v5282_v39  ;;  %v5316_v39 = vld [vmem:[#allocation7 + $0x360] sm:$0xff]  ;;  %8366 = vst [vmem:[#allocation82_spill] sm:$0xff] %v5390_v3 }
  0xc3   : > { %710 = vmatpush2.msra.mxu1 %v5280_v51  ;;  %790 = vmatprep.subr.mxu0 %v5288_v37  ;;  %v5322_v37 = vld [vmem:[#allocation7 + $0x348] sm:$0xff] }
  0xc4   : > { %711 = vmatprep.subr.mxu1 %v5286_v49  ;;  %791 = vmatpush2.msra.mxu0 %v5294_v35  ;;  %v5328_v35 = vld [vmem:[#allocation7 + $0x340] sm:$0xff] }
  0xc5   : > { %712 = vmatpush2.msra.mxu1 %v5292_v47  ;;  %792 = vmatprep.subr.mxu0 %v5300_v33  ;;  %v5334_v33 = vld [vmem:[#allocation7 + $0x328] sm:$0xff] }
  0xc6   : > { %713 = vmatprep.subr.mxu1 %v5298_v45  ;;  %793 = vmatpush2.msra.mxu0 %v5306_v31  ;;  %v5340_v31 = vld [vmem:[#allocation7 + $0x320] sm:$0xff] }
  0xc7   : > { %714 = vmatpush2.msra.mxu1 %v5304_v43  ;;  %794 = vmatprep.subr.mxu0 %v5312_v29  ;;  %v5346_v29 = vld [vmem:[#allocation7 + $0x308] sm:$0xff] }
  0xc8   : > { %715 = vmatprep.subr.mxu1 %v5310_v41  ;;  %795 = vmatpush2.msra.mxu0 %v5318_v27  ;;  %v5352_v27 = vld [vmem:[#allocation7 + $0x300] sm:$0xff] }
  0xc9   : > { %716 = vmatpush2.msra.mxu1 %v5316_v39  ;;  %796 = vmatprep.subr.mxu0 %v5324_v25  ;;  %v5358_v25 = vld [vmem:[#allocation7 + $0x2e8] sm:$0xff] }
  0xca   : > { %717 = vmatprep.subr.mxu1 %v5322_v37  ;;  %797 = vmatpush2.msra.mxu0 %v5330_v23  ;;  %8355 = vst [vmem:[#allocation71_spill] sm:$0xff] %v5358_v25  ;;  %v5364_v23 = vld [vmem:[#allocation7 + $0x2e0] sm:$0xff] }
  0xcb   : > { %718 = vmatpush2.msra.mxu1 %v5328_v35  ;;  %798 = vmatprep.subr.mxu0 %v5336_v21  ;;  %8357 = vst [vmem:[#allocation73_spill] sm:$0xff] %v5364_v23  ;;  %v5370_v21 = vld [vmem:[#allocation7 + $0x2c8] sm:$0xff] }
  0xcc   : > { %719 = vmatprep.subr.mxu1 %v5334_v33  ;;  %799 = vmatpush2.msra.mxu0 %v5342_v19  ;;  %8359 = vst [vmem:[#allocation75_spill] sm:$0xff] %v5370_v21  ;;  %v5376_v19 = vld [vmem:[#allocation7 + $0x2c0] sm:$0xff] }
  0xcd   : > { %720 = vmatpush2.msra.mxu1 %v5340_v31  ;;  %800 = vmatprep.subr.mxu0 %v5348_v17  ;;  %8361 = vst [vmem:[#allocation77_spill] sm:$0xff] %v5376_v19  ;;  %v5382_v17 = vld [vmem:[#allocation7 + $0x2a8] sm:$0xff] }
  0xce   : > { %721 = vmatprep.subr.mxu1 %v5346_v29  ;;  %801 = vmatpush2.msra.mxu0 %v5354_v15  ;;  %8363 = vst [vmem:[#allocation79_spill] sm:$0xff] %v5382_v17  ;;  %v5388_v15 = vld [vmem:[#allocation7 + $0x2a0] sm:$0xff] }
  0xcf   : > { %722 = vmatpush2.msra.mxu1 %v5352_v27  ;;  %802 = vmatprep.subr.mxu0 %v5360_v13  ;;  %8365 = vst [vmem:[#allocation81_spill] sm:$0xff] %v5388_v15  ;;  %v5394_v13 = vld [vmem:[#allocation7 + $0x288] sm:$0xff] }
  0xd0   : > { %723 = vmatprep.subr.mxu1 %v5358_v25  ;;  %803 = vmatpush2.msra.mxu0 %v5366_v11  ;;  %8367 = vst [vmem:[#allocation83_spill] sm:$0xff] %v5394_v13  ;;  %v5400_v11 = vld [vmem:[#allocation7 + $0x280] sm:$0xff] }
  0xd1   : > { %724 = vmatpush2.msra.mxu1 %v5364_v23  ;;  %804 = vmatprep.subr.mxu0 %v5372_v9  ;;  %v5396_v23 = vld [vmem:[#allocation7 + $0x278] sm:$0xff]  ;;  %8369 = vst [vmem:[#allocation85_spill] sm:$0xff] %v5400_v11  ;;  %v5406_v9 = vld [vmem:[#allocation7 + $0x268] sm:$0xff] }
  0xd2   : > { %725 = vmatprep.subr.mxu1 %v5370_v21  ;;  %805 = vmatpush2.msra.mxu0 %v5378_v8  ;;  %8368 = vst [vmem:[#allocation84_spill] sm:$0xff] %v5396_v23  ;;  %v5402_v21 = vld [vmem:[#allocation7 + $0x270] sm:$0xff]  ;;  %8371 = vst [vmem:[#allocation87_spill] sm:$0xff] %v5406_v9  ;;  %v5412_v8 = vld [vmem:[#allocation7 + $0x260] sm:$0xff] }
  0xd3   : > { %726 = vmatpush2.msra.mxu1 %v5376_v19  ;;  %806 = vmatprep.subr.mxu0 %v5384_v6  ;;  %8370 = vst [vmem:[#allocation86_spill] sm:$0xff] %v5402_v21  ;;  %v5408_v19 = vld [vmem:[#allocation7 + $0x258] sm:$0xff]  ;;  %8373 = vst [vmem:[#allocation89_spill] sm:$0xff] %v5412_v8  ;;  %v5418_v6 = vld [vmem:[#allocation7 + $0x248] sm:$0xff] }
  0xd4   : > { %727 = vmatprep.subr.mxu1 %v5382_v17  ;;  %807 = vmatpush2.msra.mxu0 %v5390_v3  ;;  %8372 = vst [vmem:[#allocation88_spill] sm:$0xff] %v5408_v19  ;;  %v5414_v17 = vld [vmem:[#allocation7 + $0x250] sm:$0xff]  ;;  %8375 = vst [vmem:[#allocation91_spill] sm:$0xff] %v5418_v6  ;;  %v5424_v3 = vld [vmem:[#allocation7 + $0x240] sm:$0xff] }
  0xd5   : > { %728 = vmatpush2.msra.mxu1 %v5388_v15  ;;  %808 = vmatprep.subr.mxu0 %v5396_v23  ;;  %8374 = vst [vmem:[#allocation90_spill] sm:$0xff] %v5414_v17  ;;  %v5420_v15 = vld [vmem:[#allocation7 + $0x238] sm:$0xff]  ;;  %8377 = vst [vmem:[#allocation93_spill] sm:$0xff] %v5424_v3  ;;  %v5428_v23 = vld [vmem:[#allocation7 + $0x228] sm:$0xff] }
  0xd6   : > { %729 = vmatprep.subr.mxu1 %v5394_v13  ;;  %809 = vmatpush2.msra.mxu0 %v5402_v21  ;;  %8376 = vst [vmem:[#allocation92_spill] sm:$0xff] %v5420_v15  ;;  %8378 = vst [vmem:[#allocation94_spill] sm:$0xff] %v5428_v23  ;;  %v5438_v21 = vld [vmem:[#allocation7 + $0x230] sm:$0xff] }
  0xd7   : > { %730 = vmatpush2.msra.mxu1 %v5400_v11  ;;  %810 = vmatprep.subr.mxu0 %v5408_v19  ;;  %v5436_v19 = vld [vmem:[#allocation7 + $0x220] sm:$0xff]  ;;  %8380 = vst [vmem:[#allocation96_spill] sm:$0xff] %v5438_v21 }
  0xd8   : > { %731 = vmatprep.subr.mxu1 %v5406_v9  ;;  %811 = vmatpush2.msra.mxu0 %v5414_v17  ;;  %8379 = vst [vmem:[#allocation95_spill] sm:$0xff] %v5436_v19  ;;  %v5442_v17 = vld [vmem:[#allocation7 + $0x208] sm:$0xff] }
  0xd9   : > { %732 = vmatpush2.msra.mxu1 %v5412_v8  ;;  %812 = vmatprep.subr.mxu0 %v5420_v15  ;;  %8381 = vst [vmem:[#allocation97_spill] sm:$0xff] %v5442_v17  ;;  %v5448_v15 = vld [vmem:[#allocation7 + $0x200] sm:$0xff] }
  0xda   : > { %733 = vmatprep.subr.mxu1 %v5418_v6  ;;  %739 = vmatprep.mubr.f32.mxu1 %v5052_v1  ;;  %v5444_v6 = vld [vmem:[#allocation7 + $0x218] sm:$0xff]  ;;  %8383 = vst [vmem:[#allocation99_spill] sm:$0xff] %v5448_v15  ;;  %v400_v1 = vsel %vm399_vm0, %v5055_v2, 0.0 }
  0xdb   : > { %734 = vmatpush2.msra.mxu1 %v5424_v3  ;;  %813 = vmatpush2.msra.mxu0 %v5438_v21  ;;  %8382 = vst [vmem:[#allocation98_spill] sm:$0xff] %v5444_v6  ;;  %v403_v21 = vsel %vm399_vm0, %v5064_v4, 0.0 }
  0xdc   : > { %735 = vmatprep.subr.mxu1 %v5428_v23  ;;  %814 = vmatprep.subr.mxu0 %v5444_v6  ;;  %v5450_v23 = vld [vmem:[#allocation7 + $0x210] sm:$0xff] }
  0xdd   : > { %736 = vmatpush2.msra.mxu1 %v5436_v19  ;;  %815 = vmatpush2.msra.mxu0 %v5450_v23 }
  0xde   : > { %737 = vmatprep.subr.mxu1 %v5442_v17  ;;  %942 = vmatprep.subr.mxu0 %v5066_v5  ;;  %v8386_v5 = vld [vmem:[#allocation77_spill] sm:$0xff] }
  0xdf   : > { %738 = vmatpush2.msra.mxu1 %v5448_v15  ;;  %404 = vadd.xlane.f32.xlu0 %v403_v21  ;;  %v2065_v21 = vld [vmem:[#allocation8 + $0x4] sm:$0xf] }
  0xe3   : > { %401 = vadd.xlane.f32.xlu0 %v400_v1  ;;  %v8384_v1 = vld [vmem:[#allocation73_spill] sm:$0xff] }
 0x15f   : > { %v3863_v17 = vpop.f32.mrf.mxu1 }
 0x161   : > { %v666_v6 = vpop.f32.mrf.mxu1 }
 0x162   : > { %740 = vmatmul.mubr.f32.vlgmr.msra.gmra.mxu1 %v666_v6  ;;  %817 = vmatmul.mubr.f32.vlgmr.msra.gmra.mxu0 %v666_v6  ;;  %v8387_v6 = vld [vmem:[#allocation79_spill] sm:$0xff] }
 0x163   : > { %745 = vmatprep.mubr.f32.mxu1 %v5050_v0  ;;  %822 = vmatprep.mubr.f32.mxu0 %v5050_v0 }
 0x164   : > { %943 = vmatpush1.msra.mxu0 %v5072_v7  ;;  %v536_v7 = vlaneseq }
 0x165   : > { %944 = vmatprep.subr.mxu0 %v5080_v10  ;;  %v8388_v10 = vld [vmem:[#allocation81_spill] sm:$0xff] }
 0x166   : > { %746 = vmatmul.mubr.f32.gmra.mxu1 %v3863_v17  ;;  %823 = vmatmul.mubr.f32.gmra.mxu0 %v3863_v17 }
 0x167   : > { %3868 = vmatprep.mubr.msk.f32.mxu1 %vm399_vm0, %v5055_v2  ;;  %945 = vmatpush1.msra.mxu0 %v5088_v12  ;;  %v8385_v2 = vld [vmem:[#allocation75_spill] sm:$0xff]  ;;  %v537_v12 = vshrl.u32 %v536_v7, 7 }
 0x168   : > { %946 = vmatprep.subr.mxu0 %v5094_v14  ;;  %v5520_v14 = vpop.xlane.xlu0 %404 }
 0x169   : > { %947 = vmatpush1.msra.mxu0 %v5100_v16  ;;  %8389 = vst [vmem:[#allocation100_spill] sm:$0xff] %v5520_v14  ;;  %v8390_v16 = vld [vmem:[#allocation91_spill] sm:$0xff]  ;;  %v542_v17 = vsub.s32 1, %v537_v12 }
 0x16a   : > { %948 = vmatprep.subr.mxu0 %v5106_v18  ;;  %v5524_v18 = vsub.s32 3, %v537_v12 }
 0x16b   : > { %949 = vmatpush1.msra.mxu0 %v5112_v20  ;;  %v8391_v20 = vld [vmem:[#allocation94_spill] sm:$0xff] }
 0x16c   : > { %950 = vmatprep.subr.mxu0 %v5118_v22  ;;  %v5527_v22 = vsub.s32 2, %v537_v12 }
 0x16d   : > { %951 = vmatpush1.msra.mxu0 %v5124_v24  ;;  %v8392_v24 = vld [vmem:[#allocation97_spill] sm:$0xff] }
 0x16e   : > { %952 = vmatprep.subr.mxu0 %v5130_v26  ;;  %v2096_v26 = vld [vmem:[#allocation10 + $0x4] sm:$0xf] }
 0x16f   : > { %953 = vmatpush1.msra.mxu0 %v5136_v28  ;;  %v2074_v28 = vrot.slane %v2065_v21, %v542_v17 }
 0x170   : > { %954 = vmatprep.subr.mxu0 %v5142_v30  ;;  %v8394_v30 = vld [vmem:[#allocation21_spill] sm:$0xff] }
 0x171   : > { %955 = vmatpush1.msra.mxu0 %v5148_v32 }
 0x172   : > { %956 = vmatprep.subr.mxu0 %v5154_v34 }
 0x173   : > { %957 = vmatpush1.msra.mxu0 %v5160_v36 }
 0x174   : > { %958 = vmatprep.subr.mxu0 %v5166_v38 }
 0x175   : > { %959 = vmatpush1.msra.mxu0 %v5172_v40  ;;  %v2092_v40 = vmul.f32 %v2074_v28, %v5520_v14 }
 0x176   : > { %960 = vmatprep.subr.mxu0 %v5178_v42 }
 0x177   : > { %961 = vmatpush1.msra.mxu0 %v5184_v44 }
 0x178   : > { %962 = vmatprep.subr.mxu0 %v5190_v46 }
 0x179   : > { %963 = vmatpush1.msra.mxu0 %v5196_v48  ;;  %v534_v48 = vld [vmem:[#allocation8] sm:$0xf] }
 0x17a   : > { %964 = vmatprep.subr.mxu0 %v5202_v50  ;;  %v564_v50 = vld [vmem:[#allocation10] sm:$0xf] }
 0x17b   : > { %965 = vmatpush1.msra.mxu0 %v5208_v52 }
 0x17c   : > { %966 = vmatprep.subr.mxu0 %v5214_v54 }
 0x17d   : > { %967 = vmatpush1.msra.mxu0 %v5220_v56  ;;  %v573_v56 = vrot.slane %v564_v50, %v542_v17 }
 0x17e   : > { %968 = vmatprep.subr.mxu0 %v5226_v58 }
 0x17f   : > { %969 = vmatpush1.msra.mxu0 %v5232_v60 }
 0x180   : > { %970 = vmatprep.subr.mxu0 %v5238_v62 }
 0x181   : > { %971 = vmatpush1.msra.mxu0 %v5244_v53  ;;  %v543_v53 = vrot.slane %v534_v48, %v542_v17 }
 0x182   : > { %972 = vmatprep.subr.mxu0 %v5250_v55 }
 0x183   : > { %973 = vmatpush1.msra.mxu0 %v5256_v57 }
 0x184   : > { %974 = vmatprep.subr.mxu0 %v5262_v59 }
 0x185   : > { %975 = vmatpush2.msra.mxu0 %v5268_v61 }
 0x186   : > { %976 = vmatprep.subr.mxu0 %v5274_v63 }
 0x187   : > { %977 = vmatpush2.msra.mxu0 %v5280_v51 }
 0x188   : > { %978 = vmatprep.subr.mxu0 %v5286_v49 }
 0x189   : > { %979 = vmatpush2.msra.mxu0 %v5292_v47  ;;  %v5557_v47 = vsub.s32 0, %v537_v12  ;;  %v561_v12 = vmul.f32 %v543_v53, %v5520_v14 }
 0x18a   : > { %980 = vmatprep.subr.mxu0 %v5298_v45 }
 0x18b   : > { %981 = vmatpush2.msra.mxu0 %v5304_v43  ;;  %8401 = vst [vmem:[#allocation107_spill] sm:$0xff] %v5557_v47  ;;  %v539_v49 = vrot.slane %v534_v48, %v5557_v47  ;;  %v569_v52 = vrot.slane %v564_v50, %v5557_v47  ;;  %v8455_v47 = vld [vmem:[#allocation64_spill] sm:$0xff] }
 0x18c   : > { %982 = vmatprep.subr.mxu0 %v5310_v41 }
 0x18d   : > { %983 = vmatpush2.msra.mxu0 %v5316_v39  ;;  %v560_v57 = vmul.f32 %v539_v49, %v5520_v14 }
 0x18e   : > { %984 = vmatprep.subr.mxu0 %v5322_v37  ;;  %v2113_v37 = vrot.slane %v2096_v26, %v5524_v18 }
 0x18f   : > { %985 = vmatpush2.msra.mxu0 %v5328_v35  ;;  %v2105_v35 = vrot.slane %v2096_v26, %v542_v17  ;;  %v5569_v63 = vadd.f32 %v569_v52, %v560_v57 }
 0x190   : > { %986 = vmatprep.subr.mxu0 %v5334_v33  ;;  %v2109_v33 = vrot.slane %v2096_v26, %v5527_v22 }
 0x191   : > { %987 = vmatpush2.msra.mxu0 %v5340_v31  ;;  %v2082_v31 = vrot.slane %v2065_v21, %v5524_v18  ;;  %v5553_v45 = vadd.f32 %v2105_v35, %v2092_v40  ;;  %8404 = vst [vmem:[#allocation110_spill] sm:$0xff] %v5569_v63  ;;  %v547_v40 = vrot.slane %v534_v48, %v5527_v22 }
 0x192   : > { %988 = vmatprep.subr.mxu0 %v5346_v29  ;;  %v5533_v29 = vpop.xlane.xlu0 %401 }
 0x193   : > { %989 = vmatpush2.msra.mxu0 %v5352_v27  ;;  %v2078_v27 = vrot.slane %v2065_v21, %v5527_v22  ;;  %8393 = vst [vmem:[#allocation101_spill] sm:$0xff] %v5533_v29  ;;  %v2088_v34 = vmul.f32 %v2074_v28, %v5533_v29  ;;  %v2090_v36 = vmul.f32 %v2082_v31, %v5533_v29  ;;  %8399 = vst [vmem:[#allocation105_spill] sm:$0xff] %v5553_v45  ;;  %v8451_v45 = vld [vmem:[#allocation60_spill] sm:$0xff] }
 0x194   : > { %990 = vmatprep.subr.mxu0 %v5358_v25  ;;  %v2094_v43 = vmul.f32 %v2082_v31, %v5520_v14  ;;  %v556_v51 = vmul.f32 %v539_v49, %v5533_v29  ;;  %v557_v55 = vmul.f32 %v543_v53, %v5533_v29  ;;  %v5574_v28 = vadd.f32 %v573_v56, %v561_v12  ;;  %v8471_v25 = vld [vmem:[#allocation90_spill] sm:$0xff] }
 0x195   : > { %991 = vmatpush2.msra.mxu0 %v8384_v1  ;;  %v2089_v32 = vmul.f32 %v2078_v27, %v5533_v29  ;;  %v2093_v39 = vmul.f32 %v2078_v27, %v5520_v14  ;;  %v5546_v41 = vadd.f32 %v2105_v35, %v2088_v34  ;;  %v5548_v42 = vadd.f32 %v2113_v37, %v2090_v36  ;;  %v8470_v1 = vld [vmem:[#allocation88_spill] sm:$0xff] }
 0x196   : > { %992 = vmatprep.subr.mxu0 %v8385_v2  ;;  %v5555_v46 = vadd.f32 %v2113_v37, %v2094_v43  ;;  %v5562_v54 = vadd.f32 %v569_v52, %v556_v51  ;;  %v5567_v62 = vadd.f32 %v573_v56, %v557_v55  ;;  %8405 = vst [vmem:[#allocation111_spill] sm:$0xff] %v5574_v28  ;;  %v8469_v2 = vld [vmem:[#allocation86_spill] sm:$0xff] }
 0x197   : > { %993 = vmatpush2.msra.mxu0 %v8386_v5  ;;  %v5542_v38 = vadd.f32 %v2109_v33, %v2089_v32  ;;  %8396 = vst [vmem:[#allocation102_spill] sm:$0xff] %v5546_v41  ;;  %8397 = vst [vmem:[#allocation103_spill] sm:$0xff] %v5548_v42  ;;  %v5551_v44 = vadd.f32 %v2109_v33, %v2093_v39  ;;  %v551_v36 = vrot.slane %v534_v48, %v5524_v18  ;;  %v8450_v42 = vld [vmem:[#allocation59_spill] sm:$0xff]  ;;  %v8452_v41 = vld [vmem:[#allocation61_spill] sm:$0xff] }
 0x198   : > { %994 = vmatprep.subr.mxu0 %v8387_v6  ;;  %8400 = vst [vmem:[#allocation106_spill] sm:$0xff] %v5555_v46  ;;  %8402 = vst [vmem:[#allocation108_spill] sm:$0xff] %v5562_v54  ;;  %v581_v51 = vrot.slane %v564_v50, %v5524_v18  ;;  %v558_v53 = vmul.f32 %v547_v40, %v5533_v29  ;;  %v577_v55 = vrot.slane %v564_v50, %v5527_v22  ;;  %v8448_v46 = vld [vmem:[#allocation57_spill] sm:$0xff]  ;;  %v8467_v6 = vld [vmem:[#allocation82_spill] sm:$0xff] }
 0x199   : > { %995 = vmatpush2.msra.mxu0 %v8388_v10  ;;  %8395 = vst [vmem:[#allocation21_spill] sm:$0xff] %v5542_v38  ;;  %8398 = vst [vmem:[#allocation104_spill] sm:$0xff] %v5551_v44  ;;  %v559_v49 = vmul.f32 %v551_v36, %v5533_v29  ;;  %v563_v48 = vmul.f32 %v551_v36, %v5520_v14  ;;  %v562_v18 = vmul.f32 %v547_v40, %v5520_v14  ;;  %v8447_v44 = vld [vmem:[#allocation56_spill] sm:$0xff]  ;;  %v8449_v38 = vld [vmem:[#allocation58_spill] sm:$0xff] }
 0x19a   : > { %996 = vmatprep.subr.mxu0 %v5394_v13  ;;  %8403 = vst [vmem:[#allocation109_spill] sm:$0xff] %v5567_v62  ;;  %v8453_v14 = vld [vmem:[#allocation62_spill] sm:$0xff]  ;;  %v8454_v29 = vld [vmem:[#allocation63_spill] sm:$0xff]  ;;  %v8466_v10 = vld [vmem:[#allocation80_spill] sm:$0xff] }
 0x19b   : > { %997 = vmatpush2.msra.mxu0 %v5400_v11  ;;  %v5583_v57 = vadd.f32 %v581_v51, %v559_v49  ;;  %v5591_v50 = vadd.f32 %v581_v51, %v563_v48  ;;  %v8410_v51 = vld [vmem:[#allocation20_spill] sm:$0xff]  ;;  %v8413_v48 = vld [vmem:[#allocation22_spill] sm:$0xff] }
 0x19c   : > { %998 = vmatprep.subr.mxu0 %v5406_v9  ;;  %v8463_v9 = vld [vmem:[#allocation74_spill] sm:$0xff]  ;;  %v8464_v11 = vld [vmem:[#allocation76_spill] sm:$0xff] }
 0x19d   : > { %999 = vmatpush2.msra.mxu0 %v5412_v8  ;;  %8406 = vst [vmem:[#allocation112_spill] sm:$0xff] %v5583_v57  ;;  %8408 = vst [vmem:[#allocation114_spill] sm:$0xff] %v5591_v50  ;;  %v8462_v8 = vld [vmem:[#allocation72_spill] sm:$0xff]  ;;  %v8465_v13 = vld [vmem:[#allocation78_spill] sm:$0xff] }
 0x19e   : > { %1000 = vmatprep.subr.mxu0 %v8390_v16  ;;  %v8461_v16 = vld [vmem:[#allocation70_spill] sm:$0xff]  ;;  %v8468_v5 = vld [vmem:[#allocation84_spill] sm:$0xff] }
 0x19f   : > { %1001 = vmatpush2.msra.mxu0 %v5424_v3  ;;  %v8460_v3 = vld [vmem:[#allocation69_spill] sm:$0xff] }
 0x1a0   : > { %1002 = vmatprep.subr.mxu0 %v8391_v20  ;;  %v8459_v20 = vld [vmem:[#allocation68_spill] sm:$0xff] }
 0x1a1   : > { %1003 = vmatpush2.msra.mxu0 %v5436_v19  ;;  %v8458_v19 = vld [vmem:[#allocation67_spill] sm:$0xff] }
 0x1a2   : > { %1004 = vmatprep.subr.mxu0 %v8392_v24  ;;  %v8457_v24 = vld [vmem:[#allocation66_spill] sm:$0xff] }
 0x1a3   : > { %1005 = vmatpush2.msra.mxu0 %v5448_v15  ;;  %v8456_v15 = vld [vmem:[#allocation65_spill] sm:$0xff] }
 0x1a4   : > { %1286 = vmatprep.subr.mxu0 %v8394_v30 }
 0x222   : > { %v741_v58 = vpop.f32.mrf.mxu1  ;;  %v818_v39 = vpop.f32.mrf.mxu0 }
 0x223   : > { %v742_v59 = vadd.f32 %v741_v58, %v5562_v54 }
 0x224   : > { %v743_v60 = vpop.f32.mrf.mxu1  ;;  %v820_v52 = vpop.f32.mrf.mxu0 }
 0x225   : > { %v3732_v61 = vmul.f32 -1.442695, %v742_v59  ;;  %v744_v26 = vadd.f32 %v743_v60, %v5567_v62  ;;  %v5585_v60 = vadd.f32 %v577_v55, %v558_v53  ;;  %v5680_v62 = vld [vmem:[#allocation7 + $0x1d8] sm:$0xff] }
 0x226   : > { %v747_v7 = vpop.f32.mrf.mxu1  ;;  %v824_v58 = vpop.f32.mrf.mxu0 }
 0x227   : > { %4062 = vpow2.f32 %v3732_v61  ;;  %v748_v21 = vadd.f32 %v747_v7, %v5569_v63  ;;  %v3734_v32 = vmul.f32 -1.442695, %v744_v26  ;;  %8407 = vst [vmem:[#allocation113_spill] sm:$0xff] %v5585_v60  ;;  %v821_v7 = vadd.f32 %v820_v52, %v5583_v57  ;;  %v5684_v63 = vld [vmem:[%s5032_s17] sm:$0xff] }
 0x228   : > { %v749_v27 = vpop.f32.mrf.mxu1  ;;  %v826_v26 = vpop.f32.mrf.mxu0 }
 0x229   : > { %v3733_v17 = vmul.f32 -1.442695, %v748_v21  ;;  %v750_v31 = vadd.f32 %v749_v27, %v5574_v28  ;;  %v5677_v28 = vld [vmem:[#allocation7 + $0x1f0] sm:$0xff] }
 0x22a   : > { %8475 = vst [vmem:[#allocation22_spill] sm:$0xff] %v5677_v28 }
 0x22b   : > { %4064 = vpow2.f32 %v3733_v17  ;;  %v3735_v33 = vmul.f32 -1.442695, %v750_v31  ;;  %v819_v17 = vadd.f32 %v818_v39, %v5585_v60  ;;  %v5593_v31 = vadd.f32 %v577_v55, %v562_v18  ;;  %v8416_v18 = vld [vmem:[#allocation25_spill] sm:$0xff] }
 0x22c   : > { %4066 = vpow2.f32 %v3734_v32  ;;  %v827_v32 = vadd.f32 %v826_v26, %v5591_v50  ;;  %v8419_v26 = vld [vmem:[#allocation28_spill] sm:$0xff]  ;;  %v8474_v50 = vld [vmem:[#allocation98_spill] sm:$0xff] }
 0x22d   : > { %4068 = vpow2.f32 %v3735_v33  ;;  %8409 = vst [vmem:[#allocation115_spill] sm:$0xff] %v5593_v31 }
 0x234   : > { %v4063_v34 = vpop.eup %4062 }
 0x235   : > { %v835_v35 = vadd.f32 1.0, %v4063_v34  ;;  %v825_v34 = vadd.f32 %v824_v58, %v5593_v31  ;;  %v8473_v31 = vld [vmem:[#allocation96_spill] sm:$0xff] }
 0x237   : > { %4070 = vrcp.f32 %v835_v35 }
 0x238   : > { %v4065_v37 = vpop.eup %4064 }
 0x239   : > { %v836_v43 = vadd.f32 1.0, %v4065_v37  ;;  %v4067_v56 = vpop.eup %4066 }
 0x23a   : > { %v4069_v59 = vpop.eup %4068  ;;  %v847_v61 = vadd.f32 1.0, %v4067_v56 }
 0x23b   : > { %4072 = vrcp.f32 %v836_v43  ;;  %v848_v21 = vadd.f32 1.0, %v4069_v59 }
 0x23c   : > { %4074 = vrcp.f32 %v847_v61 }
 0x23d   : > { %4076 = vrcp.f32 %v848_v21  ;;  %v8418_v21 = vld [vmem:[#allocation27_spill] sm:$0xff] }
 0x244   : > { %v4071_v12 = vpop.eup %4070 }
 0x245   : > { %v853_v22 = vmul.f32 %v4071_v12, %v821_v7  ;;  %v8415_v7 = vld [vmem:[#allocation24_spill] sm:$0xff]  ;;  %v8417_v12 = vld [vmem:[#allocation26_spill] sm:$0xff] }
 0x247   : > { %v855_v27 = vadd.f32 %v853_v22, %v819_v17  ;;  %v8420_v17 = vld [vmem:[#allocation29_spill] sm:$0xff]  ;;  %v8423_v22 = vld [vmem:[#allocation32_spill] sm:$0xff] }
 0x248   : > { %v4073_v33 = vpop.eup %4072 }
 0x249   : > { %4078 = vtanh.f32 %v855_v27  ;;  %v854_v35 = vmul.f32 %v4073_v33, %v827_v32  ;;  %v4075_v37 = vpop.eup %4074  ;;  %v8424_v27 = vld [vmem:[#allocation33_spill] sm:$0xff]  ;;  %v8425_v32 = vld [vmem:[#allocation34_spill] sm:$0xff]  ;;  %v8426_v33 = vld [vmem:[#allocation35_spill] sm:$0xff] }
 0x24a   : > { %v4077_v40 = vpop.eup %4076  ;;  %v859_v39 = vsub.f32 1.0, %v4075_v37  ;;  %v863_v52 = vmul.f32 %v4075_v37, %v8410_v51  ;;  %v8430_v37 = vld [vmem:[#allocation39_spill] sm:$0xff]  ;;  %v8435_v51 = vld [vmem:[#allocation44_spill] sm:$0xff] }
 0x24b   : > { %v856_v36 = vadd.f32 %v854_v35, %v825_v34  ;;  %v860_v55 = vsub.f32 1.0, %v4077_v40  ;;  %v864_v61 = vmul.f32 %v4077_v40, %v5050_v0  ;;  %v8414_v0 = vld [vmem:[#allocation23_spill] sm:$0xff]  ;;  %v8427_v34 = vld [vmem:[#allocation36_spill] sm:$0xff]  ;;  %v8428_v35 = vld [vmem:[#allocation37_spill] sm:$0xff] }
 0x24c   : > { %v8431_v40 = vld [vmem:[#allocation40_spill] sm:$0xff]  ;;  %8476 = vst [vmem:[#allocation23_spill] sm:$0xff] %v5680_v62 }
 0x24d   : > { %4080 = vtanh.f32 %v856_v36  ;;  %v8429_v36 = vld [vmem:[#allocation38_spill] sm:$0xff] }
 0x256   : > { %v4079_v43 = vpop.eup %4078 }
 0x257   : > { %v861_v49 = vmul.f32 %v4079_v43, %v859_v39  ;;  %v8432_v39 = vld [vmem:[#allocation41_spill] sm:$0xff]  ;;  %v8433_v43 = vld [vmem:[#allocation42_spill] sm:$0xff] }
 0x259   : > { %v5598_v53 = vadd.f32 %v863_v52, %v861_v49  ;;  %v8434_v49 = vld [vmem:[#allocation43_spill] sm:$0xff]  ;;  %v8436_v52 = vld [vmem:[#allocation45_spill] sm:$0xff] }
 0x25a   : > { %v4081_v56 = vpop.eup %4080 }
 0x25b   : > { %8411 = vst [vmem:[#allocation20_spill] sm:$0xff] %v5598_v53  ;;  %1006 = vmatprep.mubr.f32.mxu0 %v5598_v53  ;;  %v862_v59 = vmul.f32 %v4081_v56, %v860_v55  ;;  %v8437_v55 = vld [vmem:[#allocation46_spill] sm:$0xff]  ;;  %v8438_v56 = vld [vmem:[#allocation47_spill] sm:$0xff] }
 0x25d   : > { %v5602_v58 = vadd.f32 %v864_v61, %v862_v59  ;;  %v8439_v59 = vld [vmem:[#allocation48_spill] sm:$0xff]  ;;  %v8440_v61 = vld [vmem:[#allocation49_spill] sm:$0xff] }
 0x25f   : > { %8412 = vst [vmem:[#allocation116_spill] sm:$0xff] %v5602_v58  ;;  %3864 = vmatprep.subr.mxu1 %v5602_v58 }
 0x260   : > { %3865 = vmatpush3.msra.mxu1 %v5602_v58 }
 0x261   : > { %3866 = vmatprep.subr.mxu1 %v5598_v53 }
 0x262   : > { %3867 = vmatpush3.msra.mxu1 %v5598_v53 }
 0x263   : > { %3869 = vmatmul.mubr.msk.f32.vlgmr.msra.gmra.mxu1 %vm399_vm0, %v5064_v4  ;;  %1019 = vmatprep.subr.mxu1 %v8394_v30  ;;  %v8421_v4 = vld [vmem:[#allocation30_spill] sm:$0xff]  ;;  %v8422_v30 = vld [vmem:[#allocation31_spill] sm:$0xff] }
 0x264   : > { %1083 = vmatprep.mubr.f32.mxu1 %v5598_v53  ;;  %1020 = vmatpush1.msra.mxu1 %v8413_v48  ;;  %v8441_v48 = vld [vmem:[#allocation50_spill] sm:$0xff]  ;;  %v8472_v53 = vld [vmem:[#allocation92_spill] sm:$0xff] }
 0x265   : > { %1021 = vmatprep.subr.mxu1 %v8414_v0  ;;  %v8442_v0 = vld [vmem:[#allocation51_spill] sm:$0xff] }
 0x266   : > { %1022 = vmatpush1.msra.mxu1 %v8415_v7  ;;  %v8443_v7 = vld [vmem:[#allocation52_spill] sm:$0xff] }
 0x267   : > { %1023 = vmatprep.subr.mxu1 %v8416_v18  ;;  %v8444_v18 = vld [vmem:[#allocation53_spill] sm:$0xff] }
 0x268   : > { %1024 = vmatpush1.msra.mxu1 %v8417_v12  ;;  %v8445_v12 = vld [vmem:[#allocation54_spill] sm:$0xff] }
 0x269   : > { %1025 = vmatprep.subr.mxu1 %v8418_v21  ;;  %v8446_v21 = vld [vmem:[#allocation55_spill] sm:$0xff] }
 0x26a   : > { %1026 = vmatpush1.msra.mxu1 %v8419_v26 }
 0x26b   : > { %1027 = vmatprep.subr.mxu1 %v8420_v17 }
 0x26c   : > { %1028 = vmatpush1.msra.mxu1 %v8421_v4 }
 0x26d   : > { %1029 = vmatprep.subr.mxu1 %v8422_v30 }
 0x26e   : > { %1030 = vmatpush1.msra.mxu1 %v8423_v22 }
 0x26f   : > { %1031 = vmatprep.subr.mxu1 %v8424_v27 }
 0x270   : > { %1032 = vmatpush1.msra.mxu1 %v8425_v32 }
 0x271   : > { %1033 = vmatprep.subr.mxu1 %v8426_v33 }
 0x272   : > { %1034 = vmatpush1.msra.mxu1 %v8427_v34 }
 0x273   : > { %1035 = vmatprep.subr.mxu1 %v8428_v35 }
 0x274   : > { %1036 = vmatpush1.msra.mxu1 %v8429_v36 }
 0x275   : > { %1037 = vmatprep.subr.mxu1 %v8430_v37 }
 0x276   : > { %1038 = vmatpush1.msra.mxu1 %v8431_v40 }
 0x277   : > { %1039 = vmatprep.subr.mxu1 %v8432_v39 }
 0x278   : > { %1040 = vmatpush1.msra.mxu1 %v8433_v43 }
 0x279   : > { %1041 = vmatprep.subr.mxu1 %v8434_v49 }
 0x27a   : > { %1042 = vmatpush1.msra.mxu1 %v8435_v51 }
 0x27b   : > { %1043 = vmatprep.subr.mxu1 %v8436_v52 }
 0x27c   : > { %1044 = vmatpush1.msra.mxu1 %v8437_v55 }
 0x27d   : > { %1045 = vmatprep.subr.mxu1 %v8438_v56 }
 0x27e   : > { %1046 = vmatpush1.msra.mxu1 %v8439_v59 }
 0x27f   : > { %1047 = vmatprep.subr.mxu1 %v8440_v61 }
 0x280   : > { %1048 = vmatpush1.msra.mxu1 %v8441_v48 }
 0x281   : > { %1049 = vmatprep.subr.mxu1 %v8442_v0 }
 0x282   : > { %1050 = vmatpush1.msra.mxu1 %v8443_v7 }
 0x283   : > { %1051 = vmatprep.subr.mxu1 %v8444_v18 }
 0x284   : > { %1052 = vmatpush2.msra.mxu1 %v8445_v12 }
 0x285   : > { %1053 = vmatprep.subr.mxu1 %v8446_v21 }
 0x286   : > { %1054 = vmatpush2.msra.mxu1 %v8447_v44 }
 0x287   : > { %1055 = vmatprep.subr.mxu1 %v8448_v46 }
 0x288   : > { %1056 = vmatpush2.msra.mxu1 %v8449_v38 }
 0x289   : > { %1057 = vmatprep.subr.mxu1 %v8450_v42 }
 0x28a   : > { %1058 = vmatpush2.msra.mxu1 %v8451_v45 }
 0x28b   : > { %1059 = vmatprep.subr.mxu1 %v8452_v41 }
 0x28c   : > { %1060 = vmatpush2.msra.mxu1 %v8453_v14 }
 0x28d   : > { %1061 = vmatprep.subr.mxu1 %v8454_v29 }
 0x28e   : > { %1062 = vmatpush2.msra.mxu1 %v8455_v47 }
 0x28f   : > { %1063 = vmatprep.subr.mxu1 %v8456_v15 }
 0x290   : > { %1064 = vmatpush2.msra.mxu1 %v8457_v24 }
 0x291   : > { %1065 = vmatprep.subr.mxu1 %v8458_v19 }
 0x292   : > { %1066 = vmatpush2.msra.mxu1 %v8459_v20 }
 0x293   : > { %1067 = vmatprep.subr.mxu1 %v8460_v3 }
 0x294   : > { %1068 = vmatpush2.msra.mxu1 %v8461_v16 }
 0x295   : > { %1069 = vmatprep.subr.mxu1 %v8462_v8 }
 0x296   : > { %1070 = vmatpush2.msra.mxu1 %v8463_v9 }
 0x297   : > { %1071 = vmatprep.subr.mxu1 %v8464_v11 }
 0x298   : > { %1072 = vmatpush2.msra.mxu1 %v8465_v13 }
 0x299   : > { %1073 = vmatprep.subr.mxu1 %v8466_v10 }
 0x29a   : > { %1074 = vmatpush2.msra.mxu1 %v8467_v6 }
 0x29b   : > { %1075 = vmatprep.subr.mxu1 %v8468_v5 }
 0x29c   : > { %1076 = vmatpush2.msra.mxu1 %v8469_v2 }
 0x29d   : > { %1077 = vmatprep.subr.mxu1 %v8470_v1 }
 0x29e   : > { %1078 = vmatpush2.msra.mxu1 %v8471_v25 }
 0x29f   : > { %1079 = vmatprep.subr.mxu1 %v8472_v53 }
 0x2a0   : > { %1080 = vmatpush2.msra.mxu1 %v8473_v31 }
 0x2a1   : > { %1081 = vmatprep.subr.mxu1 %v8474_v50 }
 0x2a2   : > { %1082 = vmatpush2.msra.mxu1 %v5450_v23 }
 0x323   : > { %v3870_v60 = vpop.f32.mrf.mxu1 }
 0x325   : > { %v933_v57 = vpop.f32.mrf.mxu1 }
 0x326   : > { %1007 = vmatmul.mubr.f32.vlgmr.msra.gmra.mxu0 %v933_v57  ;;  %1084 = vmatmul.mubr.f32.vlgmr.msra.gmra.mxu1 %v933_v57  ;;  %v5688_v57 = vld [vmem:[#allocation7 + $0x1d0] sm:$0xff] }
 0x327   : > { %1012 = vmatprep.mubr.f32.mxu0 %v5602_v58  ;;  %1089 = vmatprep.mubr.f32.mxu1 %v5602_v58  ;;  %8477 = vst [vmem:[#allocation24_spill] sm:$0xff] %v5688_v57  ;;  %v5691_v58 = vld [vmem:[#allocation7 + $0x1b8] sm:$0xff] }
 0x328   : > { %1287 = vmatpush1.msra.mxu0 %v5677_v28  ;;  %8478 = vst [vmem:[#allocation25_spill] sm:$0xff] %v5691_v58  ;;  %v5694_v28 = vld [vmem:[#allocation7 + $0x1b0] sm:$0xff] }
 0x329   : > { %1288 = vmatprep.subr.mxu0 %v5680_v62  ;;  %8479 = vst [vmem:[#allocation26_spill] sm:$0xff] %v5694_v28  ;;  %v5697_v62 = vld [vmem:[#allocation7 + $0x198] sm:$0xff] }
 0x32a   : > { %1013 = vmatmul.mubr.f32.gmra.mxu0 %v3870_v60  ;;  %1090 = vmatmul.mubr.f32.gmra.mxu1 %v3870_v60  ;;  %8480 = vst [vmem:[#allocation27_spill] sm:$0xff] %v5697_v62  ;;  %v8485_v60 = vld [vmem:[#allocation112_spill] sm:$0xff] }
 0x32b   : > { %3875 = vmatprep.mubr.msk.f32.mxu1 %vm399_vm0, %v5684_v63  ;;  %1289 = vmatpush1.msra.mxu0 %v5688_v57  ;;  %v8506_v57 = vld [vmem:[#allocation79_spill] sm:$0xff] }
 0x32c   : > { %1290 = vmatprep.subr.mxu0 %v5691_v58  ;;  %v8505_v58 = vld [vmem:[#allocation77_spill] sm:$0xff] }
 0x32d   : > { %1291 = vmatpush1.msra.mxu0 %v5694_v28  ;;  %v8504_v28 = vld [vmem:[#allocation75_spill] sm:$0xff] }
 0x32e   : > { %1292 = vmatprep.subr.mxu0 %v5697_v62  ;;  %v8503_v62 = vld [vmem:[#allocation73_spill] sm:$0xff] }
 0x32f   : > { %1293 = vmatpush1.msra.mxu0 %v8419_v26 }
 0x330   : > { %1294 = vmatprep.subr.mxu0 %v8420_v17  ;;  %v8486_v17 = vld [vmem:[#allocation113_spill] sm:$0xff] }
 0x331   : > { %1295 = vmatpush1.msra.mxu0 %v8421_v4 }
 0x332   : > { %1296 = vmatprep.subr.mxu0 %v8422_v30 }
 0x333   : > { %1297 = vmatpush1.msra.mxu0 %v8423_v22 }
 0x334   : > { %1298 = vmatprep.subr.mxu0 %v8424_v27  ;;  %v8487_v27 = vld [vmem:[#allocation114_spill] sm:$0xff] }
 0x335   : > { %1299 = vmatpush1.msra.mxu0 %v8425_v32 }
 0x336   : > { %1300 = vmatprep.subr.mxu0 %v8426_v33 }
 0x337   : > { %1301 = vmatpush1.msra.mxu0 %v8427_v34  ;;  %v8488_v34 = vld [vmem:[#allocation115_spill] sm:$0xff] }
 0x338   : > { %1302 = vmatprep.subr.mxu0 %v8428_v35 }
 0x339   : > { %1303 = vmatpush1.msra.mxu0 %v8429_v36 }
 0x33a   : > { %1304 = vmatprep.subr.mxu0 %v8430_v37 }
 0x33b   : > { %1305 = vmatpush1.msra.mxu0 %v8431_v40 }
 0x33c   : > { %1306 = vmatprep.subr.mxu0 %v8432_v39 }
 0x33d   : > { %1307 = vmatpush1.msra.mxu0 %v8433_v43 }
 0x33e   : > { %1308 = vmatprep.subr.mxu0 %v8434_v49 }
 0x33f   : > { %1309 = vmatpush1.msra.mxu0 %v8435_v51 }
 0x340   : > { %1310 = vmatprep.subr.mxu0 %v8436_v52  ;;  %v8489_v52 = vld [vmem:[#allocation20_spill] sm:$0xff] }
 0x341   : > { %1311 = vmatpush1.msra.mxu0 %v8437_v55 }
 0x342   : > { %1312 = vmatprep.subr.mxu0 %v8438_v56 }
 0x343   : > { %1313 = vmatpush1.msra.mxu0 %v8439_v59 }
 0x344   : > { %1314 = vmatprep.subr.mxu0 %v8440_v61 }
 0x345   : > { %1315 = vmatpush1.msra.mxu0 %v8441_v48 }
 0x346   : > { %1316 = vmatprep.subr.mxu0 %v8442_v0  ;;  %v8491_v0 = vld [vmem:[#allocation116_spill] sm:$0xff] }
 0x347   : > { %1317 = vmatpush1.msra.mxu0 %v8443_v7 }
 0x348   : > { %1318 = vmatprep.subr.mxu0 %v8444_v18 }
 0x349   : > { %1319 = vmatpush2.msra.mxu0 %v8445_v12  ;;  %v5780_v12 = vld [vmem:[%s5032_s17 + $0x8] sm:$0xff] }
 0x34a   : > { %1320 = vmatprep.subr.mxu0 %v8446_v21  ;;  %8492 = vst [vmem:[#allocation30_spill] sm:$0xff] %v5780_v12  ;;  %v5786_v21 = vld [vmem:[#allocation7 + $0x1e0] sm:$0xff] }
 0x34b   : > { %1321 = vmatpush2.msra.mxu0 %v8447_v44 }
 0x34c   : > { %1322 = vmatprep.subr.mxu0 %v8448_v46 }
 0x34d   : > { %1323 = vmatpush2.msra.mxu0 %v8449_v38 }
 0x34e   : > { %1324 = vmatprep.subr.mxu0 %v8450_v42 }
 0x34f   : > { %1325 = vmatpush2.msra.mxu0 %v8451_v45 }
 0x350   : > { %1326 = vmatprep.subr.mxu0 %v8452_v41 }
 0x351   : > { %1327 = vmatpush2.msra.mxu0 %v8453_v14 }
 0x352   : > { %1328 = vmatprep.subr.mxu0 %v8454_v29 }
 0x353   : > { %1329 = vmatpush2.msra.mxu0 %v8455_v47 }
 0x354   : > { %1330 = vmatprep.subr.mxu0 %v8456_v15 }
 0x355   : > { %1331 = vmatpush2.msra.mxu0 %v8457_v24 }
 0x356   : > { %1332 = vmatprep.subr.mxu0 %v8458_v19  ;;  %v8482_v19 = vld [vmem:[#allocation110_spill] sm:$0xff] }
 0x357   : > { %1333 = vmatpush2.msra.mxu0 %v8459_v20 }
 0x358   : > { %1334 = vmatprep.subr.mxu0 %v8460_v3  ;;  %v5757_v3 = vld [vmem:[#allocation7 + $0x1e8] sm:$0xff] }
 0x359   : > { %1335 = vmatpush2.msra.mxu0 %v8461_v16  ;;  %8481 = vst [vmem:[#allocation28_spill] sm:$0xff] %v5757_v3 }
 0x35a   : > { %1336 = vmatprep.subr.mxu0 %v8462_v8 }
 0x35b   : > { %1337 = vmatpush2.msra.mxu0 %v8463_v9 }
 0x35c   : > { %1338 = vmatprep.subr.mxu0 %v8464_v11 }
 0x35d   : > { %1339 = vmatpush2.msra.mxu0 %v8465_v13 }
 0x35e   : > { %1340 = vmatprep.subr.mxu0 %v8466_v10  ;;  %v8484_v10 = vld [vmem:[#allocation111_spill] sm:$0xff] }
 0x35f   : > { %1341 = vmatpush2.msra.mxu0 %v8467_v6 }
 0x360   : > { %1342 = vmatprep.subr.mxu0 %v8468_v5 }
 0x361   : > { %1343 = vmatpush2.msra.mxu0 %v8469_v2 }
 0x362   : > { %1344 = vmatprep.subr.mxu0 %v8470_v1  ;;  %v8483_v1 = vld [vmem:[#allocation109_spill] sm:$0xff] }
 0x363   : > { %1345 = vmatpush2.msra.mxu0 %v8471_v25 }
 0x364   : > { %1346 = vmatprep.subr.mxu0 %v8472_v53 }
 0x365   : > { %1347 = vmatpush2.msra.mxu0 %v8473_v31 }
 0x366   : > { %1348 = vmatprep.subr.mxu0 %v8474_v50 }
 0x367   : > { %1349 = vmatpush2.msra.mxu0 %v5450_v23 }
 0x368   : > { %1476 = vmatprep.subr.mxu0 %v5757_v3 }
 0x3e6   : > { %v1008_v8 = vpop.f32.mrf.mxu0  ;;  %v1085_v38 = vpop.f32.mrf.mxu1 }
 0x3e7   : > { %v1009_v9 = vadd.f32 %v1008_v8, %v5562_v54  ;;  %v1086_v4 = vadd.f32 %v1085_v38, %v8486_v17  ;;  %v5789_v8 = vld [vmem:[#allocation7 + $0x1c8] sm:$0xff]  ;;  %v5834_v38 = vld [vmem:[#allocation7 + $0xe0] sm:$0xff]  ;;  %v8511_v17 = vld [vmem:[#allocation89_spill] sm:$0xff] }
 0x3e8   : > { %v1010_v11 = vpop.f32.mrf.mxu0  ;;  %v1087_v42 = vpop.f32.mrf.mxu1 }
 0x3e9   : > { %v3738_v13 = vmul.f32 -1.442695, %v1009_v9  ;;  %v1011_v2 = vadd.f32 %v1010_v11, %v8483_v1  ;;  %v1088_v50 = vadd.f32 %v1087_v42, %v8485_v60  ;;  %v5792_v9 = vld [vmem:[#allocation7 + $0x1c0] sm:$0xff]  ;;  %v5795_v11 = vld [vmem:[#allocation7 + $0x1a8] sm:$0xff] }
 0x3ea   : > { %v1014_v15 = vpop.f32.mrf.mxu0  ;;  %v1091_v45 = vpop.f32.mrf.mxu1  ;;  %v5840_v42 = vld [vmem:[#allocation7 + $0xc0] sm:$0xff]  ;;  %v8512_v60 = vld [vmem:[#allocation91_spill] sm:$0xff] }
 0x3eb   : > { %4082 = vpow2.f32 %v3738_v13  ;;  %v1015_v25 = vadd.f32 %v1014_v15, %v8482_v19  ;;  %v3740_v14 = vmul.f32 -1.442695, %v1011_v2  ;;  %v1092_v35 = vadd.f32 %v1091_v45, %v8488_v34  ;;  %v5798_v13 = vld [vmem:[#allocation7 + $0x1a0] sm:$0xff]  ;;  %v5801_v15 = vld [vmem:[#allocation7 + $0x188] sm:$0xff]  ;;  %v8509_v34 = vld [vmem:[#allocation85_spill] sm:$0xff] }
 0x3ec   : > { %v1016_v6 = vpop.f32.mrf.mxu0  ;;  %v1093_v26 = vpop.f32.mrf.mxu1  ;;  %v5807_v2 = vld [vmem:[#allocation7 + $0x168] sm:$0xff]  ;;  %v5846_v45 = vld [vmem:[#allocation7 + $0xa0] sm:$0xff] }
 0x3ed   : > { %v3739_v5 = vmul.f32 -1.442695, %v1015_v25  ;;  %v1017_v23 = vadd.f32 %v1016_v6, %v8484_v10  ;;  %v1094_v32 = vadd.f32 %v1093_v26, %v8487_v27  ;;  %v5804_v25 = vld [vmem:[#allocation7 + $0x180] sm:$0xff]  ;;  %v5813_v6 = vld [vmem:[#allocation7 + $0x148] sm:$0xff] }
 0x3ee   : > { %v5864_v26 = vld [vmem:[#allocation7 + $0x40] sm:$0xff]  ;;  %v8510_v27 = vld [vmem:[#allocation87_spill] sm:$0xff] }
 0x3ef   : > { %4084 = vpow2.f32 %v3739_v5  ;;  %v3741_v16 = vmul.f32 -1.442695, %v1017_v23  ;;  %v5810_v5 = vld [vmem:[#allocation7 + $0x160] sm:$0xff] }
 0x3f0   : > { %4086 = vpow2.f32 %v3740_v14  ;;  %v5816_v23 = vld [vmem:[#allocation7 + $0x140] sm:$0xff]  ;;  %v5819_v14 = vld [vmem:[#allocation7 + $0x128] sm:$0xff] }
 0x3f1   : > { %4088 = vpow2.f32 %v3741_v16  ;;  %v5822_v16 = vld [vmem:[#allocation7 + $0x120] sm:$0xff] }
 0x3f8   : > { %v4083_v20 = vpop.eup %4082 }
 0x3f9   : > { %v1102_v24 = vadd.f32 1.0, %v4083_v20  ;;  %v5825_v20 = vld [vmem:[#allocation7 + $0x108] sm:$0xff] }
 0x3fb   : > { %4090 = vrcp.f32 %v1102_v24  ;;  %v5828_v24 = vld [vmem:[#allocation7 + $0x100] sm:$0xff] }
 0x3fc   : > { %v4085_v29 = vpop.eup %4084 }
 0x3fd   : > { %v1103_v41 = vadd.f32 1.0, %v4085_v29  ;;  %v4087_v44 = vpop.eup %4086  ;;  %v5831_v29 = vld [vmem:[#allocation7 + $0xe8] sm:$0xff] }
 0x3fe   : > { %v4089_v46 = vpop.eup %4088  ;;  %v1114_v47 = vadd.f32 1.0, %v4087_v44  ;;  %v5843_v44 = vld [vmem:[#allocation7 + $0xa8] sm:$0xff] }
 0x3ff   : > { %4092 = vrcp.f32 %v1103_v41  ;;  %v1115_v53 = vadd.f32 1.0, %v4089_v46  ;;  %v5837_v41 = vld [vmem:[#allocation7 + $0xc8] sm:$0xff] }
 0x400   : > { %4094 = vrcp.f32 %v1114_v47  ;;  %v5849_v46 = vld [vmem:[#allocation7 + $0x88] sm:$0xff]  ;;  %v5852_v47 = vld [vmem:[#allocation7 + $0x80] sm:$0xff] }
 0x401   : > { %4096 = vrcp.f32 %v1115_v53  ;;  %v5861_v53 = vld [vmem:[#allocation7 + $0x48] sm:$0xff] }
 0x408   : > { %v4091_v31 = vpop.eup %4090 }
 0x409   : > { %v1120_v30 = vmul.f32 %v4091_v31, %v1088_v50  ;;  %v5855_v50 = vld [vmem:[#allocation7 + $0x68] sm:$0xff]  ;;  %v5858_v31 = vld [vmem:[#allocation7 + $0x60] sm:$0xff] }
 0x40b   : > { %v1122_v22 = vadd.f32 %v1120_v30, %v1086_v4  ;;  %v5867_v4 = vld [vmem:[#allocation7 + $0x28] sm:$0xff]  ;;  %v5870_v30 = vld [vmem:[#allocation7 + $0x20] sm:$0xff] }
 0x40c   : > { %v4093_v33 = vpop.eup %4092 }
 0x40d   : > { %4098 = vtanh.f32 %v1122_v22  ;;  %v1121_v36 = vmul.f32 %v4093_v33, %v1094_v32  ;;  %v4095_v40 = vpop.eup %4094  ;;  %v5873_v22 = vld [vmem:[#allocation7 + $0x8] sm:$0xff]  ;;  %v5876_v32 = vld [vmem:[#allocation7] sm:$0xff] }
 0x40e   : > { %v4097_v39 = vpop.eup %4096  ;;  %v1126_v43 = vsub.f32 1.0, %v4095_v40  ;;  %v1130_v55 = vmul.f32 %v4095_v40, %v8489_v52  ;;  %v5879_v33 = vld [vmem:[#allocation7 + $0x3e8] sm:$0xff]  ;;  %v5906_v52 = vld [vmem:[#allocation7 + $0x360] sm:$0xff] }
 0x40f   : > { %v1123_v37 = vadd.f32 %v1121_v36, %v1092_v35  ;;  %v1127_v59 = vsub.f32 1.0, %v4097_v39  ;;  %v1131_v7 = vmul.f32 %v4097_v39, %v8491_v0  ;;  %v5882_v35 = vld [vmem:[#allocation7 + $0x3e0] sm:$0xff]  ;;  %v5885_v36 = vld [vmem:[#allocation7 + $0x3c8] sm:$0xff]  ;;  %8495 = vst [vmem:[#allocation33_spill] sm:$0xff] %v5906_v52 }
 0x410   : > { %v5891_v40 = vld [vmem:[#allocation7 + $0x3a8] sm:$0xff]  ;;  %v5894_v39 = vld [vmem:[#allocation7 + $0x3a0] sm:$0xff] }
 0x411   : > { %4100 = vtanh.f32 %v1123_v37  ;;  %v5888_v37 = vld [vmem:[#allocation7 + $0x3c0] sm:$0xff]  ;;  %v5921_v0 = vld [vmem:[#allocation7 + $0x308] sm:$0xff] }
 0x412   : > { %8500 = vst [vmem:[#allocation38_spill] sm:$0xff] %v5921_v0 }
 0x41a   : > { %v4099_v49 = vpop.eup %4098 }
 0x41b   : > { %v1128_v51 = vmul.f32 %v4099_v49, %v1126_v43  ;;  %v5897_v43 = vld [vmem:[#allocation7 + $0x388] sm:$0xff]  ;;  %v5900_v49 = vld [vmem:[#allocation7 + $0x380] sm:$0xff] }
 0x41c   : > { %8493 = vst [vmem:[#allocation31_spill] sm:$0xff] %v5900_v49 }
 0x41d   : > { %v5769_v56 = vadd.f32 %v1130_v55, %v1128_v51  ;;  %v5903_v51 = vld [vmem:[#allocation7 + $0x368] sm:$0xff] }
 0x41e   : > { %v4101_v61 = vpop.eup %4100  ;;  %8494 = vst [vmem:[#allocation32_spill] sm:$0xff] %v5903_v51  ;;  %v5909_v55 = vld [vmem:[#allocation7 + $0x348] sm:$0xff] }
 0x41f   : > { %8490 = vst [vmem:[#allocation29_spill] sm:$0xff] %v5769_v56  ;;  %1350 = vmatprep.mubr.f32.mxu0 %v5769_v56  ;;  %v1129_v48 = vmul.f32 %v4101_v61, %v1127_v59  ;;  %8496 = vst [vmem:[#allocation34_spill] sm:$0xff] %v5909_v55  ;;  %v5912_v59 = vld [vmem:[#allocation7 + $0x340] sm:$0xff]  ;;  %v5915_v61 = vld [vmem:[#allocation7 + $0x328] sm:$0xff] }
 0x420   : > { %8497 = vst [vmem:[#allocation35_spill] sm:$0xff] %v5912_v59  ;;  %8498 = vst [vmem:[#allocation36_spill] sm:$0xff] %v5915_v61 }
 0x421   : > { %v5773_v18 = vadd.f32 %v1131_v7, %v1129_v48  ;;  %v5918_v48 = vld [vmem:[#allocation7 + $0x320] sm:$0xff] }
 0x422   : > { %8499 = vst [vmem:[#allocation37_spill] sm:$0xff] %v5918_v48  ;;  %v5924_v7 = vld [vmem:[#allocation7 + $0x300] sm:$0xff] }
 0x423   : > { %3871 = vmatprep.subr.mxu1 %v5773_v18  ;;  %8501 = vst [vmem:[#allocation39_spill] sm:$0xff] %v5924_v7 }
 0x424   : > { %3872 = vmatpush3.msra.mxu1 %v5773_v18 }
 0x425   : > { %3873 = vmatprep.subr.mxu1 %v5769_v56 }
 0x426   : > { %3874 = vmatpush3.msra.mxu1 %v5769_v56 }
 0x427   : > { %3876 = vmatmul.mubr.msk.f32.vlgmr.msra.gmra.mxu1 %vm399_vm0, %v5780_v12  ;;  %1209 = vmatprep.subr.mxu1 %v5757_v3  ;;  %v8502_v3 = vld [vmem:[#allocation71_spill] sm:$0xff]  ;;  %v8507_v12 = vld [vmem:[#allocation81_spill] sm:$0xff] }
 0x428   : > { %1273 = vmatprep.mubr.f32.mxu1 %v5769_v56  ;;  %1210 = vmatpush1.msra.mxu1 %v5786_v21  ;;  %v8508_v56 = vld [vmem:[#allocation83_spill] sm:$0xff] }
 0x429   : > { %1211 = vmatprep.subr.mxu1 %v5789_v8 }
 0x42a   : > { %1212 = vmatpush1.msra.mxu1 %v5792_v9 }
 0x42b   : > { %1213 = vmatprep.subr.mxu1 %v5795_v11 }
 0x42c   : > { %1214 = vmatpush1.msra.mxu1 %v5798_v13 }
 0x42d   : > { %1215 = vmatprep.subr.mxu1 %v5801_v15 }
 0x42e   : > { %1216 = vmatpush1.msra.mxu1 %v5804_v25 }
 0x42f   : > { %1217 = vmatprep.subr.mxu1 %v5807_v2 }
 0x430   : > { %1218 = vmatpush1.msra.mxu1 %v5810_v5 }
 0x431   : > { %1219 = vmatprep.subr.mxu1 %v5813_v6 }
 0x432   : > { %1220 = vmatpush1.msra.mxu1 %v5816_v23 }
 0x433   : > { %1221 = vmatprep.subr.mxu1 %v5819_v14 }
 0x434   : > { %1222 = vmatpush1.msra.mxu1 %v5822_v16 }
 0x435   : > { %1223 = vmatprep.subr.mxu1 %v5825_v20 }
 0x436   : > { %1224 = vmatpush1.msra.mxu1 %v5828_v24 }
 0x437   : > { %1225 = vmatprep.subr.mxu1 %v5831_v29 }
 0x438   : > { %1226 = vmatpush1.msra.mxu1 %v5834_v38 }
 0x439   : > { %1227 = vmatprep.subr.mxu1 %v5837_v41 }
 0x43a   : > { %1228 = vmatpush1.msra.mxu1 %v5840_v42 }
 0x43b   : > { %1229 = vmatprep.subr.mxu1 %v5843_v44 }
 0x43c   : > { %1230 = vmatpush1.msra.mxu1 %v5846_v45 }
 0x43d   : > { %1231 = vmatprep.subr.mxu1 %v5849_v46 }
 0x43e   : > { %1232 = vmatpush1.msra.mxu1 %v5852_v47 }
 0x43f   : > { %1233 = vmatprep.subr.mxu1 %v5855_v50 }
 0x440   : > { %1234 = vmatpush1.msra.mxu1 %v5858_v31 }
 0x441   : > { %1235 = vmatprep.subr.mxu1 %v5861_v53 }
 0x442   : > { %1236 = vmatpush1.msra.mxu1 %v5864_v26 }
 0x443   : > { %1237 = vmatprep.subr.mxu1 %v5867_v4 }
 0x444   : > { %1238 = vmatpush1.msra.mxu1 %v5870_v30 }
 0x445   : > { %1239 = vmatprep.subr.mxu1 %v5873_v22 }
 0x446   : > { %1240 = vmatpush1.msra.mxu1 %v5876_v32 }
 0x447   : > { %1241 = vmatprep.subr.mxu1 %v5879_v33 }
 0x448   : > { %1242 = vmatpush2.msra.mxu1 %v5882_v35 }
 0x449   : > { %1243 = vmatprep.subr.mxu1 %v5885_v36 }
 0x44a   : > { %1244 = vmatpush2.msra.mxu1 %v5888_v37 }
 0x44b   : > { %1245 = vmatprep.subr.mxu1 %v5891_v40 }
 0x44c   : > { %1246 = vmatpush2.msra.mxu1 %v5894_v39 }
 0x44d   : > { %1247 = vmatprep.subr.mxu1 %v5897_v43 }
 0x44e   : > { %1248 = vmatpush2.msra.mxu1 %v5900_v49 }
 0x44f   : > { %1249 = vmatprep.subr.mxu1 %v5903_v51 }
 0x450   : > { %1250 = vmatpush2.msra.mxu1 %v5906_v52 }
 0x451   : > { %1251 = vmatprep.subr.mxu1 %v5909_v55 }
 0x452   : > { %1252 = vmatpush2.msra.mxu1 %v5912_v59 }
 0x453   : > { %1253 = vmatprep.subr.mxu1 %v5915_v61 }
 0x454   : > { %1254 = vmatpush2.msra.mxu1 %v5918_v48 }
 0x455   : > { %1255 = vmatprep.subr.mxu1 %v5921_v0 }
 0x456   : > { %1256 = vmatpush2.msra.mxu1 %v5924_v7 }
 0x457   : > { %1257 = vmatprep.subr.mxu1 %v8502_v3  ;;  %v8513_v3 = vld [vmem:[#allocation93_spill] sm:$0xff] }
 0x458   : > { %1258 = vmatpush2.msra.mxu1 %v8503_v62  ;;  %v8514_v62 = vld [vmem:[#allocation94_spill] sm:$0xff] }
 0x459   : > { %1259 = vmatprep.subr.mxu1 %v8504_v28  ;;  %v8515_v28 = vld [vmem:[#allocation95_spill] sm:$0xff] }
 0x45a   : > { %1260 = vmatpush2.msra.mxu1 %v8505_v58  ;;  %v8516_v58 = vld [vmem:[#allocation97_spill] sm:$0xff] }
 0x45b   : > { %1261 = vmatprep.subr.mxu1 %v8506_v57  ;;  %v8517_v57 = vld [vmem:[#allocation99_spill] sm:$0xff] }
 0x45c   : > { %1262 = vmatpush2.msra.mxu1 %v8507_v12 }
 0x45d   : > { %1263 = vmatprep.subr.mxu1 %v8508_v56 }
 0x45e   : > { %1264 = vmatpush2.msra.mxu1 %v8509_v34  ;;  %v6003_v34 = vld [vmem:[#allocation7 + $0x2c0] sm:$0xff] }
 0x45f   : > { %1265 = vmatprep.subr.mxu1 %v8510_v27  ;;  %v6000_v27 = vld [vmem:[#allocation7 + $0x2c8] sm:$0xff]  ;;  %8521 = vst [vmem:[#allocation43_spill] sm:$0xff] %v6003_v34 }
 0x460   : > { %1266 = vmatpush2.msra.mxu1 %v8511_v17  ;;  %v5997_v17 = vld [vmem:[#allocation7 + $0x2e0] sm:$0xff]  ;;  %8520 = vst [vmem:[#allocation42_spill] sm:$0xff] %v6000_v27 }
 0x461   : > { %1267 = vmatprep.subr.mxu1 %v8512_v60  ;;  %v5994_v60 = vld [vmem:[#allocation7 + $0x2e8] sm:$0xff]  ;;  %8519 = vst [vmem:[#allocation41_spill] sm:$0xff] %v5997_v17 }
 0x462   : > { %1268 = vmatpush2.msra.mxu1 %v8513_v3  ;;  %8518 = vst [vmem:[#allocation40_spill] sm:$0xff] %v5994_v60  ;;  %v6006_v3 = vld [vmem:[#allocation7 + $0x2a8] sm:$0xff] }
 0x463   : > { %1269 = vmatprep.subr.mxu1 %v8514_v62  ;;  %8522 = vst [vmem:[#allocation44_spill] sm:$0xff] %v6006_v3  ;;  %v6009_v62 = vld [vmem:[#allocation7 + $0x2a0] sm:$0xff] }
 0x464   : > { %1270 = vmatpush2.msra.mxu1 %v8515_v28  ;;  %8523 = vst [vmem:[#allocation45_spill] sm:$0xff] %v6009_v62  ;;  %v6012_v28 = vld [vmem:[#allocation7 + $0x288] sm:$0xff] }
 0x465   : > { %1271 = vmatprep.subr.mxu1 %v8516_v58  ;;  %8524 = vst [vmem:[#allocation46_spill] sm:$0xff] %v6012_v28  ;;  %v6015_v58 = vld [vmem:[#allocation7 + $0x280] sm:$0xff] }
 0x466   : > { %1272 = vmatpush2.msra.mxu1 %v8517_v57  ;;  %8525 = vst [vmem:[#allocation47_spill] sm:$0xff] %v6015_v58  ;;  %v6018_v57 = vld [vmem:[#allocation7 + $0x268] sm:$0xff] }
 0x467   : > { %8526 = vst [vmem:[#allocation48_spill] sm:$0xff] %v6018_v57 }
 0x4e7   : > { %v3877_v12 = vpop.f32.mrf.mxu1 }
 0x4e9   : > { %v1200_v56 = vpop.f32.mrf.mxu1 }
 0x4ea   : > { %1274 = vmatmul.mubr.f32.vlgmr.msra.gmra.mxu1 %v1200_v56  ;;  %1351 = vmatmul.mubr.f32.vlgmr.msra.gmra.mxu0 %v1200_v56  ;;  %v6024_v56 = vld [vmem:[#allocation7 + $0x248] sm:$0xff] }
 0x4eb   : > { %1279 = vmatprep.mubr.f32.mxu1 %v5773_v18  ;;  %1356 = vmatprep.mubr.f32.mxu0 %v5773_v18  ;;  %8528 = vst [vmem:[#allocation50_spill] sm:$0xff] %v6024_v56 }
 0x4ec   : > { %1477 = vmatpush1.msra.mxu0 %v5786_v21 }
 0x4ed   : > { %1478 = vmatprep.subr.mxu0 %v5789_v8 }
 0x4ee   : > { %1280 = vmatmul.mubr.f32.gmra.mxu1 %v3877_v12  ;;  %1357 = vmatmul.mubr.f32.gmra.mxu0 %v3877_v12  ;;  %v6021_v12 = vld [vmem:[#allocation7 + $0x260] sm:$0xff] }
 0x4ef   : > { %3882 = vmatprep.mubr.msk.f32.mxu1 %vm399_vm0, %v5684_v63  ;;  %1479 = vmatpush1.msra.mxu0 %v5792_v9  ;;  %8527 = vst [vmem:[#allocation49_spill] sm:$0xff] %v6021_v12 }
 0x4f0   : > { %1480 = vmatprep.subr.mxu0 %v5795_v11 }
 0x4f1   : > { %1481 = vmatpush1.msra.mxu0 %v5798_v13 }
 0x4f2   : > { %1482 = vmatprep.subr.mxu0 %v5801_v15 }
 0x4f3   : > { %1483 = vmatpush1.msra.mxu0 %v5804_v25 }
 0x4f4   : > { %1484 = vmatprep.subr.mxu0 %v5807_v2 }
 0x4f5   : > { %1485 = vmatpush1.msra.mxu0 %v5810_v5 }
 0x4f6   : > { %1486 = vmatprep.subr.mxu0 %v5813_v6 }
 0x4f7   : > { %1487 = vmatpush1.msra.mxu0 %v5816_v23 }
 0x4f8   : > { %1488 = vmatprep.subr.mxu0 %v5819_v14 }
 0x4f9   : > { %1489 = vmatpush1.msra.mxu0 %v5822_v16 }
 0x4fa   : > { %1490 = vmatprep.subr.mxu0 %v5825_v20 }
 0x4fb   : > { %1491 = vmatpush1.msra.mxu0 %v5828_v24 }
 0x4fc   : > { %1492 = vmatprep.subr.mxu0 %v5831_v29 }
 0x4fd   : > { %1493 = vmatpush1.msra.mxu0 %v5834_v38 }
 0x4fe   : > { %1494 = vmatprep.subr.mxu0 %v5837_v41 }
 0x4ff   : > { %1495 = vmatpush1.msra.mxu0 %v5840_v42 }
 0x500   : > { %1496 = vmatprep.subr.mxu0 %v5843_v44 }
 0x501   : > { %1497 = vmatpush1.msra.mxu0 %v5846_v45 }
 0x502   : > { %1498 = vmatprep.subr.mxu0 %v5849_v46 }
 0x503   : > { %1499 = vmatpush1.msra.mxu0 %v5852_v47 }
 0x504   : > { %1500 = vmatprep.subr.mxu0 %v5855_v50 }
 0x505   : > { %1501 = vmatpush1.msra.mxu0 %v5858_v31 }
 0x506   : > { %1502 = vmatprep.subr.mxu0 %v5861_v53 }
 0x507   : > { %1503 = vmatpush1.msra.mxu0 %v5864_v26 }
 0x508   : > { %1504 = vmatprep.subr.mxu0 %v5867_v4 }
 0x509   : > { %1505 = vmatpush1.msra.mxu0 %v5870_v30 }
 0x50a   : > { %1506 = vmatprep.subr.mxu0 %v5873_v22 }
 0x50b   : > { %1507 = vmatpush1.msra.mxu0 %v5876_v32 }
 0x50c   : > { %1508 = vmatprep.subr.mxu0 %v5879_v33 }
 0x50d   : > { %1509 = vmatpush2.msra.mxu0 %v5882_v35 }
 0x50e   : > { %1510 = vmatprep.subr.mxu0 %v5885_v36 }
 0x50f   : > { %1511 = vmatpush2.msra.mxu0 %v5888_v37 }
 0x510   : > { %1512 = vmatprep.subr.mxu0 %v5891_v40 }
 0x511   : > { %1513 = vmatpush2.msra.mxu0 %v5894_v39 }
 0x512   : > { %1514 = vmatprep.subr.mxu0 %v5897_v43 }
 0x513   : > { %1515 = vmatpush2.msra.mxu0 %v5900_v49  ;;  %v8538_v49 = vld [vmem:[#allocation29_spill] sm:$0xff] }
 0x514   : > { %1516 = vmatprep.subr.mxu0 %v5903_v51 }
 0x515   : > { %1517 = vmatpush2.msra.mxu0 %v5906_v52 }
 0x516   : > { %1518 = vmatprep.subr.mxu0 %v5909_v55 }
 0x517   : > { %1519 = vmatpush2.msra.mxu0 %v5912_v59 }
 0x518   : > { %1520 = vmatprep.subr.mxu0 %v5915_v61 }
 0x519   : > { %1521 = vmatpush2.msra.mxu0 %v5918_v48 }
 0x51a   : > { %1522 = vmatprep.subr.mxu0 %v5921_v0 }
 0x51b   : > { %1523 = vmatpush2.msra.mxu0 %v5924_v7 }
 0x51c   : > { %1524 = vmatprep.subr.mxu0 %v5994_v60 }
 0x51d   : > { %1525 = vmatpush2.msra.mxu0 %v5997_v17 }
 0x51e   : > { %1526 = vmatprep.subr.mxu0 %v6000_v27 }
 0x51f   : > { %1527 = vmatpush2.msra.mxu0 %v6003_v34 }
 0x520   : > { %1528 = vmatprep.subr.mxu0 %v6006_v3 }
 0x521   : > { %1529 = vmatpush2.msra.mxu0 %v6009_v62  ;;  %v6027_v62 = vld [vmem:[#allocation7 + $0x240] sm:$0xff] }
 0x522   : > { %1530 = vmatprep.subr.mxu0 %v6012_v28  ;;  %8529 = vst [vmem:[#allocation51_spill] sm:$0xff] %v6027_v62  ;;  %v6030_v28 = vld [vmem:[#allocation7 + $0x228] sm:$0xff] }
 0x523   : > { %1531 = vmatpush2.msra.mxu0 %v6015_v58  ;;  %8530 = vst [vmem:[#allocation52_spill] sm:$0xff] %v6030_v28  ;;  %v6033_v58 = vld [vmem:[#allocation7 + $0x220] sm:$0xff] }
 0x524   : > { %1532 = vmatprep.subr.mxu0 %v6018_v57  ;;  %8531 = vst [vmem:[#allocation53_spill] sm:$0xff] %v6033_v58  ;;  %v6036_v57 = vld [vmem:[#allocation7 + $0x208] sm:$0xff] }
 0x525   : > { %1533 = vmatpush2.msra.mxu0 %v6021_v12  ;;  %8532 = vst [vmem:[#allocation54_spill] sm:$0xff] %v6036_v57  ;;  %v6039_v12 = vld [vmem:[#allocation7 + $0x200] sm:$0xff] }
 0x526   : > { %1534 = vmatprep.subr.mxu0 %v6024_v56  ;;  %8533 = vst [vmem:[#allocation55_spill] sm:$0xff] %v6039_v12 }
 0x527   : > { %1535 = vmatpush2.msra.mxu0 %v6027_v62 }
 0x528   : > { %1536 = vmatprep.subr.mxu0 %v6030_v28 }
 0x529   : > { %1537 = vmatpush2.msra.mxu0 %v6033_v58 }
 0x52a   : > { %1538 = vmatprep.subr.mxu0 %v6036_v57 }
 0x52b   : > { %1539 = vmatpush2.msra.mxu0 %v6039_v12 }
 0x5aa   : > { %v1275_v56 = vpop.f32.mrf.mxu1 }
 0x5ab   : > { %v1276_v3 = vadd.f32 %v1275_v56, %v5562_v54 }
 0x5ac   : > { %v1277_v62 = vpop.f32.mrf.mxu1 }
 0x5ad   : > { %v3744_v34 = vmul.f32 -1.442695, %v1276_v3  ;;  %v1278_v17 = vadd.f32 %v1277_v62, %v8483_v1  ;;  %v1352_v3 = vpop.f32.mrf.mxu0  ;;  %v8534_v1 = vld [vmem:[#allocation112_spill] sm:$0xff] }
 0x5ae   : > { %v1281_v27 = vpop.f32.mrf.mxu1 }
 0x5af   : > { %4102 = vpow2.f32 %v3744_v34  ;;  %v1282_v28 = vadd.f32 %v1281_v27, %v8482_v19  ;;  %v3746_v7 = vmul.f32 -1.442695, %v1278_v17  ;;  %v1354_v34 = vpop.f32.mrf.mxu0 }
 0x5b0   : > { %v1283_v60 = vpop.f32.mrf.mxu1 }
 0x5b1   : > { %v3745_v58 = vmul.f32 -1.442695, %v1282_v28  ;;  %v1284_v57 = vadd.f32 %v1283_v60, %v8484_v10  ;;  %v1358_v19 = vpop.f32.mrf.mxu0 }
 0x5b3   : > { %4104 = vpow2.f32 %v3745_v58  ;;  %v3747_v0 = vmul.f32 -1.442695, %v1284_v57  ;;  %v1355_v58 = vadd.f32 %v1354_v34, %v8534_v1  ;;  %v1360_v17 = vpop.f32.mrf.mxu0  ;;  %v8535_v57 = vld [vmem:[#allocation113_spill] sm:$0xff] }
 0x5b4   : > { %4106 = vpow2.f32 %v3746_v7  ;;  %v1353_v7 = vadd.f32 %v1352_v3, %v8535_v57 }
 0x5b5   : > { %4108 = vpow2.f32 %v3747_v0 }
 0x5bc   : > { %v4103_v12 = vpop.eup %4102 }
 0x5bd   : > { %v1369_v48 = vadd.f32 1.0, %v4103_v12 }
 0x5bf   : > { %4110 = vrcp.f32 %v1369_v48  ;;  %v8536_v48 = vld [vmem:[#allocation114_spill] sm:$0xff] }
 0x5c0   : > { %v4105_v56 = vpop.eup %4104  ;;  %v1361_v10 = vadd.f32 %v1360_v17, %v8536_v48 }
 0x5c1   : > { %v1370_v54 = vadd.f32 1.0, %v4105_v56  ;;  %v4107_v27 = vpop.eup %4106 }
 0x5c2   : > { %v4109_v62 = vpop.eup %4108  ;;  %v1381_v28 = vadd.f32 1.0, %v4107_v27 }
 0x5c3   : > { %4112 = vrcp.f32 %v1370_v54  ;;  %v1382_v60 = vadd.f32 1.0, %v4109_v62  ;;  %v8537_v54 = vld [vmem:[#allocation115_spill] sm:$0xff] }
 0x5c4   : > { %4114 = vrcp.f32 %v1381_v28  ;;  %v1359_v56 = vadd.f32 %v1358_v19, %v8537_v54 }
 0x5c5   : > { %4116 = vrcp.f32 %v1382_v60 }
 0x5cc   : > { %v4111_v61 = vpop.eup %4110 }
 0x5cd   : > { %v1387_v0 = vmul.f32 %v4111_v61, %v1355_v58 }
 0x5cf   : > { %v1389_v12 = vadd.f32 %v1387_v0, %v1353_v7  ;;  %v6073_v7 = vld [vmem:[#allocation7 + $0x190] sm:$0xff]  ;;  %v6076_v0 = vld [vmem:[#allocation7 + $0x178] sm:$0xff] }
 0x5d0   : > { %v4113_v59 = vpop.eup %4112 }
 0x5d1   : > { %4118 = vtanh.f32 %v1389_v12  ;;  %v1388_v55 = vmul.f32 %v4113_v59, %v1361_v10  ;;  %v4115_v27 = vpop.eup %4114  ;;  %v6063_v10 = vld [vmem:[#allocation7 + $0x1f8] sm:$0xff]  ;;  %v8545_v59 = vld [vmem:[#allocation27_spill] sm:$0xff]  ;;  %v6079_v12 = vld [vmem:[#allocation7 + $0x170] sm:$0xff] }
 0x5d2   : > { %v4117_v34 = vpop.eup %4116  ;;  %v1393_v1 = vsub.f32 1.0, %v4115_v27  ;;  %v1397_v3 = vmul.f32 %v4115_v27, %v8538_v49  ;;  %v8541_v49 = vld [vmem:[#allocation23_spill] sm:$0xff]  ;;  %v6085_v27 = vld [vmem:[#allocation7 + $0x150] sm:$0xff] }
 0x5d3   : > { %v1390_v52 = vadd.f32 %v1388_v55, %v1359_v56  ;;  %v1394_v61 = vsub.f32 1.0, %v4117_v34  ;;  %v1398_v17 = vmul.f32 %v4117_v34, %v5773_v18  ;;  %v8540_v18 = vld [vmem:[#allocation22_spill] sm:$0xff]  ;;  %v6082_v56 = vld [vmem:[#allocation7 + $0x158] sm:$0xff] }
 0x5d4   : > { %v8544_v55 = vld [vmem:[#allocation26_spill] sm:$0xff]  ;;  %v6088_v34 = vld [vmem:[#allocation7 + $0x138] sm:$0xff] }
 0x5d5   : > { %4120 = vtanh.f32 %v1390_v52  ;;  %v8543_v52 = vld [vmem:[#allocation25_spill] sm:$0xff] }
 0x5de   : > { %v4119_v62 = vpop.eup %4118 }
 0x5df   : > { %v1395_v51 = vmul.f32 %v4119_v62, %v1393_v1  ;;  %v8539_v1 = vld [vmem:[#allocation30_spill] sm:$0xff]  ;;  %v6091_v62 = vld [vmem:[#allocation7 + $0x130] sm:$0xff] }
 0x5e1   : > { %v6051_v28 = vadd.f32 %v1397_v3, %v1395_v51  ;;  %v8542_v51 = vld [vmem:[#allocation24_spill] sm:$0xff]  ;;  %v6094_v3 = vld [vmem:[#allocation7 + $0x118] sm:$0xff] }
 0x5e2   : > { %v4121_v58 = vpop.eup %4120 }
 0x5e3   : > { %1540 = vmatprep.mubr.f32.mxu0 %v6051_v28  ;;  %v1396_v60 = vmul.f32 %v4121_v58, %v1394_v61  ;;  %v6097_v61 = vld [vmem:[#allocation7 + $0x110] sm:$0xff]  ;;  %v6100_v58 = vld [vmem:[#allocation7 + $0xf8] sm:$0xff] }
 0x5e5   : > { %v6055_v19 = vadd.f32 %v1398_v17, %v1396_v60  ;;  %v6103_v60 = vld [vmem:[#allocation7 + $0xf0] sm:$0xff]  ;;  %v6106_v17 = vld [vmem:[#allocation7 + $0xd8] sm:$0xff] }
 0x5e6   : > { %8546 = vst [vmem:[#allocation56_spill] sm:$0xff] %v6106_v17 }
 0x5e7   : > { %3878 = vmatprep.subr.mxu1 %v6055_v19 }
 0x5e8   : > { %3879 = vmatpush3.msra.mxu1 %v6055_v19 }
 0x5e9   : > { %3880 = vmatprep.subr.mxu1 %v6051_v28 }
 0x5ea   : > { %3881 = vmatpush3.msra.mxu1 %v6051_v28 }
 0x5eb   : > { %3883 = vmatmul.mubr.msk.f32.vlgmr.msra.gmra.mxu1 %vm399_vm0, %v8539_v1  ;;  %1553 = vmatprep.subr.mxu1 %v6063_v10 }
 0x5ec   : > { %1617 = vmatprep.mubr.f32.mxu1 %v6051_v28  ;;  %1554 = vmatpush1.msra.mxu1 %v8540_v18  ;;  %v6109_v18 = vld [vmem:[#allocation7 + $0xd0] sm:$0xff] }
 0x5ed   : > { %1555 = vmatprep.subr.mxu1 %v8541_v49  ;;  %8547 = vst [vmem:[#allocation57_spill] sm:$0xff] %v6109_v18  ;;  %v6112_v49 = vld [vmem:[#allocation7 + $0xb8] sm:$0xff] }
 0x5ee   : > { %1556 = vmatpush1.msra.mxu1 %v8542_v51  ;;  %8548 = vst [vmem:[#allocation58_spill] sm:$0xff] %v6112_v49  ;;  %v6115_v51 = vld [vmem:[#allocation7 + $0xb0] sm:$0xff] }
 0x5ef   : > { %1557 = vmatprep.subr.mxu1 %v8543_v52  ;;  %8549 = vst [vmem:[#allocation59_spill] sm:$0xff] %v6115_v51  ;;  %v6118_v52 = vld [vmem:[#allocation7 + $0x98] sm:$0xff] }
 0x5f0   : > { %1558 = vmatpush1.msra.mxu1 %v8544_v55  ;;  %8550 = vst [vmem:[#allocation60_spill] sm:$0xff] %v6118_v52  ;;  %v6121_v55 = vld [vmem:[#allocation7 + $0x90] sm:$0xff] }
 0x5f1   : > { %1559 = vmatprep.subr.mxu1 %v8545_v59  ;;  %8551 = vst [vmem:[#allocation61_spill] sm:$0xff] %v6121_v55  ;;  %v6124_v59 = vld [vmem:[#allocation7 + $0x78] sm:$0xff] }
 0x5f2   : > { %1560 = vmatpush1.msra.mxu1 %v6073_v7  ;;  %8552 = vst [vmem:[#allocation62_spill] sm:$0xff] %v6124_v59 }
 0x5f3   : > { %1561 = vmatprep.subr.mxu1 %v6076_v0 }
 0x5f4   : > { %1562 = vmatpush1.msra.mxu1 %v6079_v12 }
 0x5f5   : > { %1563 = vmatprep.subr.mxu1 %v6082_v56 }
 0x5f6   : > { %1564 = vmatpush1.msra.mxu1 %v6085_v27 }
 0x5f7   : > { %1565 = vmatprep.subr.mxu1 %v6088_v34 }
 0x5f8   : > { %1566 = vmatpush1.msra.mxu1 %v6091_v62 }
 0x5f9   : > { %1567 = vmatprep.subr.mxu1 %v6094_v3 }
 0x5fa   : > { %1568 = vmatpush1.msra.mxu1 %v6097_v61 }
 0x5fb   : > { %1569 = vmatprep.subr.mxu1 %v6100_v58 }
 0x5fc   : > { %1570 = vmatpush1.msra.mxu1 %v6103_v60 }
 0x5fd   : > { %1571 = vmatprep.subr.mxu1 %v6106_v17 }
 0x5fe   : > { %1572 = vmatpush1.msra.mxu1 %v6109_v18  ;;  %v6127_v18 = vld [vmem:[#allocation7 + $0x70] sm:$0xff] }
 0x5ff   : > { %1573 = vmatprep.subr.mxu1 %v6112_v49  ;;  %8553 = vst [vmem:[#allocation63_spill] sm:$0xff] %v6127_v18  ;;  %v6130_v49 = vld [vmem:[#allocation7 + $0x58] sm:$0xff] }
 0x600   : > { %1574 = vmatpush1.msra.mxu1 %v6115_v51  ;;  %8554 = vst [vmem:[#allocation64_spill] sm:$0xff] %v6130_v49  ;;  %v6133_v51 = vld [vmem:[#allocation7 + $0x50] sm:$0xff] }
 0x601   : > { %1575 = vmatprep.subr.mxu1 %v6118_v52  ;;  %8555 = vst [vmem:[#allocation65_spill] sm:$0xff] %v6133_v51  ;;  %v6136_v52 = vld [vmem:[#allocation7 + $0x38] sm:$0xff] }
 0x602   : > { %1576 = vmatpush1.msra.mxu1 %v6121_v55  ;;  %8556 = vst [vmem:[#allocation66_spill] sm:$0xff] %v6136_v52  ;;  %v6139_v55 = vld [vmem:[#allocation7 + $0x30] sm:$0xff] }
 0x603   : > { %1577 = vmatprep.subr.mxu1 %v6124_v59  ;;  %8557 = vst [vmem:[#allocation67_spill] sm:$0xff] %v6139_v55  ;;  %v6142_v59 = vld [vmem:[#allocation7 + $0x18] sm:$0xff] }
 0x604   : > { %1578 = vmatpush1.msra.mxu1 %v6127_v18  ;;  %8558 = vst [vmem:[#allocation68_spill] sm:$0xff] %v6142_v59  ;;  %v6145_v18 = vld [vmem:[#allocation7 + $0x10] sm:$0xff] }
 0x605   : > { %1579 = vmatprep.subr.mxu1 %v6130_v49  ;;  %8559 = vst [vmem:[#allocation69_spill] sm:$0xff] %v6145_v18  ;;  %v6148_v49 = vld [vmem:[#allocation7 + $0x3f8] sm:$0xff] }
 0x606   : > { %1580 = vmatpush1.msra.mxu1 %v6133_v51  ;;  %8560 = vst [vmem:[#allocation70_spill] sm:$0xff] %v6148_v49  ;;  %v6151_v51 = vld [vmem:[#allocation7 + $0x3f0] sm:$0xff] }
 0x607   : > { %1581 = vmatprep.subr.mxu1 %v6136_v52  ;;  %8561 = vst [vmem:[#allocation72_spill] sm:$0xff] %v6151_v51  ;;  %v6154_v52 = vld [vmem:[#allocation7 + $0x3d8] sm:$0xff] }
 0x608   : > { %1582 = vmatpush1.msra.mxu1 %v6139_v55  ;;  %8562 = vst [vmem:[#allocation74_spill] sm:$0xff] %v6154_v52  ;;  %v6157_v55 = vld [vmem:[#allocation7 + $0x3d0] sm:$0xff] }
 0x609   : > { %1583 = vmatprep.subr.mxu1 %v6142_v59  ;;  %8563 = vst [vmem:[#allocation76_spill] sm:$0xff] %v6157_v55  ;;  %v6160_v59 = vld [vmem:[#allocation7 + $0x3b8] sm:$0xff] }
 0x60a   : > { %1584 = vmatpush1.msra.mxu1 %v6145_v18  ;;  %8564 = vst [vmem:[#allocation78_spill] sm:$0xff] %v6160_v59  ;;  %v6163_v18 = vld [vmem:[#allocation7 + $0x3b0] sm:$0xff] }
 0x60b   : > { %1585 = vmatprep.subr.mxu1 %v6148_v49  ;;  %8565 = vst [vmem:[#allocation80_spill] sm:$0xff] %v6163_v18  ;;  %v6166_v49 = vld [vmem:[#allocation7 + $0x398] sm:$0xff] }
 0x60c   : > { %1586 = vmatpush2.msra.mxu1 %v6151_v51  ;;  %8566 = vst [vmem:[#allocation82_spill] sm:$0xff] %v6166_v49  ;;  %v6169_v51 = vld [vmem:[#allocation7 + $0x390] sm:$0xff] }
 0x60d   : > { %1587 = vmatprep.subr.mxu1 %v6154_v52  ;;  %8567 = vst [vmem:[#allocation84_spill] sm:$0xff] %v6169_v51  ;;  %v6172_v52 = vld [vmem:[#allocation7 + $0x378] sm:$0xff] }
 0x60e   : > { %1588 = vmatpush2.msra.mxu1 %v6157_v55  ;;  %8568 = vst [vmem:[#allocation86_spill] sm:$0xff] %v6172_v52  ;;  %v6175_v55 = vld [vmem:[#allocation7 + $0x370] sm:$0xff] }
 0x60f   : > { %1589 = vmatprep.subr.mxu1 %v6160_v59  ;;  %8569 = vst [vmem:[#allocation88_spill] sm:$0xff] %v6175_v55  ;;  %v6178_v59 = vld [vmem:[#allocation7 + $0x358] sm:$0xff] }
 0x610   : > { %1590 = vmatpush2.msra.mxu1 %v6163_v18  ;;  %8570 = vst [vmem:[#allocation90_spill] sm:$0xff] %v6178_v59  ;;  %v6181_v18 = vld [vmem:[#allocation7 + $0x350] sm:$0xff] }
 0x611   : > { %1591 = vmatprep.subr.mxu1 %v6166_v49  ;;  %8571 = vst [vmem:[#allocation92_spill] sm:$0xff] %v6181_v18  ;;  %v6184_v49 = vld [vmem:[#allocation7 + $0x338] sm:$0xff] }
 0x612   : > { %1592 = vmatpush2.msra.mxu1 %v6169_v51  ;;  %8572 = vst [vmem:[#allocation96_spill] sm:$0xff] %v6184_v49  ;;  %v6187_v51 = vld [vmem:[#allocation7 + $0x330] sm:$0xff] }
 0x613   : > { %1593 = vmatprep.subr.mxu1 %v6172_v52  ;;  %8573 = vst [vmem:[#allocation98_spill] sm:$0xff] %v6187_v51  ;;  %v6190_v52 = vld [vmem:[#allocation7 + $0x318] sm:$0xff] }
 0x614   : > { %1594 = vmatpush2.msra.mxu1 %v6175_v55  ;;  %8574 = vst [vmem:[#allocation20_spill] sm:$0xff] %v6190_v52  ;;  %v6193_v55 = vld [vmem:[#allocation7 + $0x310] sm:$0xff] }
 0x615   : > { %1595 = vmatprep.subr.mxu1 %v6178_v59  ;;  %8575 = vst [vmem:[#allocation116_spill] sm:$0xff] %v6193_v55  ;;  %v6196_v59 = vld [vmem:[#allocation7 + $0x2f8] sm:$0xff] }
 0x616   : > { %1596 = vmatpush2.msra.mxu1 %v6181_v18  ;;  %8576 = vst [vmem:[#allocation71_spill] sm:$0xff] %v6196_v59  ;;  %v6199_v18 = vld [vmem:[#allocation7 + $0x2f0] sm:$0xff] }
 0x617   : > { %1597 = vmatprep.subr.mxu1 %v6184_v49  ;;  %8577 = vst [vmem:[#allocation73_spill] sm:$0xff] %v6199_v18  ;;  %v6202_v49 = vld [vmem:[#allocation7 + $0x2d8] sm:$0xff] }
 0x618   : > { %1598 = vmatpush2.msra.mxu1 %v6187_v51  ;;  %8578 = vst [vmem:[#allocation75_spill] sm:$0xff] %v6202_v49  ;;  %v6205_v51 = vld [vmem:[#allocation7 + $0x2d0] sm:$0xff] }
 0x619   : > { %1599 = vmatprep.subr.mxu1 %v6190_v52  ;;  %8579 = vst [vmem:[#allocation77_spill] sm:$0xff] %v6205_v51  ;;  %v6208_v52 = vld [vmem:[#allocation7 + $0x2b8] sm:$0xff] }
 0x61a   : > { %1600 = vmatpush2.msra.mxu1 %v6193_v55  ;;  %8580 = vst [vmem:[#allocation79_spill] sm:$0xff] %v6208_v52  ;;  %v6211_v55 = vld [vmem:[#allocation7 + $0x2b0] sm:$0xff] }
 0x61b   : > { %1601 = vmatprep.subr.mxu1 %v6196_v59  ;;  %8581 = vst [vmem:[#allocation81_spill] sm:$0xff] %v6211_v55  ;;  %v6214_v59 = vld [vmem:[#allocation7 + $0x298] sm:$0xff] }
 0x61c   : > { %1602 = vmatpush2.msra.mxu1 %v6199_v18  ;;  %8582 = vst [vmem:[#allocation83_spill] sm:$0xff] %v6214_v59  ;;  %v6217_v18 = vld [vmem:[#allocation7 + $0x290] sm:$0xff] }
 0x61d   : > { %1603 = vmatprep.subr.mxu1 %v6202_v49  ;;  %8583 = vst [vmem:[#allocation85_spill] sm:$0xff] %v6217_v18  ;;  %v6220_v49 = vld [vmem:[#allocation7 + $0x278] sm:$0xff] }
 0x61e   : > { %1604 = vmatpush2.msra.mxu1 %v6205_v51  ;;  %8584 = vst [vmem:[#allocation87_spill] sm:$0xff] %v6220_v49  ;;  %v6223_v51 = vld [vmem:[#allocation7 + $0x270] sm:$0xff] }
 0x61f   : > { %1605 = vmatprep.subr.mxu1 %v6208_v52  ;;  %8585 = vst [vmem:[#allocation89_spill] sm:$0xff] %v6223_v51  ;;  %v6226_v52 = vld [vmem:[#allocation7 + $0x258] sm:$0xff] }
 0x620   : > { %1606 = vmatpush2.msra.mxu1 %v6211_v55  ;;  %8586 = vst [vmem:[#allocation91_spill] sm:$0xff] %v6226_v52  ;;  %v6229_v55 = vld [vmem:[#allocation7 + $0x250] sm:$0xff] }
 0x621   : > { %1607 = vmatprep.subr.mxu1 %v6214_v59  ;;  %8587 = vst [vmem:[#allocation93_spill] sm:$0xff] %v6229_v55  ;;  %v6232_v59 = vld [vmem:[#allocation7 + $0x238] sm:$0xff] }
 0x622   : > { %1608 = vmatpush2.msra.mxu1 %v6217_v18  ;;  %v6235_v18 = vld [vmem:[#allocation7 + $0x230] sm:$0xff] }
 0x623   : > { %1609 = vmatprep.subr.mxu1 %v6220_v49  ;;  %v6238_v49 = vld [vmem:[#allocation7 + $0x218] sm:$0xff] }
 0x624   : > { %1610 = vmatpush2.msra.mxu1 %v6223_v51  ;;  %v6241_v51 = vld [vmem:[#allocation7 + $0x210] sm:$0xff] }
 0x625   : > { %1611 = vmatprep.subr.mxu1 %v6226_v52  ;;  %v8588_v52 = vld [vmem:[#allocation28_spill] sm:$0xff] }
 0x626   : > { %1612 = vmatpush2.msra.mxu1 %v6229_v55 }
 0x627   : > { %1613 = vmatprep.subr.mxu1 %v6232_v59 }
 0x628   : > { %1614 = vmatpush2.msra.mxu1 %v6235_v18 }
 0x629   : > { %1615 = vmatprep.subr.mxu1 %v6238_v49 }
 0x62a   : > { %1616 = vmatpush2.msra.mxu1 %v6241_v51 }
 0x62b   : > { %1743 = vmatprep.subr.mxu1 %v8588_v52 }
 0x6ab   : > { %v3884_v17 = vpop.f32.mrf.mxu1 }
 0x6ad   : > { %v1467_v55 = vpop.f32.mrf.mxu1 }
 0x6ae   : > { %1541 = vmatmul.mubr.f32.vlgmr.msra.gmra.mxu0 %v1467_v55  ;;  %1618 = vmatmul.mubr.f32.vlgmr.msra.gmra.mxu1 %v1467_v55 }
 0x6af   : > { %1546 = vmatprep.mubr.f32.mxu0 %v6055_v19  ;;  %1623 = vmatprep.mubr.f32.mxu1 %v6055_v19 }
 0x6b0   : > { %1744 = vmatpush1.msra.mxu1 %v5786_v21  ;;  %v8590_v21 = vld [vmem:[#allocation32_spill] sm:$0xff] }
 0x6b1   : > { %1745 = vmatprep.subr.mxu1 %v5789_v8  ;;  %v8591_v8 = vld [vmem:[#allocation33_spill] sm:$0xff] }
 0x6b2   : > { %1547 = vmatmul.mubr.f32.gmra.mxu0 %v3884_v17  ;;  %1624 = vmatmul.mubr.f32.gmra.mxu1 %v3884_v17 }
 0x6b3   : > { %3889 = vmatprep.mubr.msk.f32.mxu0 %vm399_vm0, %v5684_v63  ;;  %1746 = vmatpush1.msra.mxu1 %v5792_v9  ;;  %v8589_v63 = vld [vmem:[#allocation31_spill] sm:$0xff]  ;;  %v8592_v9 = vld [vmem:[#allocation34_spill] sm:$0xff] }
 0x6b4   : > { %1747 = vmatprep.subr.mxu1 %v5795_v11  ;;  %v8593_v11 = vld [vmem:[#allocation35_spill] sm:$0xff] }
 0x6b5   : > { %1748 = vmatpush1.msra.mxu1 %v5798_v13  ;;  %v8594_v13 = vld [vmem:[#allocation36_spill] sm:$0xff] }
 0x6b6   : > { %1749 = vmatprep.subr.mxu1 %v5801_v15  ;;  %v8595_v15 = vld [vmem:[#allocation37_spill] sm:$0xff] }
 0x6b7   : > { %1750 = vmatpush1.msra.mxu1 %v5804_v25  ;;  %v8596_v25 = vld [vmem:[#allocation38_spill] sm:$0xff] }
 0x6b8   : > { %1751 = vmatprep.subr.mxu1 %v5807_v2  ;;  %v8597_v2 = vld [vmem:[#allocation39_spill] sm:$0xff] }
 0x6b9   : > { %1752 = vmatpush1.msra.mxu1 %v5810_v5  ;;  %v8598_v5 = vld [vmem:[#allocation40_spill] sm:$0xff] }
 0x6ba   : > { %1753 = vmatprep.subr.mxu1 %v5813_v6  ;;  %v8599_v6 = vld [vmem:[#allocation41_spill] sm:$0xff] }
 0x6bb   : > { %1754 = vmatpush1.msra.mxu1 %v5816_v23  ;;  %v8600_v23 = vld [vmem:[#allocation42_spill] sm:$0xff] }
 0x6bc   : > { %1755 = vmatprep.subr.mxu1 %v5819_v14  ;;  %v8601_v14 = vld [vmem:[#allocation43_spill] sm:$0xff] }
 0x6bd   : > { %1756 = vmatpush1.msra.mxu1 %v5822_v16  ;;  %v8602_v16 = vld [vmem:[#allocation44_spill] sm:$0xff] }
 0x6be   : > { %1757 = vmatprep.subr.mxu1 %v5825_v20  ;;  %v8603_v20 = vld [vmem:[#allocation45_spill] sm:$0xff] }
 0x6bf   : > { %1758 = vmatpush1.msra.mxu1 %v5828_v24  ;;  %v8604_v24 = vld [vmem:[#allocation46_spill] sm:$0xff] }
 0x6c0   : > { %1759 = vmatprep.subr.mxu1 %v5831_v29  ;;  %v8605_v29 = vld [vmem:[#allocation47_spill] sm:$0xff] }
 0x6c1   : > { %1760 = vmatpush1.msra.mxu1 %v5834_v38  ;;  %v8606_v38 = vld [vmem:[#allocation48_spill] sm:$0xff] }
 0x6c2   : > { %1761 = vmatprep.subr.mxu1 %v5837_v41  ;;  %v8607_v41 = vld [vmem:[#allocation49_spill] sm:$0xff] }
 0x6c3   : > { %1762 = vmatpush1.msra.mxu1 %v5840_v42  ;;  %v8608_v42 = vld [vmem:[#allocation50_spill] sm:$0xff] }
 0x6c4   : > { %1763 = vmatprep.subr.mxu1 %v5843_v44  ;;  %v8609_v44 = vld [vmem:[#allocation51_spill] sm:$0xff] }
 0x6c5   : > { %1764 = vmatpush1.msra.mxu1 %v5846_v45  ;;  %v8610_v45 = vld [vmem:[#allocation52_spill] sm:$0xff] }
 0x6c6   : > { %1765 = vmatprep.subr.mxu1 %v5849_v46  ;;  %v8611_v46 = vld [vmem:[#allocation53_spill] sm:$0xff] }
 0x6c7   : > { %1766 = vmatpush1.msra.mxu1 %v5852_v47  ;;  %v8612_v47 = vld [vmem:[#allocation54_spill] sm:$0xff] }
 0x6c8   : > { %1767 = vmatprep.subr.mxu1 %v5855_v50  ;;  %v8613_v50 = vld [vmem:[#allocation55_spill] sm:$0xff] }
 0x6c9   : > { %1768 = vmatpush1.msra.mxu1 %v5858_v31 }
 0x6ca   : > { %1769 = vmatprep.subr.mxu1 %v5861_v53  ;;  %v8614_v53 = vld [vmem:[#allocation108_spill] sm:$0xff] }
 0x6cb   : > { %1770 = vmatpush1.msra.mxu1 %v5864_v26 }
 0x6cc   : > { %1771 = vmatprep.subr.mxu1 %v5867_v4 }
 0x6cd   : > { %1772 = vmatpush1.msra.mxu1 %v5870_v30 }
 0x6ce   : > { %1773 = vmatprep.subr.mxu1 %v5873_v22 }
 0x6cf   : > { %1774 = vmatpush1.msra.mxu1 %v5876_v32  ;;  %v8615_v32 = vld [vmem:[#allocation110_spill] sm:$0xff] }
 0x6d0   : > { %1775 = vmatprep.subr.mxu1 %v5879_v33 }
 0x6d1   : > { %1776 = vmatpush2.msra.mxu1 %v5882_v35  ;;  %v8616_v35 = vld [vmem:[#allocation109_spill] sm:$0xff] }
 0x6d2   : > { %1777 = vmatprep.subr.mxu1 %v5885_v36 }
 0x6d3   : > { %1778 = vmatpush2.msra.mxu1 %v5888_v37 }
 0x6d4   : > { %1779 = vmatprep.subr.mxu1 %v5891_v40 }
 0x6d5   : > { %1780 = vmatpush2.msra.mxu1 %v5894_v39  ;;  %v8617_v39 = vld [vmem:[#allocation111_spill] sm:$0xff] }
 0x6d6   : > { %1781 = vmatprep.subr.mxu1 %v5897_v43 }
 0x6d7   : > { %1782 = vmatpush2.msra.mxu1 %v8589_v63 }
 0x6d8   : > { %1783 = vmatprep.subr.mxu1 %v8590_v21 }
 0x6d9   : > { %1784 = vmatpush2.msra.mxu1 %v8591_v8 }
 0x6da   : > { %1785 = vmatprep.subr.mxu1 %v8592_v9 }
 0x6db   : > { %1786 = vmatpush2.msra.mxu1 %v8593_v11 }
 0x6dc   : > { %1787 = vmatprep.subr.mxu1 %v8594_v13 }
 0x6dd   : > { %1788 = vmatpush2.msra.mxu1 %v8595_v15 }
 0x6de   : > { %1789 = vmatprep.subr.mxu1 %v8596_v25 }
 0x6df   : > { %1790 = vmatpush2.msra.mxu1 %v8597_v2 }
 0x6e0   : > { %1791 = vmatprep.subr.mxu1 %v8598_v5  ;;  %v8618_v5 = vld [vmem:[#allocation112_spill] sm:$0xff] }
 0x6e1   : > { %1792 = vmatpush2.msra.mxu1 %v8599_v6 }
 0x6e2   : > { %1793 = vmatprep.subr.mxu1 %v8600_v23 }
 0x6e3   : > { %1794 = vmatpush2.msra.mxu1 %v8601_v14 }
 0x6e4   : > { %1795 = vmatprep.subr.mxu1 %v8602_v16 }
 0x6e5   : > { %1796 = vmatpush2.msra.mxu1 %v8603_v20 }
 0x6e6   : > { %1797 = vmatprep.subr.mxu1 %v8604_v24 }
 0x6e7   : > { %1798 = vmatpush2.msra.mxu1 %v8605_v29 }
 0x6e8   : > { %1799 = vmatprep.subr.mxu1 %v8606_v38 }
 0x6e9   : > { %1800 = vmatpush2.msra.mxu1 %v8607_v41 }
 0x6ea   : > { %1801 = vmatprep.subr.mxu1 %v8608_v42 }
 0x6eb   : > { %1802 = vmatpush2.msra.mxu1 %v8609_v44 }
 0x6ec   : > { %1803 = vmatprep.subr.mxu1 %v8610_v45 }
 0x6ed   : > { %1804 = vmatpush2.msra.mxu1 %v8611_v46 }
 0x6ee   : > { %1805 = vmatprep.subr.mxu1 %v8612_v47 }
 0x6ef   : > { %1806 = vmatpush2.msra.mxu1 %v8613_v50 }
 0x76e   : > { %v1542_v31 = vpop.f32.mrf.mxu0  ;;  %v1619_v8 = vpop.f32.mrf.mxu1 }
 0x76f   : > { %v1543_v26 = vadd.f32 %v1542_v31, %v8614_v53  ;;  %v1620_v20 = vadd.f32 %v1619_v8, %v8535_v57  ;;  %v8634_v8 = vld [vmem:[#allocation72_spill] sm:$0xff] }
 0x770   : > { %v1544_v4 = vpop.f32.mrf.mxu0  ;;  %v1621_v11 = vpop.f32.mrf.mxu1 }
 0x771   : > { %v3750_v30 = vmul.f32 -1.442695, %v1543_v26  ;;  %v1545_v36 = vadd.f32 %v1544_v4, %v8616_v35  ;;  %v1622_v6 = vadd.f32 %v1621_v11, %v8618_v5  ;;  %v8636_v11 = vld [vmem:[#allocation76_spill] sm:$0xff] }
 0x772   : > { %v1548_v22 = vpop.f32.mrf.mxu0  ;;  %v1625_v15 = vpop.f32.mrf.mxu1 }
 0x773   : > { %4122 = vpow2.f32 %v3750_v30  ;;  %v1549_v33 = vadd.f32 %v1548_v22, %v8615_v32  ;;  %v3752_v17 = vmul.f32 -1.442695, %v1545_v36  ;;  %v1626_v42 = vadd.f32 %v1625_v15, %v8537_v54  ;;  %v8638_v15 = vld [vmem:[#allocation80_spill] sm:$0xff] }
 0x774   : > { %v1550_v40 = vpop.f32.mrf.mxu0  ;;  %v1627_v16 = vpop.f32.mrf.mxu1 }
 0x775   : > { %v3751_v37 = vmul.f32 -1.442695, %v1549_v33  ;;  %v1551_v43 = vadd.f32 %v1550_v40, %v8617_v39  ;;  %v1628_v38 = vadd.f32 %v1627_v16, %v8536_v48  ;;  %v8644_v16 = vld [vmem:[#allocation92_spill] sm:$0xff] }
 0x777   : > { %4124 = vpow2.f32 %v3751_v37  ;;  %v3753_v52 = vmul.f32 -1.442695, %v1551_v43  ;;  %v4394_v43 = vld [vmem:[#allocation7 + $0x1d0] sm:$0xff] }
 0x778   : > { %4126 = vpow2.f32 %v3752_v17  ;;  %v4395_v17 = vld [vmem:[#allocation7 + $0x1b8] sm:$0xff] }
 0x779   : > { %4128 = vpow2.f32 %v3753_v52  ;;  %v4396_v52 = vld [vmem:[#allocation7 + $0x1b0] sm:$0xff] }
 0x780   : > { %v4123_v55 = vpop.eup %4122 }
 0x781   : > { %v1636_v63 = vadd.f32 1.0, %v4123_v55  ;;  %v4397_v55 = vld [vmem:[#allocation7 + $0x198] sm:$0xff] }
 0x783   : > { %4130 = vrcp.f32 %v1636_v63  ;;  %v8632_v63 = vld [vmem:[#allocation69_spill] sm:$0xff] }
 0x784   : > { %v4125_v21 = vpop.eup %4124 }
 0x785   : > { %v1637_v9 = vadd.f32 1.0, %v4125_v21  ;;  %v4127_v13 = vpop.eup %4126  ;;  %v8633_v21 = vld [vmem:[#allocation70_spill] sm:$0xff] }
 0x786   : > { %v4129_v25 = vpop.eup %4128  ;;  %v1648_v2 = vadd.f32 1.0, %v4127_v13  ;;  %v8637_v13 = vld [vmem:[#allocation78_spill] sm:$0xff] }
 0x787   : > { %4132 = vrcp.f32 %v1637_v9  ;;  %v1649_v14 = vadd.f32 1.0, %v4129_v25  ;;  %v8635_v9 = vld [vmem:[#allocation74_spill] sm:$0xff] }
 0x788   : > { %4134 = vrcp.f32 %v1648_v2  ;;  %v8639_v25 = vld [vmem:[#allocation82_spill] sm:$0xff]  ;;  %v8640_v2 = vld [vmem:[#allocation84_spill] sm:$0xff] }
 0x789   : > { %4136 = vrcp.f32 %v1649_v14  ;;  %v8643_v14 = vld [vmem:[#allocation90_spill] sm:$0xff] }
 0x790   : > { %v4131_v23 = vpop.eup %4130 }
 0x791   : > { %v1654_v24 = vmul.f32 %v4131_v23, %v1622_v6  ;;  %v8641_v6 = vld [vmem:[#allocation86_spill] sm:$0xff]  ;;  %v8642_v23 = vld [vmem:[#allocation88_spill] sm:$0xff] }
 0x793   : > { %v1656_v29 = vadd.f32 %v1654_v24, %v1620_v20  ;;  %v8645_v20 = vld [vmem:[#allocation96_spill] sm:$0xff]  ;;  %v8646_v24 = vld [vmem:[#allocation98_spill] sm:$0xff] }
 0x794   : > { %v4133_v41 = vpop.eup %4132 }
 0x795   : > { %4138 = vtanh.f32 %v1656_v29  ;;  %v1655_v44 = vmul.f32 %v4133_v41, %v1628_v38  ;;  %v4135_v46 = vpop.eup %4134  ;;  %v8647_v29 = vld [vmem:[#allocation20_spill] sm:$0xff]  ;;  %v8649_v41 = vld [vmem:[#allocation71_spill] sm:$0xff] }
 0x796   : > { %v4137_v47 = vpop.eup %4136  ;;  %v1660_v50 = vsub.f32 1.0, %v4135_v46  ;;  %v1664_v4 = vmul.f32 %v4135_v46, %v6051_v28  ;;  %v4392_v28 = vld [vmem:[#allocation7 + $0x1f0] sm:$0xff]  ;;  %v8653_v46 = vld [vmem:[#allocation79_spill] sm:$0xff] }
 0x797   : > { %v1657_v45 = vadd.f32 %v1655_v44, %v1626_v42  ;;  %v1661_v22 = vsub.f32 1.0, %v4137_v47  ;;  %v1665_v37 = vmul.f32 %v4137_v47, %v6055_v19  ;;  %v4393_v19 = vld [vmem:[#allocation7 + $0x1d8] sm:$0xff]  ;;  %v8648_v38 = vld [vmem:[#allocation116_spill] sm:$0xff]  ;;  %v8651_v44 = vld [vmem:[#allocation75_spill] sm:$0xff] }
 0x798   : > { %v8650_v42 = vld [vmem:[#allocation73_spill] sm:$0xff] }
 0x799   : > { %4140 = vtanh.f32 %v1657_v45  ;;  %v8652_v45 = vld [vmem:[#allocation77_spill] sm:$0xff] }
 0x79a   : > { %v8654_v47 = vld [vmem:[#allocation81_spill] sm:$0xff] }
 0x7a2   : > { %v4139_v31 = vpop.eup %4138 }
 0x7a3   : > { %v1662_v26 = vmul.f32 %v4139_v31, %v1660_v50  ;;  %v8655_v50 = vld [vmem:[#allocation83_spill] sm:$0xff]  ;;  %v8656_v31 = vld [vmem:[#allocation85_spill] sm:$0xff] }
 0x7a5   : > { %v6321_v30 = vadd.f32 %v1664_v4, %v1662_v26  ;;  %v8657_v26 = vld [vmem:[#allocation87_spill] sm:$0xff]  ;;  %v8658_v4 = vld [vmem:[#allocation89_spill] sm:$0xff] }
 0x7a6   : > { %v4141_v33 = vpop.eup %4140 }
 0x7a7   : > { %1807 = vmatprep.mubr.f32.mxu1 %v6321_v30  ;;  %v1663_v36 = vmul.f32 %v4141_v33, %v1661_v22  ;;  %v8659_v22 = vld [vmem:[#allocation91_spill] sm:$0xff]  ;;  %v8660_v33 = vld [vmem:[#allocation93_spill] sm:$0xff] }
 0x7a9   : > { %v6325_v40 = vadd.f32 %v1665_v37, %v1663_v36 }
 0x7ab   : > { %3885 = vmatprep.subr.mxu0 %v6325_v40 }
 0x7ac   : > { %3886 = vmatpush3.msra.mxu0 %v6325_v40 }
 0x7ad   : > { %3887 = vmatprep.subr.mxu0 %v6321_v30 }
 0x7ae   : > { %3888 = vmatpush3.msra.mxu0 %v6321_v30 }
 0x7af   : > { %3890 = vmatmul.mubr.msk.f32.vlgmr.msra.gmra.mxu0 %vm399_vm0, %v8539_v1  ;;  %1820 = vmatprep.subr.mxu0 %v6063_v10  ;;  %v8619_v1 = vld [vmem:[#allocation56_spill] sm:$0xff]  ;;  %v8620_v10 = vld [vmem:[#allocation57_spill] sm:$0xff] }
 0x7b0   : > { %1884 = vmatprep.mubr.f32.mxu0 %v6321_v30  ;;  %1821 = vmatpush1.msra.mxu0 %v4392_v28  ;;  %v6395_v28 = vld [vmem:[%s5032_s17] sm:$0xff] }
 0x7b1   : > { %1822 = vmatprep.subr.mxu0 %v4393_v19  ;;  %v6409_v19 = vld [vmem:[#allocation7 + $0x5a8] sm:$0xff] }
 0x7b2   : > { %1823 = vmatpush1.msra.mxu0 %v4394_v43  ;;  %v6412_v43 = vld [vmem:[#allocation7 + $0x5a0] sm:$0xff] }
 0x7b3   : > { %1824 = vmatprep.subr.mxu0 %v4395_v17  ;;  %v6415_v17 = vld [vmem:[#allocation7 + $0x588] sm:$0xff] }
 0x7b4   : > { %1825 = vmatpush1.msra.mxu0 %v4396_v52  ;;  %v6418_v52 = vld [vmem:[#allocation7 + $0x580] sm:$0xff] }
 0x7b5   : > { %1826 = vmatprep.subr.mxu0 %v4397_v55  ;;  %v6421_v55 = vld [vmem:[#allocation7 + $0x568] sm:$0xff] }
 0x7b6   : > { %1827 = vmatpush1.msra.mxu0 %v6073_v7  ;;  %v8621_v7 = vld [vmem:[#allocation58_spill] sm:$0xff] }
 0x7b7   : > { %1828 = vmatprep.subr.mxu0 %v6076_v0  ;;  %v8622_v0 = vld [vmem:[#allocation59_spill] sm:$0xff] }
 0x7b8   : > { %1829 = vmatpush1.msra.mxu0 %v6079_v12  ;;  %v8623_v12 = vld [vmem:[#allocation60_spill] sm:$0xff] }
 0x7b9   : > { %1830 = vmatprep.subr.mxu0 %v6082_v56  ;;  %v8624_v56 = vld [vmem:[#allocation61_spill] sm:$0xff] }
 0x7ba   : > { %1831 = vmatpush1.msra.mxu0 %v6085_v27  ;;  %v8625_v27 = vld [vmem:[#allocation62_spill] sm:$0xff] }
 0x7bb   : > { %1832 = vmatprep.subr.mxu0 %v6088_v34  ;;  %v8626_v34 = vld [vmem:[#allocation63_spill] sm:$0xff] }
 0x7bc   : > { %1833 = vmatpush1.msra.mxu0 %v6091_v62  ;;  %v8627_v62 = vld [vmem:[#allocation64_spill] sm:$0xff] }
 0x7bd   : > { %1834 = vmatprep.subr.mxu0 %v6094_v3  ;;  %v8628_v3 = vld [vmem:[#allocation65_spill] sm:$0xff] }
 0x7be   : > { %1835 = vmatpush1.msra.mxu0 %v6097_v61  ;;  %v8629_v61 = vld [vmem:[#allocation66_spill] sm:$0xff] }
 0x7bf   : > { %1836 = vmatprep.subr.mxu0 %v6100_v58  ;;  %v8630_v58 = vld [vmem:[#allocation67_spill] sm:$0xff] }
 0x7c0   : > { %1837 = vmatpush1.msra.mxu0 %v6103_v60  ;;  %v8631_v60 = vld [vmem:[#allocation68_spill] sm:$0xff] }
 0x7c1   : > { %1838 = vmatprep.subr.mxu0 %v8619_v1  ;;  %v6424_v1 = vld [vmem:[#allocation7 + $0x560] sm:$0xff] }
 0x7c2   : > { %1839 = vmatpush1.msra.mxu0 %v8620_v10  ;;  %v6427_v10 = vld [vmem:[#allocation7 + $0x548] sm:$0xff] }
 0x7c3   : > { %1840 = vmatprep.subr.mxu0 %v8621_v7  ;;  %v6430_v7 = vld [vmem:[#allocation7 + $0x540] sm:$0xff] }
 0x7c4   : > { %1841 = vmatpush1.msra.mxu0 %v8622_v0  ;;  %v6433_v0 = vld [vmem:[#allocation7 + $0x528] sm:$0xff] }
 0x7c5   : > { %1842 = vmatprep.subr.mxu0 %v8623_v12  ;;  %v6436_v12 = vld [vmem:[#allocation7 + $0x520] sm:$0xff] }
 0x7c6   : > { %1843 = vmatpush1.msra.mxu0 %v8624_v56  ;;  %v6439_v56 = vld [vmem:[#allocation7 + $0x508] sm:$0xff] }
 0x7c7   : > { %1844 = vmatprep.subr.mxu0 %v8625_v27  ;;  %v6442_v27 = vld [vmem:[#allocation7 + $0x500] sm:$0xff] }
 0x7c8   : > { %1845 = vmatpush1.msra.mxu0 %v8626_v34  ;;  %v6445_v34 = vld [vmem:[#allocation7 + $0x4e8] sm:$0xff] }
 0x7c9   : > { %1846 = vmatprep.subr.mxu0 %v8627_v62  ;;  %v6448_v62 = vld [vmem:[#allocation7 + $0x4e0] sm:$0xff] }
 0x7ca   : > { %1847 = vmatpush1.msra.mxu0 %v8628_v3  ;;  %v6451_v3 = vld [vmem:[#allocation7 + $0x4c8] sm:$0xff] }
 0x7cb   : > { %1848 = vmatprep.subr.mxu0 %v8629_v61  ;;  %v6454_v61 = vld [vmem:[#allocation7 + $0x4c0] sm:$0xff] }
 0x7cc   : > { %1849 = vmatpush1.msra.mxu0 %v8630_v58  ;;  %v6457_v58 = vld [vmem:[#allocation7 + $0x4a8] sm:$0xff] }
 0x7cd   : > { %1850 = vmatprep.subr.mxu0 %v8631_v60  ;;  %v6460_v60 = vld [vmem:[#allocation7 + $0x4a0] sm:$0xff] }
 0x7ce   : > { %1851 = vmatpush1.msra.mxu0 %v8632_v63  ;;  %v6463_v63 = vld [vmem:[#allocation7 + $0x488] sm:$0xff] }
 0x7cf   : > { %1852 = vmatprep.subr.mxu0 %v8633_v21  ;;  %v6466_v21 = vld [vmem:[#allocation7 + $0x480] sm:$0xff] }
 0x7d0   : > { %1853 = vmatpush2.msra.mxu0 %v8634_v8  ;;  %v6469_v8 = vld [vmem:[#allocation7 + $0x468] sm:$0xff] }
 0x7d1   : > { %1854 = vmatprep.subr.mxu0 %v8635_v9  ;;  %v6472_v9 = vld [vmem:[#allocation7 + $0x460] sm:$0xff] }
 0x7d2   : > { %1855 = vmatpush2.msra.mxu0 %v8636_v11  ;;  %v6475_v11 = vld [vmem:[#allocation7 + $0x448] sm:$0xff] }
 0x7d3   : > { %1856 = vmatprep.subr.mxu0 %v8637_v13  ;;  %v6478_v13 = vld [vmem:[#allocation7 + $0x440] sm:$0xff] }
 0x7d4   : > { %1857 = vmatpush2.msra.mxu0 %v8638_v15  ;;  %v6481_v15 = vld [vmem:[#allocation7 + $0x428] sm:$0xff] }
 0x7d5   : > { %1858 = vmatprep.subr.mxu0 %v8639_v25  ;;  %v6484_v25 = vld [vmem:[#allocation7 + $0x420] sm:$0xff] }
 0x7d6   : > { %1859 = vmatpush2.msra.mxu0 %v8640_v2  ;;  %v6487_v2 = vld [vmem:[#allocation7 + $0x408] sm:$0xff] }
 0x7d7   : > { %1860 = vmatprep.subr.mxu0 %v8641_v6  ;;  %v6490_v6 = vld [vmem:[#allocation7 + $0x400] sm:$0xff] }
 0x7d8   : > { %1861 = vmatpush2.msra.mxu0 %v8642_v23  ;;  %v6493_v23 = vld [vmem:[#allocation7 + $0x7e8] sm:$0xff] }
 0x7d9   : > { %1862 = vmatprep.subr.mxu0 %v8643_v14  ;;  %v6496_v14 = vld [vmem:[#allocation7 + $0x7e0] sm:$0xff] }
 0x7da   : > { %1863 = vmatpush2.msra.mxu0 %v8644_v16  ;;  %v6499_v16 = vld [vmem:[#allocation7 + $0x7c8] sm:$0xff] }
 0x7db   : > { %1864 = vmatprep.subr.mxu0 %v8645_v20  ;;  %v6502_v20 = vld [vmem:[#allocation7 + $0x7c0] sm:$0xff] }
 0x7dc   : > { %1865 = vmatpush2.msra.mxu0 %v8646_v24  ;;  %v6505_v24 = vld [vmem:[#allocation7 + $0x7a8] sm:$0xff] }
 0x7dd   : > { %1866 = vmatprep.subr.mxu0 %v8647_v29  ;;  %v6508_v29 = vld [vmem:[#allocation7 + $0x7a0] sm:$0xff] }
 0x7de   : > { %1867 = vmatpush2.msra.mxu0 %v8648_v38  ;;  %v6511_v38 = vld [vmem:[#allocation7 + $0x788] sm:$0xff] }
 0x7df   : > { %1868 = vmatprep.subr.mxu0 %v8649_v41  ;;  %8661 = vst [vmem:[#allocation94_spill] sm:$0xff] %v6511_v38  ;;  %v6514_v41 = vld [vmem:[#allocation7 + $0x780] sm:$0xff] }
 0x7e0   : > { %1869 = vmatpush2.msra.mxu0 %v8650_v42  ;;  %8662 = vst [vmem:[#allocation95_spill] sm:$0xff] %v6514_v41  ;;  %v6517_v42 = vld [vmem:[#allocation7 + $0x768] sm:$0xff] }
 0x7e1   : > { %1870 = vmatprep.subr.mxu0 %v8651_v44  ;;  %8663 = vst [vmem:[#allocation97_spill] sm:$0xff] %v6517_v42  ;;  %v6520_v44 = vld [vmem:[#allocation7 + $0x760] sm:$0xff] }
 0x7e2   : > { %1871 = vmatpush2.msra.mxu0 %v8652_v45  ;;  %8664 = vst [vmem:[#allocation99_spill] sm:$0xff] %v6520_v44  ;;  %v6523_v45 = vld [vmem:[#allocation7 + $0x748] sm:$0xff] }
 0x7e3   : > { %1872 = vmatprep.subr.mxu0 %v8653_v46  ;;  %8665 = vst [vmem:[#allocation113_spill] sm:$0xff] %v6523_v45  ;;  %v6526_v46 = vld [vmem:[#allocation7 + $0x740] sm:$0xff] }
 0x7e4   : > { %1873 = vmatpush2.msra.mxu0 %v8654_v47  ;;  %8666 = vst [vmem:[#allocation114_spill] sm:$0xff] %v6526_v46  ;;  %v6529_v47 = vld [vmem:[#allocation7 + $0x728] sm:$0xff] }
 0x7e5   : > { %1874 = vmatprep.subr.mxu0 %v8655_v50  ;;  %8667 = vst [vmem:[#allocation115_spill] sm:$0xff] %v6529_v47  ;;  %v6532_v50 = vld [vmem:[#allocation7 + $0x720] sm:$0xff] }
 0x7e6   : > { %1875 = vmatpush2.msra.mxu0 %v8656_v31  ;;  %8668 = vst [vmem:[#allocation29_spill] sm:$0xff] %v6532_v50  ;;  %v6535_v31 = vld [vmem:[#allocation7 + $0x708] sm:$0xff] }
 0x7e7   : > { %1876 = vmatprep.subr.mxu0 %v8657_v26  ;;  %8669 = vst [vmem:[#allocation30_spill] sm:$0xff] %v6535_v31  ;;  %v6538_v26 = vld [vmem:[#allocation7 + $0x700] sm:$0xff] }
 0x7e8   : > { %1877 = vmatpush2.msra.mxu0 %v8658_v4  ;;  %8670 = vst [vmem:[#allocation22_spill] sm:$0xff] %v6538_v26  ;;  %v6541_v4 = vld [vmem:[#allocation7 + $0x6e8] sm:$0xff] }
 0x7e9   : > { %1878 = vmatprep.subr.mxu0 %v8659_v22  ;;  %8671 = vst [vmem:[#allocation23_spill] sm:$0xff] %v6541_v4  ;;  %v6544_v22 = vld [vmem:[#allocation7 + $0x6e0] sm:$0xff] }
 0x7ea   : > { %1879 = vmatpush2.msra.mxu0 %v8660_v33  ;;  %8672 = vst [vmem:[#allocation24_spill] sm:$0xff] %v6544_v22  ;;  %v6547_v33 = vld [vmem:[#allocation7 + $0x6c8] sm:$0xff] }
 0x7eb   : > { %1880 = vmatprep.subr.mxu0 %v6232_v59  ;;  %v6407_v59 = vld [vmem:[#allocation7 + $0x5c0] sm:$0xff]  ;;  %8673 = vst [vmem:[#allocation25_spill] sm:$0xff] %v6547_v33 }
 0x7ec   : > { %1881 = vmatpush2.msra.mxu0 %v6235_v18  ;;  %v6399_v18 = vld [vmem:[#allocation7 + $0x5e8] sm:$0xff] }
 0x7ed   : > { %1882 = vmatprep.subr.mxu0 %v6238_v49  ;;  %v6401_v49 = vld [vmem:[#allocation7 + $0x5e0] sm:$0xff] }
 0x7ee   : > { %1883 = vmatpush2.msra.mxu0 %v6241_v51  ;;  %v6404_v51 = vld [vmem:[#allocation7 + $0x5c8] sm:$0xff] }
 0x7ef   : > { %2201 = vmatprep.subr.mxu0 %v6399_v18 }
 0x86f   : > { %v3891_v36 = vpop.f32.mrf.mxu0 }
 0x871   : > { %v1734_v37 = vpop.f32.mrf.mxu0 }
 0x872   : > { %1808 = vmatmul.mubr.f32.vlgmr.msra.gmra.mxu1 %v1734_v37  ;;  %1885 = vmatmul.mubr.f32.vlgmr.msra.gmra.mxu0 %v1734_v37  ;;  %v6553_v37 = vld [vmem:[#allocation7 + $0x6a8] sm:$0xff] }
 0x873   : > { %1813 = vmatprep.mubr.f32.mxu1 %v6325_v40  ;;  %1890 = vmatprep.mubr.f32.mxu0 %v6325_v40  ;;  %8675 = vst [vmem:[#allocation27_spill] sm:$0xff] %v6553_v37 }
 0x874   : > { %2202 = vmatpush1.msra.mxu0 %v6401_v49 }
 0x875   : > { %2203 = vmatprep.subr.mxu0 %v6404_v51 }
 0x876   : > { %1814 = vmatmul.mubr.f32.gmra.mxu1 %v3891_v36  ;;  %1891 = vmatmul.mubr.f32.gmra.mxu0 %v3891_v36  ;;  %v6550_v36 = vld [vmem:[#allocation7 + $0x6c0] sm:$0xff] }
 0x877   : > { %3896 = vmatprep.mubr.msk.f32.mxu1 %vm399_vm0, %v6395_v28  ;;  %2204 = vmatpush1.msra.mxu0 %v6407_v59  ;;  %8674 = vst [vmem:[#allocation26_spill] sm:$0xff] %v6550_v36 }
 0x878   : > { %2205 = vmatprep.subr.mxu0 %v6409_v19 }
 0x879   : > { %2206 = vmatpush1.msra.mxu0 %v6412_v43 }
 0x87a   : > { %2207 = vmatprep.subr.mxu0 %v6415_v17 }
 0x87b   : > { %2208 = vmatpush1.msra.mxu0 %v6418_v52 }
 0x87c   : > { %2209 = vmatprep.subr.mxu0 %v6421_v55 }
 0x87d   : > { %2210 = vmatpush1.msra.mxu0 %v6424_v1 }
 0x87e   : > { %2211 = vmatprep.subr.mxu0 %v6427_v10 }
 0x87f   : > { %2212 = vmatpush1.msra.mxu0 %v6430_v7 }
 0x880   : > { %2213 = vmatprep.subr.mxu0 %v6433_v0 }
 0x881   : > { %2214 = vmatpush1.msra.mxu0 %v6436_v12 }
 0x882   : > { %2215 = vmatprep.subr.mxu0 %v6439_v56 }
 0x883   : > { %2216 = vmatpush1.msra.mxu0 %v6442_v27 }
 0x884   : > { %2217 = vmatprep.subr.mxu0 %v6445_v34 }
 0x885   : > { %2218 = vmatpush1.msra.mxu0 %v6448_v62 }
 0x886   : > { %2219 = vmatprep.subr.mxu0 %v6451_v3 }
 0x887   : > { %2220 = vmatpush1.msra.mxu0 %v6454_v61 }
 0x888   : > { %2221 = vmatprep.subr.mxu0 %v6457_v58 }
 0x889   : > { %2222 = vmatpush1.msra.mxu0 %v6460_v60 }
 0x88a   : > { %2223 = vmatprep.subr.mxu0 %v6463_v63 }
 0x88b   : > { %2224 = vmatpush1.msra.mxu0 %v6466_v21 }
 0x88c   : > { %2225 = vmatprep.subr.mxu0 %v6469_v8 }
 0x88d   : > { %2226 = vmatpush1.msra.mxu0 %v6472_v9 }
 0x88e   : > { %2227 = vmatprep.subr.mxu0 %v6475_v11 }
 0x88f   : > { %2228 = vmatpush1.msra.mxu0 %v6478_v13 }
 0x890   : > { %2229 = vmatprep.subr.mxu0 %v6481_v15 }
 0x891   : > { %2230 = vmatpush1.msra.mxu0 %v6484_v25 }
 0x892   : > { %2231 = vmatprep.subr.mxu0 %v6487_v2 }
 0x893   : > { %2232 = vmatpush1.msra.mxu0 %v6490_v6 }
 0x894   : > { %2233 = vmatprep.subr.mxu0 %v6493_v23 }
 0x895   : > { %2234 = vmatpush2.msra.mxu0 %v6496_v14 }
 0x896   : > { %2235 = vmatprep.subr.mxu0 %v6499_v16 }
 0x897   : > { %2236 = vmatpush2.msra.mxu0 %v6502_v20 }
 0x898   : > { %2237 = vmatprep.subr.mxu0 %v6505_v24 }
 0x899   : > { %2238 = vmatpush2.msra.mxu0 %v6508_v29 }
 0x89a   : > { %2239 = vmatprep.subr.mxu0 %v6511_v38 }
 0x89b   : > { %2240 = vmatpush2.msra.mxu0 %v6514_v41 }
 0x89c   : > { %2241 = vmatprep.subr.mxu0 %v6517_v42 }
 0x89d   : > { %2242 = vmatpush2.msra.mxu0 %v6520_v44 }
 0x89e   : > { %2243 = vmatprep.subr.mxu0 %v6523_v45 }
 0x89f   : > { %2244 = vmatpush2.msra.mxu0 %v6526_v46 }
 0x8a0   : > { %2245 = vmatprep.subr.mxu0 %v6529_v47 }
 0x8a1   : > { %2246 = vmatpush2.msra.mxu0 %v6532_v50  ;;  %v6556_v50 = vld [vmem:[#allocation7 + $0x6a0] sm:$0xff] }
 0x8a2   : > { %2247 = vmatprep.subr.mxu0 %v6535_v31  ;;  %8676 = vst [vmem:[#allocation28_spill] sm:$0xff] %v6556_v50  ;;  %v6559_v31 = vld [vmem:[#allocation7 + $0x688] sm:$0xff] }
 0x8a3   : > { %2248 = vmatpush2.msra.mxu0 %v6538_v26  ;;  %8677 = vst [vmem:[#allocation31_spill] sm:$0xff] %v6559_v31  ;;  %v6562_v26 = vld [vmem:[#allocation7 + $0x680] sm:$0xff] }
 0x8a4   : > { %2249 = vmatprep.subr.mxu0 %v6541_v4  ;;  %8678 = vst [vmem:[#allocation32_spill] sm:$0xff] %v6562_v26  ;;  %v6565_v4 = vld [vmem:[#allocation7 + $0x668] sm:$0xff] }
 0x8a5   : > { %2250 = vmatpush2.msra.mxu0 %v6544_v22  ;;  %8679 = vst [vmem:[#allocation33_spill] sm:$0xff] %v6565_v4  ;;  %v6568_v22 = vld [vmem:[#allocation7 + $0x660] sm:$0xff] }
 0x8a6   : > { %2251 = vmatprep.subr.mxu0 %v6547_v33  ;;  %8680 = vst [vmem:[#allocation34_spill] sm:$0xff] %v6568_v22  ;;  %v6571_v33 = vld [vmem:[#allocation7 + $0x648] sm:$0xff] }
 0x8a7   : > { %2252 = vmatpush2.msra.mxu0 %v6550_v36  ;;  %8681 = vst [vmem:[#allocation35_spill] sm:$0xff] %v6571_v33  ;;  %v6574_v36 = vld [vmem:[#allocation7 + $0x640] sm:$0xff] }
 0x8a8   : > { %2253 = vmatprep.subr.mxu0 %v6553_v37  ;;  %8682 = vst [vmem:[#allocation36_spill] sm:$0xff] %v6574_v36  ;;  %v6577_v37 = vld [vmem:[#allocation7 + $0x628] sm:$0xff] }
 0x8a9   : > { %2254 = vmatpush2.msra.mxu0 %v6556_v50  ;;  %8683 = vst [vmem:[#allocation37_spill] sm:$0xff] %v6577_v37 }
 0x8aa   : > { %2255 = vmatprep.subr.mxu0 %v6559_v31 }
 0x8ab   : > { %2256 = vmatpush2.msra.mxu0 %v6562_v26 }
 0x8ac   : > { %2257 = vmatprep.subr.mxu0 %v6565_v4 }
 0x8ad   : > { %2258 = vmatpush2.msra.mxu0 %v6568_v22 }
 0x8ae   : > { %2259 = vmatprep.subr.mxu0 %v6571_v33 }
 0x8af   : > { %2260 = vmatpush2.msra.mxu0 %v6574_v36 }
 0x8b0   : > { %2261 = vmatprep.subr.mxu0 %v6577_v37 }
 0x932   : > { %v1809_v31 = vpop.f32.mrf.mxu1 }
 0x933   : > { %v1810_v50 = vadd.f32 %v1809_v31, %v8614_v53 }
 0x934   : > { %v1811_v26 = vpop.f32.mrf.mxu1 }
 0x935   : > { %v3756_v47 = vmul.f32 -1.442695, %v1810_v50  ;;  %v1812_v45 = vadd.f32 %v1811_v26, %v8616_v35  ;;  %v1886_v50 = vpop.f32.mrf.mxu0 }
 0x936   : > { %v1815_v46 = vpop.f32.mrf.mxu1 }
 0x937   : > { %4142 = vpow2.f32 %v3756_v47  ;;  %v1816_v4 = vadd.f32 %v1815_v46, %v8615_v32  ;;  %v3758_v42 = vmul.f32 -1.442695, %v1812_v45  ;;  %v1888_v47 = vpop.f32.mrf.mxu0 }
 0x938   : > { %v1817_v44 = vpop.f32.mrf.mxu1 }
 0x939   : > { %v3757_v22 = vmul.f32 -1.442695, %v1816_v4  ;;  %v1818_v33 = vadd.f32 %v1817_v44, %v8617_v39  ;;  %v1892_v46 = vpop.f32.mrf.mxu0  ;;  %v1889_v4 = vadd.f32 %v1888_v47, %v8618_v5 }
 0x93b   : > { %4144 = vpow2.f32 %v3757_v22  ;;  %v3759_v36 = vmul.f32 -1.442695, %v1818_v33  ;;  %v1894_v44 = vpop.f32.mrf.mxu0 }
 0x93c   : > { %4146 = vpow2.f32 %v3758_v42  ;;  %v1887_v42 = vadd.f32 %v1886_v50, %v8535_v57 }
 0x93d   : > { %4148 = vpow2.f32 %v3759_v36 }
 0x944   : > { %v4143_v37 = vpop.eup %4142 }
 0x945   : > { %v1903_v41 = vadd.f32 1.0, %v4143_v37  ;;  %v1893_v37 = vadd.f32 %v1892_v46, %v8537_v54 }
 0x947   : > { %4150 = vrcp.f32 %v1903_v41  ;;  %v1895_v41 = vadd.f32 %v1894_v44, %v8536_v48  ;;  %v6617_v44 = vld [vmem:[#allocation7 + $0x5b8] sm:$0xff] }
 0x948   : > { %v4145_v53 = vpop.eup %4144 }
 0x949   : > { %v1904_v31 = vadd.f32 1.0, %v4145_v53  ;;  %v4147_v32 = vpop.eup %4146 }
 0x94a   : > { %v4149_v35 = vpop.eup %4148  ;;  %v1915_v26 = vadd.f32 1.0, %v4147_v32 }
 0x94b   : > { %4152 = vrcp.f32 %v1904_v31  ;;  %v1916_v39 = vadd.f32 1.0, %v4149_v35 }
 0x94c   : > { %4154 = vrcp.f32 %v1915_v26 }
 0x94d   : > { %4156 = vrcp.f32 %v1916_v39  ;;  %v6608_v39 = vld [vmem:[%s5032_s17 + $0x8] sm:$0xff] }
 0x954   : > { %v4151_v22 = vpop.eup %4150 }
 0x955   : > { %v1921_v45 = vmul.f32 %v4151_v22, %v1889_v4  ;;  %v6599_v22 = vld [vmem:[#allocation7 + $0x5f8] sm:$0xff] }
 0x957   : > { %v1923_v33 = vadd.f32 %v1921_v45, %v1887_v42  ;;  %v6620_v42 = vld [vmem:[#allocation7 + $0x5b0] sm:$0xff]  ;;  %v6623_v45 = vld [vmem:[#allocation7 + $0x598] sm:$0xff] }
 0x958   : > { %v4153_v36 = vpop.eup %4152 }
 0x959   : > { %4158 = vtanh.f32 %v1923_v33  ;;  %v1922_v53 = vmul.f32 %v4153_v36, %v1895_v41  ;;  %v4155_v32 = vpop.eup %4154  ;;  %v6626_v33 = vld [vmem:[#allocation7 + $0x590] sm:$0xff]  ;;  %v6629_v41 = vld [vmem:[#allocation7 + $0x578] sm:$0xff] }
 0x95a   : > { %v4157_v5 = vpop.eup %4156  ;;  %v1927_v47 = vsub.f32 1.0, %v4155_v32  ;;  %v1931_v57 = vmul.f32 %v4155_v32, %v6321_v30  ;;  %v6602_v30 = vld [vmem:[#allocation7 + $0x5f0] sm:$0xff] }
 0x95b   : > { %v1924_v31 = vadd.f32 %v1922_v53, %v1893_v37  ;;  %v1928_v26 = vsub.f32 1.0, %v4157_v5  ;;  %v1932_v54 = vmul.f32 %v4157_v5, %v6325_v40  ;;  %v6613_v40 = vld [vmem:[#allocation7 + $0x5d0] sm:$0xff]  ;;  %v6635_v37 = vld [vmem:[#allocation7 + $0x558] sm:$0xff] }
 0x95c   : > { %v6632_v36 = vld [vmem:[#allocation7 + $0x570] sm:$0xff]  ;;  %v6647_v5 = vld [vmem:[#allocation7 + $0x518] sm:$0xff] }
 0x95d   : > { %4160 = vtanh.f32 %v1924_v31  ;;  %v6638_v53 = vld [vmem:[#allocation7 + $0x550] sm:$0xff]  ;;  %v6641_v31 = vld [vmem:[#allocation7 + $0x538] sm:$0xff]  ;;  %8684 = vst [vmem:[#allocation38_spill] sm:$0xff] %v6647_v5 }
 0x95e   : > { %v6644_v32 = vld [vmem:[#allocation7 + $0x530] sm:$0xff] }
 0x966   : > { %v4159_v35 = vpop.eup %4158 }
 0x967   : > { %v1929_v38 = vmul.f32 %v4159_v35, %v1927_v47  ;;  %v6650_v47 = vld [vmem:[#allocation7 + $0x510] sm:$0xff]  ;;  %v6653_v35 = vld [vmem:[#allocation7 + $0x4f8] sm:$0xff] }
 0x968   : > { %8685 = vst [vmem:[#allocation39_spill] sm:$0xff] %v6650_v47  ;;  %8686 = vst [vmem:[#allocation40_spill] sm:$0xff] %v6653_v35 }
 0x969   : > { %v6591_v50 = vadd.f32 %v1931_v57, %v1929_v38  ;;  %v6605_v38 = vld [vmem:[#allocation7 + $0x5d8] sm:$0xff]  ;;  %v6656_v57 = vld [vmem:[#allocation7 + $0x4f0] sm:$0xff] }
 0x96a   : > { %v4161_v48 = vpop.eup %4160  ;;  %8687 = vst [vmem:[#allocation41_spill] sm:$0xff] %v6656_v57 }
 0x96b   : > { %2265 = vmatprep.mubr.f32.mxu0 %v6591_v50  ;;  %v1930_v4 = vmul.f32 %v4161_v48, %v1928_v26  ;;  %v6659_v26 = vld [vmem:[#allocation7 + $0x4d8] sm:$0xff]  ;;  %v6662_v48 = vld [vmem:[#allocation7 + $0x4d0] sm:$0xff] }
 0x96c   : > { %8688 = vst [vmem:[#allocation42_spill] sm:$0xff] %v6659_v26  ;;  %8689 = vst [vmem:[#allocation43_spill] sm:$0xff] %v6662_v48 }
 0x96d   : > { %v6595_v46 = vadd.f32 %v1932_v54, %v1930_v4  ;;  %v6665_v4 = vld [vmem:[#allocation7 + $0x4b8] sm:$0xff]  ;;  %v6668_v54 = vld [vmem:[#allocation7 + $0x4b0] sm:$0xff] }
 0x96e   : > { %8690 = vst [vmem:[#allocation44_spill] sm:$0xff] %v6665_v4  ;;  %8691 = vst [vmem:[#allocation45_spill] sm:$0xff] %v6668_v54 }
 0x96f   : > { %3892 = vmatprep.subr.mxu1 %v6595_v46 }
 0x970   : > { %3893 = vmatpush3.msra.mxu1 %v6595_v46 }
 0x971   : > { %3894 = vmatprep.subr.mxu1 %v6591_v50 }
 0x972   : > { %3895 = vmatpush3.msra.mxu1 %v6591_v50 }
 0x973   : > { %3897 = vmatmul.mubr.msk.f32.vlgmr.msra.gmra.mxu1 %vm399_vm0, %v6608_v39  ;;  %2278 = vmatprep.subr.mxu1 %v6599_v22 }
 0x974   : > { %2342 = vmatprep.mubr.f32.mxu1 %v6591_v50  ;;  %2279 = vmatpush1.msra.mxu1 %v6602_v30 }
 0x975   : > { %2280 = vmatprep.subr.mxu1 %v6605_v38 }
 0x976   : > { %2281 = vmatpush1.msra.mxu1 %v6613_v40 }
 0x977   : > { %2282 = vmatprep.subr.mxu1 %v6617_v44 }
 0x978   : > { %2283 = vmatpush1.msra.mxu1 %v6620_v42 }
 0x979   : > { %2284 = vmatprep.subr.mxu1 %v6623_v45 }
 0x97a   : > { %2285 = vmatpush1.msra.mxu1 %v6626_v33 }
 0x97b   : > { %2286 = vmatprep.subr.mxu1 %v6629_v41 }
 0x97c   : > { %2287 = vmatpush1.msra.mxu1 %v6632_v36 }
 0x97d   : > { %2288 = vmatprep.subr.mxu1 %v6635_v37 }
 0x97e   : > { %2289 = vmatpush1.msra.mxu1 %v6638_v53 }
 0x97f   : > { %2290 = vmatprep.subr.mxu1 %v6641_v31 }
 0x980   : > { %2291 = vmatpush1.msra.mxu1 %v6644_v32 }
 0x981   : > { %2292 = vmatprep.subr.mxu1 %v6647_v5  ;;  %v6671_v5 = vld [vmem:[#allocation7 + $0x498] sm:$0xff] }
 0x982   : > { %2293 = vmatpush1.msra.mxu1 %v6650_v47  ;;  %8692 = vst [vmem:[#allocation46_spill] sm:$0xff] %v6671_v5  ;;  %v6674_v47 = vld [vmem:[#allocation7 + $0x490] sm:$0xff] }
 0x983   : > { %2294 = vmatprep.subr.mxu1 %v6653_v35  ;;  %8693 = vst [vmem:[#allocation47_spill] sm:$0xff] %v6674_v47  ;;  %v6677_v35 = vld [vmem:[#allocation7 + $0x478] sm:$0xff] }
 0x984   : > { %2295 = vmatpush1.msra.mxu1 %v6656_v57  ;;  %8694 = vst [vmem:[#allocation48_spill] sm:$0xff] %v6677_v35  ;;  %v6680_v57 = vld [vmem:[#allocation7 + $0x470] sm:$0xff] }
 0x985   : > { %2296 = vmatprep.subr.mxu1 %v6659_v26  ;;  %8695 = vst [vmem:[#allocation49_spill] sm:$0xff] %v6680_v57  ;;  %v6683_v26 = vld [vmem:[#allocation7 + $0x458] sm:$0xff] }
 0x986   : > { %2297 = vmatpush1.msra.mxu1 %v6662_v48  ;;  %8696 = vst [vmem:[#allocation50_spill] sm:$0xff] %v6683_v26  ;;  %v6686_v48 = vld [vmem:[#allocation7 + $0x450] sm:$0xff] }
 0x987   : > { %2298 = vmatprep.subr.mxu1 %v6665_v4  ;;  %8697 = vst [vmem:[#allocation51_spill] sm:$0xff] %v6686_v48  ;;  %v6689_v4 = vld [vmem:[#allocation7 + $0x438] sm:$0xff] }
 0x988   : > { %2299 = vmatpush1.msra.mxu1 %v6668_v54  ;;  %8698 = vst [vmem:[#allocation52_spill] sm:$0xff] %v6689_v4  ;;  %v6692_v54 = vld [vmem:[#allocation7 + $0x430] sm:$0xff] }
 0x989   : > { %2300 = vmatprep.subr.mxu1 %v6671_v5  ;;  %8699 = vst [vmem:[#allocation53_spill] sm:$0xff] %v6692_v54  ;;  %v6695_v5 = vld [vmem:[#allocation7 + $0x418] sm:$0xff] }
 0x98a   : > { %2301 = vmatpush1.msra.mxu1 %v6674_v47  ;;  %8700 = vst [vmem:[#allocation54_spill] sm:$0xff] %v6695_v5  ;;  %v6698_v47 = vld [vmem:[#allocation7 + $0x410] sm:$0xff] }
 0x98b   : > { %2302 = vmatprep.subr.mxu1 %v6677_v35  ;;  %8701 = vst [vmem:[#allocation55_spill] sm:$0xff] %v6698_v47  ;;  %v6701_v35 = vld [vmem:[#allocation7 + $0x7f8] sm:$0xff] }
 0x98c   : > { %2303 = vmatpush1.msra.mxu1 %v6680_v57  ;;  %8702 = vst [vmem:[#allocation108_spill] sm:$0xff] %v6701_v35  ;;  %v6704_v57 = vld [vmem:[#allocation7 + $0x7f0] sm:$0xff] }
 0x98d   : > { %2304 = vmatprep.subr.mxu1 %v6683_v26  ;;  %8703 = vst [vmem:[#allocation110_spill] sm:$0xff] %v6704_v57  ;;  %v6707_v26 = vld [vmem:[#allocation7 + $0x7d8] sm:$0xff] }
 0x98e   : > { %2305 = vmatpush1.msra.mxu1 %v6686_v48  ;;  %8704 = vst [vmem:[#allocation109_spill] sm:$0xff] %v6707_v26  ;;  %v6710_v48 = vld [vmem:[#allocation7 + $0x7d0] sm:$0xff] }
 0x98f   : > { %2306 = vmatprep.subr.mxu1 %v6689_v4  ;;  %8705 = vst [vmem:[#allocation111_spill] sm:$0xff] %v6710_v48  ;;  %v6713_v4 = vld [vmem:[#allocation7 + $0x7b8] sm:$0xff] }
 0x990   : > { %2307 = vmatpush1.msra.mxu1 %v6692_v54  ;;  %8706 = vst [vmem:[#allocation112_spill] sm:$0xff] %v6713_v4  ;;  %v6716_v54 = vld [vmem:[#allocation7 + $0x7b0] sm:$0xff] }
 0x991   : > { %2308 = vmatprep.subr.mxu1 %v6695_v5  ;;  %8707 = vst [vmem:[#allocation56_spill] sm:$0xff] %v6716_v54  ;;  %v6719_v5 = vld [vmem:[#allocation7 + $0x798] sm:$0xff] }
 0x992   : > { %2309 = vmatpush1.msra.mxu1 %v6698_v47  ;;  %8708 = vst [vmem:[#allocation57_spill] sm:$0xff] %v6719_v5  ;;  %v6722_v47 = vld [vmem:[#allocation7 + $0x790] sm:$0xff] }
 0x993   : > { %2310 = vmatprep.subr.mxu1 %v6701_v35  ;;  %8709 = vst [vmem:[#allocation58_spill] sm:$0xff] %v6722_v47  ;;  %v6725_v35 = vld [vmem:[#allocation7 + $0x778] sm:$0xff] }
 0x994   : > { %2311 = vmatpush2.msra.mxu1 %v6704_v57  ;;  %8710 = vst [vmem:[#allocation59_spill] sm:$0xff] %v6725_v35  ;;  %v6728_v57 = vld [vmem:[#allocation7 + $0x770] sm:$0xff] }
 0x995   : > { %2312 = vmatprep.subr.mxu1 %v6707_v26  ;;  %8711 = vst [vmem:[#allocation60_spill] sm:$0xff] %v6728_v57  ;;  %v6731_v26 = vld [vmem:[#allocation7 + $0x758] sm:$0xff] }
 0x996   : > { %2313 = vmatpush2.msra.mxu1 %v6710_v48  ;;  %8712 = vst [vmem:[#allocation61_spill] sm:$0xff] %v6731_v26  ;;  %v6734_v48 = vld [vmem:[#allocation7 + $0x750] sm:$0xff] }
 0x997   : > { %2314 = vmatprep.subr.mxu1 %v6713_v4  ;;  %8713 = vst [vmem:[#allocation62_spill] sm:$0xff] %v6734_v48  ;;  %v6737_v4 = vld [vmem:[#allocation7 + $0x738] sm:$0xff] }
 0x998   : > { %2315 = vmatpush2.msra.mxu1 %v6716_v54  ;;  %8714 = vst [vmem:[#allocation63_spill] sm:$0xff] %v6737_v4  ;;  %v6740_v54 = vld [vmem:[#allocation7 + $0x730] sm:$0xff] }
 0x999   : > { %2316 = vmatprep.subr.mxu1 %v6719_v5  ;;  %8715 = vst [vmem:[#allocation64_spill] sm:$0xff] %v6740_v54  ;;  %v6743_v5 = vld [vmem:[#allocation7 + $0x718] sm:$0xff] }
 0x99a   : > { %2317 = vmatpush2.msra.mxu1 %v6722_v47  ;;  %8716 = vst [vmem:[#allocation65_spill] sm:$0xff] %v6743_v5  ;;  %v6746_v47 = vld [vmem:[#allocation7 + $0x710] sm:$0xff] }
 0x99b   : > { %2318 = vmatprep.subr.mxu1 %v6725_v35  ;;  %8717 = vst [vmem:[#allocation66_spill] sm:$0xff] %v6746_v47  ;;  %v6749_v35 = vld [vmem:[#allocation7 + $0x6f8] sm:$0xff] }
 0x99c   : > { %2319 = vmatpush2.msra.mxu1 %v6728_v57  ;;  %8718 = vst [vmem:[#allocation67_spill] sm:$0xff] %v6749_v35  ;;  %v6752_v57 = vld [vmem:[#allocation7 + $0x6f0] sm:$0xff] }
 0x99d   : > { %2320 = vmatprep.subr.mxu1 %v6731_v26  ;;  %8719 = vst [vmem:[#allocation68_spill] sm:$0xff] %v6752_v57  ;;  %v6755_v26 = vld [vmem:[#allocation7 + $0x6d8] sm:$0xff] }
 0x99e   : > { %2321 = vmatpush2.msra.mxu1 %v6734_v48  ;;  %8720 = vst [vmem:[#allocation69_spill] sm:$0xff] %v6755_v26  ;;  %v6758_v48 = vld [vmem:[#allocation7 + $0x6d0] sm:$0xff] }
 0x99f   : > { %2322 = vmatprep.subr.mxu1 %v6737_v4  ;;  %8721 = vst [vmem:[#allocation70_spill] sm:$0xff] %v6758_v48  ;;  %v6761_v4 = vld [vmem:[#allocation7 + $0x6b8] sm:$0xff] }
 0x9a0   : > { %2323 = vmatpush2.msra.mxu1 %v6740_v54  ;;  %8722 = vst [vmem:[#allocation72_spill] sm:$0xff] %v6761_v4  ;;  %v6764_v54 = vld [vmem:[#allocation7 + $0x6b0] sm:$0xff] }
 0x9a1   : > { %2324 = vmatprep.subr.mxu1 %v6743_v5  ;;  %8723 = vst [vmem:[#allocation74_spill] sm:$0xff] %v6764_v54  ;;  %v6767_v5 = vld [vmem:[#allocation7 + $0x698] sm:$0xff] }
 0x9a2   : > { %2325 = vmatpush2.msra.mxu1 %v6746_v47  ;;  %8724 = vst [vmem:[#allocation76_spill] sm:$0xff] %v6767_v5  ;;  %v6770_v47 = vld [vmem:[#allocation7 + $0x690] sm:$0xff] }
 0x9a3   : > { %2326 = vmatprep.subr.mxu1 %v6749_v35  ;;  %8725 = vst [vmem:[#allocation78_spill] sm:$0xff] %v6770_v47  ;;  %v6773_v35 = vld [vmem:[#allocation7 + $0x678] sm:$0xff] }
 0x9a4   : > { %2327 = vmatpush2.msra.mxu1 %v6752_v57  ;;  %8726 = vst [vmem:[#allocation80_spill] sm:$0xff] %v6773_v35  ;;  %v6776_v57 = vld [vmem:[#allocation7 + $0x670] sm:$0xff] }
 0x9a5   : > { %2328 = vmatprep.subr.mxu1 %v6755_v26  ;;  %v6779_v26 = vld [vmem:[#allocation7 + $0x658] sm:$0xff] }
 0x9a6   : > { %2329 = vmatpush2.msra.mxu1 %v6758_v48  ;;  %8727 = vst [vmem:[#allocation82_spill] sm:$0xff] %v6779_v26  ;;  %v6782_v48 = vld [vmem:[#allocation7 + $0x650] sm:$0xff] }
 0x9a7   : > { %2330 = vmatprep.subr.mxu1 %v6761_v4  ;;  %8728 = vst [vmem:[#allocation84_spill] sm:$0xff] %v6782_v48  ;;  %v6785_v4 = vld [vmem:[#allocation7 + $0x638] sm:$0xff] }
 0x9a8   : > { %2331 = vmatpush2.msra.mxu1 %v6764_v54  ;;  %8729 = vst [vmem:[#allocation86_spill] sm:$0xff] %v6785_v4  ;;  %v6792_v54 = vld [vmem:[#allocation7 + $0x630] sm:$0xff] }
 0x9a9   : > { %2332 = vmatprep.subr.mxu1 %v6767_v5  ;;  %v6790_v5 = vld [vmem:[#allocation7 + $0x620] sm:$0xff]  ;;  %8731 = vst [vmem:[#allocation90_spill] sm:$0xff] %v6792_v54 }
 0x9aa   : > { %2333 = vmatpush2.msra.mxu1 %v6770_v47  ;;  %8730 = vst [vmem:[#allocation88_spill] sm:$0xff] %v6790_v5  ;;  %2262 = vmatpush2.msra.mxu0 %v6790_v5  ;;  %v6798_v47 = vld [vmem:[#allocation7 + $0x618] sm:$0xff] }
 0x9ab   : > { %2334 = vmatprep.subr.mxu1 %v6773_v35  ;;  %v6796_v35 = vld [vmem:[#allocation7 + $0x608] sm:$0xff]  ;;  %8733 = vst [vmem:[#allocation96_spill] sm:$0xff] %v6798_v47 }
 0x9ac   : > { %2335 = vmatpush2.msra.mxu1 %v6776_v57  ;;  %8732 = vst [vmem:[#allocation92_spill] sm:$0xff] %v6796_v35  ;;  %2263 = vmatprep.subr.mxu0 %v6796_v35 }
 0x9ad   : > { %2336 = vmatprep.subr.mxu1 %v6779_v26  ;;  %v6802_v26 = vld [vmem:[#allocation7 + $0x600] sm:$0xff] }
 0x9ae   : > { %2337 = vmatpush2.msra.mxu1 %v6782_v48  ;;  %8734 = vst [vmem:[#allocation98_spill] sm:$0xff] %v6802_v26  ;;  %v6804_v48 = vld [vmem:[#allocation7 + $0x610] sm:$0xff]  ;;  %2264 = vmatpush2.msra.mxu0 %v6802_v26 }
 0x9af   : > { %2338 = vmatprep.subr.mxu1 %v6785_v4  ;;  %8735 = vst [vmem:[#allocation20_spill] sm:$0xff] %v6804_v48 }
 0x9b0   : > { %2339 = vmatpush2.msra.mxu1 %v6792_v54 }
 0x9b1   : > { %2340 = vmatprep.subr.mxu1 %v6798_v47 }
 0x9b2   : > { %2341 = vmatpush2.msra.mxu1 %v6804_v48 }
 0x9b3   : > { %2468 = vmatprep.subr.mxu1 %v6399_v18  ;;  %v8737_v18 = vld [vmem:[#allocation95_spill] sm:$0xff] }
 0xa33   : > { %v3898_v4 = vpop.f32.mrf.mxu1 }
 0xa35   : > { %v2192_v54 = vpop.f32.mrf.mxu1 }
 0xa36   : > { %2266 = vmatmul.mubr.f32.vlgmr.msra.gmra.mxu0 %v2192_v54  ;;  %2343 = vmatmul.mubr.f32.vlgmr.msra.gmra.mxu1 %v2192_v54 }
 0xa37   : > { %2271 = vmatprep.mubr.f32.mxu0 %v6595_v46  ;;  %2348 = vmatprep.mubr.f32.mxu1 %v6595_v46 }
 0xa38   : > { %2469 = vmatpush1.msra.mxu1 %v6401_v49  ;;  %v8738_v49 = vld [vmem:[#allocation97_spill] sm:$0xff] }
 0xa39   : > { %2470 = vmatprep.subr.mxu1 %v6404_v51  ;;  %v8739_v51 = vld [vmem:[#allocation99_spill] sm:$0xff] }
 0xa3a   : > { %2272 = vmatmul.mubr.f32.gmra.mxu0 %v3898_v4  ;;  %2349 = vmatmul.mubr.f32.gmra.mxu1 %v3898_v4  ;;  %v8760_v4 = vld [vmem:[#allocation101_spill] sm:$0xff] }
 0xa3b   : > { %3903 = vmatprep.mubr.msk.f32.mxu0 %vm399_vm0, %v6395_v28  ;;  %2471 = vmatpush1.msra.mxu1 %v6407_v59  ;;  %v8736_v28 = vld [vmem:[#allocation94_spill] sm:$0xff]  ;;  %v8740_v59 = vld [vmem:[#allocation113_spill] sm:$0xff] }
 0xa3c   : > { %2472 = vmatprep.subr.mxu1 %v6409_v19  ;;  %v8741_v19 = vld [vmem:[#allocation114_spill] sm:$0xff] }
 0xa3d   : > { %2473 = vmatpush1.msra.mxu1 %v6412_v43  ;;  %v8742_v43 = vld [vmem:[#allocation115_spill] sm:$0xff] }
 0xa3e   : > { %2474 = vmatprep.subr.mxu1 %v6415_v17  ;;  %v8743_v17 = vld [vmem:[#allocation29_spill] sm:$0xff] }
 0xa3f   : > { %2475 = vmatpush1.msra.mxu1 %v6418_v52  ;;  %v8744_v52 = vld [vmem:[#allocation30_spill] sm:$0xff] }
 0xa40   : > { %2476 = vmatprep.subr.mxu1 %v6421_v55  ;;  %v8745_v55 = vld [vmem:[#allocation22_spill] sm:$0xff] }
 0xa41   : > { %2477 = vmatpush1.msra.mxu1 %v6424_v1  ;;  %v8746_v1 = vld [vmem:[#allocation23_spill] sm:$0xff] }
 0xa42   : > { %2478 = vmatprep.subr.mxu1 %v6427_v10  ;;  %v8747_v10 = vld [vmem:[#allocation24_spill] sm:$0xff] }
 0xa43   : > { %2479 = vmatpush1.msra.mxu1 %v6430_v7  ;;  %v8748_v7 = vld [vmem:[#allocation25_spill] sm:$0xff] }
 0xa44   : > { %2480 = vmatprep.subr.mxu1 %v6433_v0  ;;  %v8749_v0 = vld [vmem:[#allocation26_spill] sm:$0xff] }
 0xa45   : > { %2481 = vmatpush1.msra.mxu1 %v6436_v12  ;;  %v8750_v12 = vld [vmem:[#allocation27_spill] sm:$0xff] }
 0xa46   : > { %2482 = vmatprep.subr.mxu1 %v6439_v56  ;;  %v8751_v56 = vld [vmem:[#allocation28_spill] sm:$0xff] }
 0xa47   : > { %2483 = vmatpush1.msra.mxu1 %v6442_v27  ;;  %v8752_v27 = vld [vmem:[#allocation31_spill] sm:$0xff] }
 0xa48   : > { %2484 = vmatprep.subr.mxu1 %v6445_v34  ;;  %v8753_v34 = vld [vmem:[#allocation32_spill] sm:$0xff] }
 0xa49   : > { %2485 = vmatpush1.msra.mxu1 %v6448_v62  ;;  %v8754_v62 = vld [vmem:[#allocation33_spill] sm:$0xff] }
 0xa4a   : > { %2486 = vmatprep.subr.mxu1 %v6451_v3  ;;  %v8755_v3 = vld [vmem:[#allocation34_spill] sm:$0xff] }
 0xa4b   : > { %2487 = vmatpush1.msra.mxu1 %v6454_v61  ;;  %v8756_v61 = vld [vmem:[#allocation35_spill] sm:$0xff] }
 0xa4c   : > { %2488 = vmatprep.subr.mxu1 %v6457_v58  ;;  %v8757_v58 = vld [vmem:[#allocation36_spill] sm:$0xff] }
 0xa4d   : > { %2489 = vmatpush1.msra.mxu1 %v6460_v60  ;;  %v8758_v60 = vld [vmem:[#allocation37_spill] sm:$0xff] }
 0xa4e   : > { %2490 = vmatprep.subr.mxu1 %v6463_v63  ;;  %v4400_v63 = vld [vmem:[#allocation8 + $0x4] sm:$0xf] }
 0xa4f   : > { %2491 = vmatpush1.msra.mxu1 %v6466_v21  ;;  %v8759_v21 = vld [vmem:[#allocation107_spill] sm:$0xff] }
 0xa50   : > { %2492 = vmatprep.subr.mxu1 %v6469_v8  ;;  %v2070_v8 = vrot.slane %v4400_v63, %v8759_v21 }
 0xa51   : > { %2493 = vmatpush1.msra.mxu1 %v6472_v9 }
 0xa52   : > { %2494 = vmatprep.subr.mxu1 %v6475_v11  ;;  %v2087_v54 = vmul.f32 %v2070_v8, %v8760_v4 }
 0xa53   : > { %2495 = vmatpush1.msra.mxu1 %v6478_v13 }
 0xa54   : > { %2496 = vmatprep.subr.mxu1 %v6481_v15 }
 0xa55   : > { %2497 = vmatpush1.msra.mxu1 %v6484_v25 }
 0xa56   : > { %2498 = vmatprep.subr.mxu1 %v6487_v2 }
 0xa57   : > { %2499 = vmatpush1.msra.mxu1 %v6490_v6 }
 0xa58   : > { %2500 = vmatprep.subr.mxu1 %v6493_v23 }
 0xa59   : > { %2501 = vmatpush2.msra.mxu1 %v6496_v14 }
 0xa5a   : > { %2502 = vmatprep.subr.mxu1 %v6499_v16 }
 0xa5b   : > { %2503 = vmatpush2.msra.mxu1 %v6502_v20 }
 0xa5c   : > { %2504 = vmatprep.subr.mxu1 %v6505_v24 }
 0xa5d   : > { %2505 = vmatpush2.msra.mxu1 %v6508_v29 }
 0xa5e   : > { %2506 = vmatprep.subr.mxu1 %v8736_v28 }
 0xa5f   : > { %2507 = vmatpush2.msra.mxu1 %v8737_v18 }
 0xa60   : > { %2508 = vmatprep.subr.mxu1 %v8738_v49 }
 0xa61   : > { %2509 = vmatpush2.msra.mxu1 %v8739_v51 }
 0xa62   : > { %2510 = vmatprep.subr.mxu1 %v8740_v59 }
 0xa63   : > { %2511 = vmatpush2.msra.mxu1 %v8741_v19 }
 0xa64   : > { %2512 = vmatprep.subr.mxu1 %v8742_v43 }
 0xa65   : > { %2513 = vmatpush2.msra.mxu1 %v8743_v17 }
 0xa66   : > { %2514 = vmatprep.subr.mxu1 %v8744_v52 }
 0xa67   : > { %2515 = vmatpush2.msra.mxu1 %v8745_v55 }
 0xa68   : > { %2516 = vmatprep.subr.mxu1 %v8746_v1 }
 0xa69   : > { %2517 = vmatpush2.msra.mxu1 %v8747_v10 }
 0xa6a   : > { %2518 = vmatprep.subr.mxu1 %v8748_v7 }
 0xa6b   : > { %2519 = vmatpush2.msra.mxu1 %v8749_v0 }
 0xa6c   : > { %2520 = vmatprep.subr.mxu1 %v8750_v12  ;;  %v8764_v12 = vld [vmem:[#allocation102_spill] sm:$0xff] }
 0xa6d   : > { %2521 = vmatpush2.msra.mxu1 %v8751_v56 }
 0xa6e   : > { %2522 = vmatprep.subr.mxu1 %v8752_v27 }
 0xa6f   : > { %2523 = vmatpush2.msra.mxu1 %v8753_v34 }
 0xa70   : > { %2524 = vmatprep.subr.mxu1 %v8754_v62  ;;  %v4401_v62 = vld [vmem:[#allocation10 + $0x4] sm:$0xf] }
 0xa71   : > { %2525 = vmatpush2.msra.mxu1 %v8755_v3  ;;  %v2101_v3 = vrot.slane %v4401_v62, %v8759_v21  ;;  %v8765_v62 = vld [vmem:[#allocation105_spill] sm:$0xff] }
 0xa72   : > { %2526 = vmatprep.subr.mxu1 %v8756_v61  ;;  %v8762_v61 = vld [vmem:[#allocation100_spill] sm:$0xff] }
 0xa73   : > { %2527 = vmatpush2.msra.mxu1 %v8757_v58  ;;  %v6879_v34 = vadd.f32 %v2101_v3, %v2087_v54  ;;  %v2091_v58 = vmul.f32 %v2070_v8, %v8762_v61 }
 0xa74   : > { %2528 = vmatprep.subr.mxu1 %v8758_v60 }
 0xa75   : > { %2529 = vmatpush2.msra.mxu1 %v6790_v5  ;;  %8761 = vst [vmem:[#allocation116_spill] sm:$0xff] %v6879_v34 }
 0xa76   : > { %2530 = vmatprep.subr.mxu1 %v6796_v35  ;;  %v6883_v35 = vadd.f32 %v2101_v3, %v2091_v58 }
 0xa77   : > { %2531 = vmatpush2.msra.mxu1 %v6802_v26 }
 0xa78   : > { %8763 = vst [vmem:[#allocation71_spill] sm:$0xff] %v6883_v35 }
 0xaf6   : > { %v2267_v27 = vpop.f32.mrf.mxu0  ;;  %v2344_v58 = vpop.f32.mrf.mxu1 }
 0xaf7   : > { %v2268_v60 = vadd.f32 %v2267_v27, %v6879_v34 }
 0xaf8   : > { %v2269_v5 = vpop.f32.mrf.mxu0 }
 0xaf9   : > { %v3762_v56 = vmul.f32 -1.442695, %v2268_v60  ;;  %v2270_v4 = vadd.f32 %v2269_v5, %v8764_v12  ;;  %v8766_v12 = vld [vmem:[#allocation103_spill] sm:$0xff] }
 0xafa   : > { %v2273_v26 = vpop.f32.mrf.mxu0 }
 0xafb   : > { %4162 = vpow2.f32 %v3762_v56  ;;  %v2274_v63 = vadd.f32 %v2273_v26, %v6883_v35  ;;  %v3764_v54 = vmul.f32 -1.442695, %v2270_v4  ;;  %v2346_v56 = vpop.f32.mrf.mxu1 }
 0xafc   : > { %v2275_v7 = vpop.f32.mrf.mxu0 }
 0xafd   : > { %v3763_v0 = vmul.f32 -1.442695, %v2274_v63  ;;  %v2276_v21 = vadd.f32 %v2275_v7, %v8765_v62  ;;  %v2350_v35 = vpop.f32.mrf.mxu1 }
 0xaff   : > { %4164 = vpow2.f32 %v3763_v0  ;;  %v3765_v61 = vmul.f32 -1.442695, %v2276_v21  ;;  %v2347_v0 = vadd.f32 %v2346_v56, %v8766_v12  ;;  %v2352_v4 = vpop.f32.mrf.mxu1  ;;  %v8767_v21 = vld [vmem:[#allocation21_spill] sm:$0xff] }
 0xb00   : > { %4166 = vpow2.f32 %v3764_v54  ;;  %v2345_v54 = vadd.f32 %v2344_v58, %v8767_v21 }
 0xb01   : > { %4168 = vpow2.f32 %v3765_v61 }
 0xb08   : > { %v4163_v8 = vpop.eup %4162 }
 0xb09   : > { %v2361_v27 = vadd.f32 1.0, %v4163_v8 }
 0xb0b   : > { %4170 = vrcp.f32 %v2361_v27  ;;  %v8768_v27 = vld [vmem:[#allocation106_spill] sm:$0xff] }
 0xb0c   : > { %v4165_v3 = vpop.eup %4164  ;;  %v2353_v62 = vadd.f32 %v2352_v4, %v8768_v27 }
 0xb0d   : > { %v2362_v60 = vadd.f32 1.0, %v4165_v3  ;;  %v4167_v26 = vpop.eup %4166  ;;  %v8769_v3 = vld [vmem:[#allocation104_spill] sm:$0xff] }
 0xb0e   : > { %v4169_v5 = vpop.eup %4168  ;;  %v2373_v63 = vadd.f32 1.0, %v4167_v26 }
 0xb0f   : > { %4172 = vrcp.f32 %v2362_v60  ;;  %v2374_v7 = vadd.f32 1.0, %v4169_v5  ;;  %v2351_v60 = vadd.f32 %v2350_v35, %v8769_v3 }
 0xb10   : > { %4174 = vrcp.f32 %v2373_v63 }
 0xb11   : > { %4176 = vrcp.f32 %v2374_v7 }
 0xb18   : > { %v4171_v34 = vpop.eup %4170 }
 0xb19   : > { %v2379_v61 = vmul.f32 %v4171_v34, %v2347_v0 }
 0xb1b   : > { %v2381_v8 = vadd.f32 %v2379_v61, %v2345_v54  ;;  %v8778_v54 = vld [vmem:[#allocation46_spill] sm:$0xff]  ;;  %v8779_v61 = vld [vmem:[#allocation47_spill] sm:$0xff] }
 0xb1c   : > { %v4173_v10 = vpop.eup %4172 }
 0xb1d   : > { %4178 = vtanh.f32 %v2381_v8  ;;  %v2380_v1 = vmul.f32 %v4173_v10, %v2353_v62  ;;  %v4175_v26 = vpop.eup %4174  ;;  %v8775_v10 = vld [vmem:[#allocation43_spill] sm:$0xff]  ;;  %v8777_v62 = vld [vmem:[#allocation45_spill] sm:$0xff]  ;;  %v8780_v8 = vld [vmem:[#allocation48_spill] sm:$0xff] }
 0xb1e   : > { %v4177_v56 = vpop.eup %4176  ;;  %v2385_v12 = vsub.f32 1.0, %v4175_v26  ;;  %v2389_v58 = vmul.f32 %v4175_v26, %v6591_v50  ;;  %v8770_v50 = vld [vmem:[#allocation38_spill] sm:$0xff] }
 0xb1f   : > { %v2382_v55 = vadd.f32 %v2380_v1, %v2351_v60  ;;  %v2386_v34 = vsub.f32 1.0, %v4177_v56  ;;  %v2390_v4 = vmul.f32 %v4177_v56, %v6595_v46  ;;  %v8771_v46 = vld [vmem:[#allocation39_spill] sm:$0xff]  ;;  %v8774_v1 = vld [vmem:[#allocation42_spill] sm:$0xff]  ;;  %v8781_v60 = vld [vmem:[#allocation49_spill] sm:$0xff] }
 0xb20   : > { %v8782_v26 = vld [vmem:[#allocation50_spill] sm:$0xff]  ;;  %v8783_v56 = vld [vmem:[#allocation51_spill] sm:$0xff] }
 0xb21   : > { %4180 = vtanh.f32 %v2382_v55  ;;  %v8773_v55 = vld [vmem:[#allocation41_spill] sm:$0xff] }
 0xb2a   : > { %v4179_v5 = vpop.eup %4178 }
 0xb2b   : > { %v2387_v52 = vmul.f32 %v4179_v5, %v2385_v12  ;;  %v8776_v12 = vld [vmem:[#allocation44_spill] sm:$0xff] }
 0xb2c   : > { %v8784_v5 = vld [vmem:[#allocation52_spill] sm:$0xff] }
 0xb2d   : > { %v6893_v63 = vadd.f32 %v2389_v58, %v2387_v52  ;;  %v8772_v52 = vld [vmem:[#allocation40_spill] sm:$0xff]  ;;  %v8785_v58 = vld [vmem:[#allocation53_spill] sm:$0xff] }
 0xb2e   : > { %v4181_v0 = vpop.eup %4180 }
 0xb2f   : > { %2532 = vmatprep.mubr.f32.mxu1 %v6893_v63  ;;  %v2388_v7 = vmul.f32 %v4181_v0, %v2386_v34  ;;  %v8786_v34 = vld [vmem:[#allocation54_spill] sm:$0xff]  ;;  %v8787_v0 = vld [vmem:[#allocation55_spill] sm:$0xff] }
 0xb31   : > { %v6897_v35 = vadd.f32 %v2390_v4, %v2388_v7  ;;  %v8788_v7 = vld [vmem:[#allocation108_spill] sm:$0xff]  ;;  %v8789_v4 = vld [vmem:[#allocation110_spill] sm:$0xff] }
 0xb33   : > { %3899 = vmatprep.subr.mxu0 %v6897_v35 }
 0xb34   : > { %3900 = vmatpush3.msra.mxu0 %v6897_v35 }
 0xb35   : > { %3901 = vmatprep.subr.mxu0 %v6893_v63 }
 0xb36   : > { %3902 = vmatpush3.msra.mxu0 %v6893_v63 }
 0xb37   : > { %3904 = vmatmul.mubr.msk.f32.vlgmr.msra.gmra.mxu0 %vm399_vm0, %v6608_v39  ;;  %2545 = vmatprep.subr.mxu0 %v6599_v22 }
 0xb38   : > { %2609 = vmatprep.mubr.f32.mxu0 %v6893_v63  ;;  %2546 = vmatpush1.msra.mxu0 %v6602_v30 }
 0xb39   : > { %2547 = vmatprep.subr.mxu0 %v6605_v38 }
 0xb3a   : > { %2548 = vmatpush1.msra.mxu0 %v6613_v40 }
 0xb3b   : > { %2549 = vmatprep.subr.mxu0 %v6617_v44 }
 0xb3c   : > { %2550 = vmatpush1.msra.mxu0 %v6620_v42 }
 0xb3d   : > { %2551 = vmatprep.subr.mxu0 %v6623_v45 }
 0xb3e   : > { %2552 = vmatpush1.msra.mxu0 %v6626_v33 }
 0xb3f   : > { %2553 = vmatprep.subr.mxu0 %v6629_v41 }
 0xb40   : > { %2554 = vmatpush1.msra.mxu0 %v6632_v36 }
 0xb41   : > { %2555 = vmatprep.subr.mxu0 %v6635_v37 }
 0xb42   : > { %2556 = vmatpush1.msra.mxu0 %v6638_v53 }
 0xb43   : > { %2557 = vmatprep.subr.mxu0 %v6641_v31 }
 0xb44   : > { %2558 = vmatpush1.msra.mxu0 %v6644_v32 }
 0xb45   : > { %2559 = vmatprep.subr.mxu0 %v8770_v50 }
 0xb46   : > { %2560 = vmatpush1.msra.mxu0 %v8771_v46 }
 0xb47   : > { %2561 = vmatprep.subr.mxu0 %v8772_v52 }
 0xb48   : > { %2562 = vmatpush1.msra.mxu0 %v8773_v55 }
 0xb49   : > { %2563 = vmatprep.subr.mxu0 %v8774_v1 }
 0xb4a   : > { %2564 = vmatpush1.msra.mxu0 %v8775_v10 }
 0xb4b   : > { %2565 = vmatprep.subr.mxu0 %v8776_v12 }
 0xb4c   : > { %2566 = vmatpush1.msra.mxu0 %v8777_v62 }
 0xb4d   : > { %2567 = vmatprep.subr.mxu0 %v8778_v54 }
 0xb4e   : > { %2568 = vmatpush1.msra.mxu0 %v8779_v61  ;;  %v8790_v61 = vld [vmem:[#allocation109_spill] sm:$0xff] }
 0xb4f   : > { %2569 = vmatprep.subr.mxu0 %v8780_v8  ;;  %v8791_v8 = vld [vmem:[#allocation111_spill] sm:$0xff] }
 0xb50   : > { %2570 = vmatpush1.msra.mxu0 %v8781_v60  ;;  %v8792_v60 = vld [vmem:[#allocation112_spill] sm:$0xff] }
 0xb51   : > { %2571 = vmatprep.subr.mxu0 %v8782_v26  ;;  %v8793_v26 = vld [vmem:[#allocation56_spill] sm:$0xff] }
 0xb52   : > { %2572 = vmatpush1.msra.mxu0 %v8783_v56  ;;  %v8794_v56 = vld [vmem:[#allocation57_spill] sm:$0xff] }
 0xb53   : > { %2573 = vmatprep.subr.mxu0 %v8784_v5  ;;  %v8795_v5 = vld [vmem:[#allocation58_spill] sm:$0xff] }
 0xb54   : > { %2574 = vmatpush1.msra.mxu0 %v8785_v58  ;;  %v8796_v58 = vld [vmem:[#allocation59_spill] sm:$0xff] }
 0xb55   : > { %2575 = vmatprep.subr.mxu0 %v8786_v34  ;;  %v8797_v34 = vld [vmem:[#allocation60_spill] sm:$0xff] }
 0xb56   : > { %2576 = vmatpush1.msra.mxu0 %v8787_v0  ;;  %v8798_v0 = vld [vmem:[#allocation61_spill] sm:$0xff] }
 0xb57   : > { %2577 = vmatprep.subr.mxu0 %v8788_v7  ;;  %v8799_v7 = vld [vmem:[#allocation62_spill] sm:$0xff] }
 0xb58   : > { %2578 = vmatpush2.msra.mxu0 %v8789_v4  ;;  %v8800_v4 = vld [vmem:[#allocation63_spill] sm:$0xff] }
 0xb59   : > { %2579 = vmatprep.subr.mxu0 %v8790_v61  ;;  %v8801_v61 = vld [vmem:[#allocation64_spill] sm:$0xff] }
 0xb5a   : > { %2580 = vmatpush2.msra.mxu0 %v8791_v8  ;;  %v8802_v8 = vld [vmem:[#allocation65_spill] sm:$0xff] }
 0xb5b   : > { %2581 = vmatprep.subr.mxu0 %v8792_v60  ;;  %v8803_v60 = vld [vmem:[#allocation66_spill] sm:$0xff] }
 0xb5c   : > { %2582 = vmatpush2.msra.mxu0 %v8793_v26  ;;  %v8804_v26 = vld [vmem:[#allocation67_spill] sm:$0xff] }
 0xb5d   : > { %2583 = vmatprep.subr.mxu0 %v8794_v56  ;;  %v8805_v56 = vld [vmem:[#allocation68_spill] sm:$0xff] }
 0xb5e   : > { %2584 = vmatpush2.msra.mxu0 %v8795_v5  ;;  %v8806_v5 = vld [vmem:[#allocation69_spill] sm:$0xff] }
 0xb5f   : > { %2585 = vmatprep.subr.mxu0 %v8796_v58  ;;  %v8807_v58 = vld [vmem:[#allocation70_spill] sm:$0xff] }
 0xb60   : > { %2586 = vmatpush2.msra.mxu0 %v8797_v34  ;;  %v8808_v34 = vld [vmem:[#allocation72_spill] sm:$0xff] }
 0xb61   : > { %2587 = vmatprep.subr.mxu0 %v8798_v0  ;;  %v8809_v0 = vld [vmem:[#allocation74_spill] sm:$0xff] }
 0xb62   : > { %2588 = vmatpush2.msra.mxu0 %v8799_v7  ;;  %v8810_v7 = vld [vmem:[#allocation76_spill] sm:$0xff] }
 0xb63   : > { %2589 = vmatprep.subr.mxu0 %v8800_v4  ;;  %v8811_v4 = vld [vmem:[#allocation78_spill] sm:$0xff] }
 0xb64   : > { %2590 = vmatpush2.msra.mxu0 %v8801_v61  ;;  %v8812_v61 = vld [vmem:[#allocation80_spill] sm:$0xff] }
 0xb65   : > { %2591 = vmatprep.subr.mxu0 %v8802_v8 }
 0xb66   : > { %2592 = vmatpush2.msra.mxu0 %v8803_v60  ;;  %v8813_v60 = vld [vmem:[#allocation82_spill] sm:$0xff] }
 0xb67   : > { %2593 = vmatprep.subr.mxu0 %v8804_v26  ;;  %v8814_v26 = vld [vmem:[#allocation84_spill] sm:$0xff] }
 0xb68   : > { %2594 = vmatpush2.msra.mxu0 %v8805_v56  ;;  %v8815_v56 = vld [vmem:[#allocation86_spill] sm:$0xff] }
 0xb69   : > { %2595 = vmatprep.subr.mxu0 %v8806_v5  ;;  %v8816_v5 = vld [vmem:[#allocation90_spill] sm:$0xff] }
 0xb6a   : > { %2596 = vmatpush2.msra.mxu0 %v8807_v58 }
 0xb6b   : > { %2597 = vmatprep.subr.mxu0 %v8808_v34 }
 0xb6c   : > { %2598 = vmatpush2.msra.mxu0 %v8809_v0 }
 0xb6d   : > { %2599 = vmatprep.subr.mxu0 %v8810_v7  ;;  %v6970_v7 = vld [vmem:[#allocation7 + $0x5e8] sm:$0xff] }
 0xb6e   : > { %2600 = vmatpush2.msra.mxu0 %v8811_v4  ;;  %8817 = vst [vmem:[#allocation73_spill] sm:$0xff] %v6970_v7 }
 0xb6f   : > { %2601 = vmatprep.subr.mxu0 %v8812_v61 }
 0xb70   : > { %2602 = vmatpush2.msra.mxu0 %v6776_v57 }
 0xb71   : > { %2603 = vmatprep.subr.mxu0 %v8813_v60 }
 0xb72   : > { %2604 = vmatpush2.msra.mxu0 %v8814_v26 }
 0xb73   : > { %2605 = vmatprep.subr.mxu0 %v8815_v56  ;;  %v6975_v56 = vld [vmem:[#allocation7 + $0x5e0] sm:$0xff] }
 0xb74   : > { %2606 = vmatpush2.msra.mxu0 %v8816_v5  ;;  %8818 = vst [vmem:[#allocation75_spill] sm:$0xff] %v6975_v56 }
 0xb75   : > { %2607 = vmatprep.subr.mxu0 %v6798_v47  ;;  %v6978_v47 = vld [vmem:[#allocation7 + $0x5c8] sm:$0xff] }
 0xb76   : > { %2608 = vmatpush2.msra.mxu0 %v6804_v48  ;;  %8819 = vst [vmem:[#allocation77_spill] sm:$0xff] %v6978_v47  ;;  %v6982_v48 = vld [vmem:[%s5032_s17] sm:$0xff] }
 0xb77   : > { %2735 = vmatprep.subr.mxu0 %v6970_v7  ;;  %8820 = vst [vmem:[#allocation79_spill] sm:$0xff] %v6982_v48  ;;  %v6989_v7 = vld [vmem:[#allocation7 + $0x5a8] sm:$0xff] }
 0xb78   : > { %8822 = vst [vmem:[#allocation83_spill] sm:$0xff] %v6989_v7 }
 0xbf7   : > { %v3905_v61 = vpop.f32.mrf.mxu0 }
 0xbf9   : > { %v2459_v4 = vpop.f32.mrf.mxu0 }
 0xbfa   : > { %2533 = vmatmul.mubr.f32.vlgmr.msra.gmra.mxu1 %v2459_v4  ;;  %2610 = vmatmul.mubr.f32.vlgmr.msra.gmra.mxu0 %v2459_v4  ;;  %v6986_v4 = vld [vmem:[#allocation7 + $0x5c0] sm:$0xff] }
 0xbfb   : > { %2538 = vmatprep.mubr.f32.mxu1 %v6897_v35  ;;  %2615 = vmatprep.mubr.f32.mxu0 %v6897_v35  ;;  %8821 = vst [vmem:[#allocation81_spill] sm:$0xff] %v6986_v4 }
 0xbfc   : > { %2736 = vmatpush1.msra.mxu0 %v6975_v56  ;;  %v6992_v56 = vld [vmem:[#allocation7 + $0x5a0] sm:$0xff] }
 0xbfd   : > { %2737 = vmatprep.subr.mxu0 %v6978_v47  ;;  %8823 = vst [vmem:[#allocation85_spill] sm:$0xff] %v6992_v56  ;;  %v6995_v47 = vld [vmem:[#allocation7 + $0x588] sm:$0xff] }
 0xbfe   : > { %2539 = vmatmul.mubr.f32.gmra.mxu1 %v3905_v61  ;;  %2616 = vmatmul.mubr.f32.gmra.mxu0 %v3905_v61  ;;  %8824 = vst [vmem:[#allocation87_spill] sm:$0xff] %v6995_v47  ;;  %v6998_v61 = vld [vmem:[#allocation7 + $0x580] sm:$0xff] }
 0xbff   : > { %3910 = vmatprep.mubr.msk.f32.mxu1 %vm399_vm0, %v6982_v48  ;;  %2738 = vmatpush1.msra.mxu0 %v6986_v4  ;;  %8825 = vst [vmem:[#allocation89_spill] sm:$0xff] %v6998_v61  ;;  %v7001_v48 = vld [vmem:[#allocation7 + $0x568] sm:$0xff]  ;;  %v7004_v4 = vld [vmem:[#allocation7 + $0x560] sm:$0xff] }
 0xc00   : > { %2739 = vmatprep.subr.mxu0 %v6989_v7  ;;  %8826 = vst [vmem:[#allocation91_spill] sm:$0xff] %v7001_v48  ;;  %8827 = vst [vmem:[#allocation93_spill] sm:$0xff] %v7004_v4  ;;  %v7007_v7 = vld [vmem:[#allocation7 + $0x548] sm:$0xff] }
 0xc01   : > { %2740 = vmatpush1.msra.mxu0 %v6992_v56  ;;  %8828 = vst [vmem:[#allocation94_spill] sm:$0xff] %v7007_v7  ;;  %v7010_v56 = vld [vmem:[#allocation7 + $0x540] sm:$0xff] }
 0xc02   : > { %2741 = vmatprep.subr.mxu0 %v6995_v47  ;;  %8829 = vst [vmem:[#allocation95_spill] sm:$0xff] %v7010_v56  ;;  %v7013_v47 = vld [vmem:[#allocation7 + $0x528] sm:$0xff] }
 0xc03   : > { %2742 = vmatpush1.msra.mxu0 %v6998_v61  ;;  %8830 = vst [vmem:[#allocation97_spill] sm:$0xff] %v7013_v47  ;;  %v7016_v61 = vld [vmem:[#allocation7 + $0x520] sm:$0xff] }
 0xc04   : > { %2743 = vmatprep.subr.mxu0 %v7001_v48  ;;  %8831 = vst [vmem:[#allocation99_spill] sm:$0xff] %v7016_v61  ;;  %v7019_v48 = vld [vmem:[#allocation7 + $0x508] sm:$0xff] }
 0xc05   : > { %2744 = vmatpush1.msra.mxu0 %v7004_v4  ;;  %8832 = vst [vmem:[#allocation113_spill] sm:$0xff] %v7019_v48  ;;  %v7022_v4 = vld [vmem:[#allocation7 + $0x500] sm:$0xff] }
 0xc06   : > { %2745 = vmatprep.subr.mxu0 %v7007_v7  ;;  %8833 = vst [vmem:[#allocation114_spill] sm:$0xff] %v7022_v4  ;;  %v7025_v7 = vld [vmem:[#allocation7 + $0x4e8] sm:$0xff] }
 0xc07   : > { %2746 = vmatpush1.msra.mxu0 %v7010_v56  ;;  %8834 = vst [vmem:[#allocation115_spill] sm:$0xff] %v7025_v7  ;;  %v7028_v56 = vld [vmem:[#allocation7 + $0x4e0] sm:$0xff] }
 0xc08   : > { %2747 = vmatprep.subr.mxu0 %v7013_v47  ;;  %8835 = vst [vmem:[#allocation29_spill] sm:$0xff] %v7028_v56  ;;  %v7031_v47 = vld [vmem:[#allocation7 + $0x4c8] sm:$0xff] }
 0xc09   : > { %2748 = vmatpush1.msra.mxu0 %v7016_v61  ;;  %8836 = vst [vmem:[#allocation107_spill] sm:$0xff] %v7031_v47  ;;  %v7034_v61 = vld [vmem:[#allocation7 + $0x4c0] sm:$0xff] }
 0xc0a   : > { %2749 = vmatprep.subr.mxu0 %v7019_v48  ;;  %v7037_v48 = vld [vmem:[#allocation7 + $0x4a8] sm:$0xff] }
 0xc0b   : > { %2750 = vmatpush1.msra.mxu0 %v7022_v4  ;;  %v7040_v4 = vld [vmem:[#allocation7 + $0x4a0] sm:$0xff] }
 0xc0c   : > { %2751 = vmatprep.subr.mxu0 %v7025_v7  ;;  %v7043_v7 = vld [vmem:[#allocation7 + $0x488] sm:$0xff] }
 0xc0d   : > { %2752 = vmatpush1.msra.mxu0 %v7028_v56  ;;  %v7046_v56 = vld [vmem:[#allocation7 + $0x480] sm:$0xff] }
 0xc0e   : > { %2753 = vmatprep.subr.mxu0 %v7031_v47  ;;  %v7049_v47 = vld [vmem:[#allocation7 + $0x468] sm:$0xff] }
 0xc0f   : > { %2754 = vmatpush1.msra.mxu0 %v7034_v61 }
 0xc10   : > { %2755 = vmatprep.subr.mxu0 %v7037_v48 }
 0xc11   : > { %2756 = vmatpush1.msra.mxu0 %v7040_v4 }
 0xc12   : > { %2757 = vmatprep.subr.mxu0 %v7043_v7 }
 0xc13   : > { %2758 = vmatpush1.msra.mxu0 %v7046_v56 }
 0xc14   : > { %2759 = vmatprep.subr.mxu0 %v7049_v47 }
 0xc15   : > { %2760 = vmatpush1.msra.mxu0 %v6472_v9  ;;  %v8837_v9 = vld [vmem:[#allocation30_spill] sm:$0xff] }
 0xc16   : > { %2761 = vmatprep.subr.mxu0 %v6475_v11  ;;  %v8838_v11 = vld [vmem:[#allocation22_spill] sm:$0xff] }
 0xc17   : > { %2762 = vmatpush1.msra.mxu0 %v6478_v13  ;;  %v8839_v13 = vld [vmem:[#allocation23_spill] sm:$0xff] }
 0xc18   : > { %2763 = vmatprep.subr.mxu0 %v6481_v15  ;;  %v8840_v15 = vld [vmem:[#allocation24_spill] sm:$0xff] }
 0xc19   : > { %2764 = vmatpush1.msra.mxu0 %v6484_v25  ;;  %v8841_v25 = vld [vmem:[#allocation25_spill] sm:$0xff] }
 0xc1a   : > { %2765 = vmatprep.subr.mxu0 %v6487_v2  ;;  %v8842_v2 = vld [vmem:[#allocation26_spill] sm:$0xff] }
 0xc1b   : > { %2766 = vmatpush1.msra.mxu0 %v6490_v6  ;;  %v8843_v6 = vld [vmem:[#allocation27_spill] sm:$0xff] }
 0xc1c   : > { %2767 = vmatprep.subr.mxu0 %v6493_v23  ;;  %v8844_v23 = vld [vmem:[#allocation28_spill] sm:$0xff] }
 0xc1d   : > { %2768 = vmatpush2.msra.mxu0 %v6496_v14  ;;  %v8845_v14 = vld [vmem:[#allocation31_spill] sm:$0xff] }
 0xc1e   : > { %2769 = vmatprep.subr.mxu0 %v6499_v16  ;;  %v8846_v16 = vld [vmem:[#allocation32_spill] sm:$0xff] }
 0xc1f   : > { %2770 = vmatpush2.msra.mxu0 %v6502_v20  ;;  %v8847_v20 = vld [vmem:[#allocation33_spill] sm:$0xff] }
 0xc20   : > { %2771 = vmatprep.subr.mxu0 %v6505_v24  ;;  %v8848_v24 = vld [vmem:[#allocation34_spill] sm:$0xff] }
 0xc21   : > { %2772 = vmatpush2.msra.mxu0 %v6508_v29  ;;  %v8849_v29 = vld [vmem:[#allocation35_spill] sm:$0xff] }
 0xc22   : > { %2773 = vmatprep.subr.mxu0 %v8736_v28  ;;  %v8850_v28 = vld [vmem:[#allocation36_spill] sm:$0xff] }
 0xc23   : > { %2774 = vmatpush2.msra.mxu0 %v8737_v18  ;;  %v8851_v18 = vld [vmem:[#allocation37_spill] sm:$0xff] }
 0xc24   : > { %2775 = vmatprep.subr.mxu0 %v8738_v49  ;;  %v8852_v49 = vld [vmem:[#allocation88_spill] sm:$0xff] }
 0xc25   : > { %2776 = vmatpush2.msra.mxu0 %v8739_v51  ;;  %v8853_v51 = vld [vmem:[#allocation92_spill] sm:$0xff] }
 0xc26   : > { %2777 = vmatprep.subr.mxu0 %v8740_v59  ;;  %v8854_v59 = vld [vmem:[#allocation98_spill] sm:$0xff] }
 0xc27   : > { %2778 = vmatpush2.msra.mxu0 %v8741_v19 }
 0xc28   : > { %2779 = vmatprep.subr.mxu0 %v8742_v43  ;;  %v8855_v43 = vld [vmem:[#allocation116_spill] sm:$0xff] }
 0xc29   : > { %2780 = vmatpush2.msra.mxu0 %v8743_v17 }
 0xc2a   : > { %2781 = vmatprep.subr.mxu0 %v8837_v9 }
 0xc2b   : > { %2782 = vmatpush2.msra.mxu0 %v8838_v11 }
 0xc2c   : > { %2783 = vmatprep.subr.mxu0 %v8839_v13 }
 0xc2d   : > { %2784 = vmatpush2.msra.mxu0 %v8840_v15  ;;  %v8856_v15 = vld [vmem:[#allocation71_spill] sm:$0xff] }
 0xc2e   : > { %2785 = vmatprep.subr.mxu0 %v8841_v25 }
 0xc2f   : > { %2786 = vmatpush2.msra.mxu0 %v8842_v2  ;;  %v8857_v2 = vld [vmem:[#allocation102_spill] sm:$0xff] }
 0xc30   : > { %2787 = vmatprep.subr.mxu0 %v8843_v6 }
 0xc31   : > { %2788 = vmatpush2.msra.mxu0 %v8844_v23 }
 0xc32   : > { %2789 = vmatprep.subr.mxu0 %v8845_v14 }
 0xc33   : > { %2790 = vmatpush2.msra.mxu0 %v8846_v16  ;;  %v8858_v16 = vld [vmem:[#allocation105_spill] sm:$0xff] }
 0xc34   : > { %2791 = vmatprep.subr.mxu0 %v8847_v20 }
 0xc35   : > { %2792 = vmatpush2.msra.mxu0 %v8848_v24 }
 0xc36   : > { %2793 = vmatprep.subr.mxu0 %v8849_v29 }
 0xc37   : > { %2794 = vmatpush2.msra.mxu0 %v8850_v28 }
 0xc38   : > { %2795 = vmatprep.subr.mxu0 %v8851_v18 }
 0xc39   : > { %2796 = vmatpush2.msra.mxu0 %v8852_v49 }
 0xc3a   : > { %2797 = vmatprep.subr.mxu0 %v8853_v51 }
 0xc3b   : > { %2798 = vmatpush2.msra.mxu0 %v8854_v59 }
 0xcba   : > { %v2534_v19 = vpop.f32.mrf.mxu1 }
 0xcbb   : > { %v2535_v17 = vadd.f32 %v2534_v19, %v8855_v43 }
 0xcbc   : > { %v2536_v9 = vpop.f32.mrf.mxu1 }
 0xcbd   : > { %v3768_v11 = vmul.f32 -1.442695, %v2535_v17  ;;  %v2537_v6 = vadd.f32 %v2536_v9, %v8857_v2  ;;  %v2611_v17 = vpop.f32.mrf.mxu0  ;;  %v8859_v2 = vld [vmem:[#allocation103_spill] sm:$0xff] }
 0xcbe   : > { %v2540_v13 = vpop.f32.mrf.mxu1 }
 0xcbf   : > { %4182 = vpow2.f32 %v3768_v11  ;;  %v2541_v25 = vadd.f32 %v2540_v13, %v8856_v15  ;;  %v3770_v24 = vmul.f32 -1.442695, %v2537_v6  ;;  %v2613_v11 = vpop.f32.mrf.mxu0 }
 0xcc0   : > { %v2542_v14 = vpop.f32.mrf.mxu1 }
 0xcc1   : > { %v3769_v23 = vmul.f32 -1.442695, %v2541_v25  ;;  %v2543_v20 = vadd.f32 %v2542_v14, %v8858_v16  ;;  %v2617_v15 = vpop.f32.mrf.mxu0 }
 0xcc3   : > { %4184 = vpow2.f32 %v3769_v23  ;;  %v3771_v29 = vmul.f32 -1.442695, %v2543_v20  ;;  %v2614_v23 = vadd.f32 %v2613_v11, %v8859_v2  ;;  %v2619_v6 = vpop.f32.mrf.mxu0  ;;  %v2612_v20 = vadd.f32 %v2611_v17, %v8767_v21 }
 0xcc4   : > { %4186 = vpow2.f32 %v3770_v24 }
 0xcc5   : > { %4188 = vpow2.f32 %v3771_v29 }
 0xccc   : > { %v4183_v28 = vpop.eup %4182 }
 0xccd   : > { %v2628_v18 = vadd.f32 1.0, %v4183_v28  ;;  %v2620_v28 = vadd.f32 %v2619_v6, %v8768_v27 }
 0xccf   : > { %4190 = vrcp.f32 %v2628_v18 }
 0xcd0   : > { %v4185_v19 = vpop.eup %4184 }
 0xcd1   : > { %v2629_v43 = vadd.f32 1.0, %v4185_v19  ;;  %v4187_v13 = vpop.eup %4186 }
 0xcd2   : > { %v4189_v9 = vpop.eup %4188  ;;  %v2640_v25 = vadd.f32 1.0, %v4187_v13 }
 0xcd3   : > { %4192 = vrcp.f32 %v2629_v43  ;;  %v2641_v14 = vadd.f32 1.0, %v4189_v9  ;;  %v2618_v43 = vadd.f32 %v2617_v15, %v8769_v3 }
 0xcd4   : > { %4194 = vrcp.f32 %v2640_v25 }
 0xcd5   : > { %4196 = vrcp.f32 %v2641_v14 }
 0xcdc   : > { %v4191_v59 = vpop.eup %4190 }
 0xcdd   : > { %v2646_v24 = vmul.f32 %v4191_v59, %v2614_v23 }
 0xcdf   : > { %v2648_v29 = vadd.f32 %v2646_v24, %v2612_v20  ;;  %v8889_v20 = vld [vmem:[#allocation80_spill] sm:$0xff] }
 0xce0   : > { %v4193_v18 = vpop.eup %4192 }
 0xce1   : > { %4198 = vtanh.f32 %v2648_v29  ;;  %v2647_v19 = vmul.f32 %v4193_v18, %v2620_v28  ;;  %v4195_v13 = vpop.eup %4194  ;;  %v8898_v28 = vld [vmem:[#allocation83_spill] sm:$0xff]  ;;  %v8899_v18 = vld [vmem:[#allocation85_spill] sm:$0xff] }
 0xce2   : > { %v4197_v11 = vpop.eup %4196  ;;  %v2652_v2 = vsub.f32 1.0, %v4195_v13  ;;  %v2656_v17 = vmul.f32 %v4195_v13, %v6893_v63  ;;  %v8875_v63 = vld [vmem:[#allocation57_spill] sm:$0xff]  ;;  %v8902_v13 = vld [vmem:[#allocation91_spill] sm:$0xff] }
 0xce3   : > { %v2649_v16 = vadd.f32 %v2647_v19, %v2618_v43  ;;  %v2653_v59 = vsub.f32 1.0, %v4197_v11  ;;  %v2657_v6 = vmul.f32 %v4197_v11, %v6897_v35  ;;  %v8876_v35 = vld [vmem:[#allocation58_spill] sm:$0xff]  ;;  %v8900_v43 = vld [vmem:[#allocation87_spill] sm:$0xff]  ;;  %v8901_v19 = vld [vmem:[#allocation89_spill] sm:$0xff] }
 0xce4   : > { %v8903_v11 = vld [vmem:[#allocation93_spill] sm:$0xff] }
 0xce5   : > { %4200 = vtanh.f32 %v2649_v16  ;;  %v8888_v16 = vld [vmem:[#allocation78_spill] sm:$0xff] }
 0xcee   : > { %v4199_v9 = vpop.eup %4198 }
 0xcef   : > { %v2654_v51 = vmul.f32 %v4199_v9, %v2652_v2  ;;  %v8887_v2 = vld [vmem:[#allocation76_spill] sm:$0xff]  ;;  %v8904_v9 = vld [vmem:[#allocation94_spill] sm:$0xff] }
 0xcf1   : > { %v7100_v25 = vadd.f32 %v2656_v17, %v2654_v51  ;;  %v8886_v51 = vld [vmem:[#allocation69_spill] sm:$0xff]  ;;  %v8905_v17 = vld [vmem:[#allocation95_spill] sm:$0xff] }
 0xcf2   : > { %v4201_v23 = vpop.eup %4200 }
 0xcf3   : > { %2799 = vmatprep.mubr.f32.mxu0 %v7100_v25  ;;  %v2655_v14 = vmul.f32 %v4201_v23, %v2653_v59  ;;  %v8906_v59 = vld [vmem:[#allocation97_spill] sm:$0xff]  ;;  %v8907_v23 = vld [vmem:[#allocation99_spill] sm:$0xff] }
 0xcf5   : > { %v7104_v15 = vadd.f32 %v2657_v6, %v2655_v14  ;;  %v8908_v14 = vld [vmem:[#allocation113_spill] sm:$0xff]  ;;  %v8909_v6 = vld [vmem:[#allocation114_spill] sm:$0xff] }
 0xcf7   : > { %3906 = vmatprep.subr.mxu1 %v7104_v15 }
 0xcf8   : > { %3907 = vmatpush3.msra.mxu1 %v7104_v15 }
 0xcf9   : > { %3908 = vmatprep.subr.mxu1 %v7100_v25 }
 0xcfa   : > { %3909 = vmatpush3.msra.mxu1 %v7100_v25 }
 0xcfb   : > { %3911 = vmatmul.mubr.msk.f32.vlgmr.msra.gmra.mxu1 %vm399_vm0, %v6608_v39  ;;  %2812 = vmatprep.subr.mxu1 %v6599_v22  ;;  %v8860_v22 = vld [vmem:[#allocation47_spill] sm:$0xff]  ;;  %v8863_v39 = vld [vmem:[#allocation50_spill] sm:$0xff] }
 0xcfc   : > { %2876 = vmatprep.mubr.f32.mxu1 %v7100_v25  ;;  %2813 = vmatpush1.msra.mxu1 %v6602_v30  ;;  %v8861_v30 = vld [vmem:[#allocation48_spill] sm:$0xff] }
 0xcfd   : > { %2814 = vmatprep.subr.mxu1 %v6605_v38  ;;  %v8862_v38 = vld [vmem:[#allocation49_spill] sm:$0xff] }
 0xcfe   : > { %2815 = vmatpush1.msra.mxu1 %v6613_v40  ;;  %v8864_v40 = vld [vmem:[#allocation51_spill] sm:$0xff] }
 0xcff   : > { %2816 = vmatprep.subr.mxu1 %v6617_v44  ;;  %v8865_v44 = vld [vmem:[#allocation52_spill] sm:$0xff] }
 0xd00   : > { %2817 = vmatpush1.msra.mxu1 %v6620_v42  ;;  %v8866_v42 = vld [vmem:[#allocation53_spill] sm:$0xff] }
 0xd01   : > { %2818 = vmatprep.subr.mxu1 %v6623_v45  ;;  %v8867_v45 = vld [vmem:[#allocation54_spill] sm:$0xff] }
 0xd02   : > { %2819 = vmatpush1.msra.mxu1 %v6626_v33  ;;  %v8868_v33 = vld [vmem:[#allocation55_spill] sm:$0xff] }
 0xd03   : > { %2820 = vmatprep.subr.mxu1 %v6629_v41  ;;  %v8869_v41 = vld [vmem:[#allocation108_spill] sm:$0xff] }
 0xd04   : > { %2821 = vmatpush1.msra.mxu1 %v6632_v36  ;;  %v8870_v36 = vld [vmem:[#allocation110_spill] sm:$0xff] }
 0xd05   : > { %2822 = vmatprep.subr.mxu1 %v6635_v37  ;;  %v8871_v37 = vld [vmem:[#allocation109_spill] sm:$0xff] }
 0xd06   : > { %2823 = vmatpush1.msra.mxu1 %v6638_v53  ;;  %v8872_v53 = vld [vmem:[#allocation111_spill] sm:$0xff] }
 0xd07   : > { %2824 = vmatprep.subr.mxu1 %v6641_v31  ;;  %v8873_v31 = vld [vmem:[#allocation112_spill] sm:$0xff] }
 0xd08   : > { %2825 = vmatpush1.msra.mxu1 %v6644_v32  ;;  %v8874_v32 = vld [vmem:[#allocation56_spill] sm:$0xff] }
 0xd09   : > { %2826 = vmatprep.subr.mxu1 %v8770_v50  ;;  %v8877_v50 = vld [vmem:[#allocation59_spill] sm:$0xff] }
 0xd0a   : > { %2827 = vmatpush1.msra.mxu1 %v8771_v46  ;;  %v8878_v46 = vld [vmem:[#allocation60_spill] sm:$0xff] }
 0xd0b   : > { %2828 = vmatprep.subr.mxu1 %v8772_v52  ;;  %v8879_v52 = vld [vmem:[#allocation61_spill] sm:$0xff] }
 0xd0c   : > { %2829 = vmatpush1.msra.mxu1 %v8773_v55  ;;  %v8880_v55 = vld [vmem:[#allocation62_spill] sm:$0xff] }
 0xd0d   : > { %2830 = vmatprep.subr.mxu1 %v8774_v1  ;;  %v8881_v1 = vld [vmem:[#allocation63_spill] sm:$0xff] }
 0xd0e   : > { %2831 = vmatpush1.msra.mxu1 %v8775_v10  ;;  %v8882_v10 = vld [vmem:[#allocation64_spill] sm:$0xff] }
 0xd0f   : > { %2832 = vmatprep.subr.mxu1 %v8776_v12  ;;  %v8883_v12 = vld [vmem:[#allocation66_spill] sm:$0xff] }
 0xd10   : > { %2833 = vmatpush1.msra.mxu1 %v8777_v62  ;;  %v8884_v62 = vld [vmem:[#allocation67_spill] sm:$0xff] }
 0xd11   : > { %2834 = vmatprep.subr.mxu1 %v8778_v54  ;;  %v8885_v54 = vld [vmem:[#allocation68_spill] sm:$0xff] }
 0xd12   : > { %2835 = vmatpush1.msra.mxu1 %v8860_v22  ;;  %v8910_v22 = vld [vmem:[#allocation115_spill] sm:$0xff] }
 0xd13   : > { %2836 = vmatprep.subr.mxu1 %v8861_v30  ;;  %v8911_v30 = vld [vmem:[#allocation29_spill] sm:$0xff] }
 0xd14   : > { %2837 = vmatpush1.msra.mxu1 %v8862_v38  ;;  %v8912_v38 = vld [vmem:[#allocation107_spill] sm:$0xff] }
 0xd15   : > { %2838 = vmatprep.subr.mxu1 %v8863_v39  ;;  %v7206_v39 = vld [vmem:[#allocation7 + $0x460] sm:$0xff] }
 0xd16   : > { %2839 = vmatpush1.msra.mxu1 %v8864_v40  ;;  %v7209_v40 = vld [vmem:[#allocation7 + $0x448] sm:$0xff] }
 0xd17   : > { %2840 = vmatprep.subr.mxu1 %v8865_v44  ;;  %v7212_v44 = vld [vmem:[#allocation7 + $0x440] sm:$0xff] }
 0xd18   : > { %2841 = vmatpush1.msra.mxu1 %v8866_v42  ;;  %v7215_v42 = vld [vmem:[#allocation7 + $0x428] sm:$0xff] }
 0xd19   : > { %2842 = vmatprep.subr.mxu1 %v8867_v45  ;;  %v7218_v45 = vld [vmem:[#allocation7 + $0x420] sm:$0xff] }
 0xd1a   : > { %2843 = vmatpush1.msra.mxu1 %v8868_v33  ;;  %v7221_v33 = vld [vmem:[#allocation7 + $0x408] sm:$0xff] }
 0xd1b   : > { %2844 = vmatprep.subr.mxu1 %v8869_v41  ;;  %v7224_v41 = vld [vmem:[#allocation7 + $0x400] sm:$0xff] }
 0xd1c   : > { %2845 = vmatpush2.msra.mxu1 %v8870_v36  ;;  %v7227_v36 = vld [vmem:[#allocation7 + $0x7e8] sm:$0xff] }
 0xd1d   : > { %2846 = vmatprep.subr.mxu1 %v8871_v37  ;;  %v7230_v37 = vld [vmem:[#allocation7 + $0x7e0] sm:$0xff] }
 0xd1e   : > { %2847 = vmatpush2.msra.mxu1 %v8872_v53  ;;  %v7233_v53 = vld [vmem:[#allocation7 + $0x7c8] sm:$0xff] }
 0xd1f   : > { %2848 = vmatprep.subr.mxu1 %v8873_v31  ;;  %v7236_v31 = vld [vmem:[#allocation7 + $0x7c0] sm:$0xff] }
 0xd20   : > { %2849 = vmatpush2.msra.mxu1 %v8874_v32  ;;  %v7239_v32 = vld [vmem:[#allocation7 + $0x7a8] sm:$0xff] }
 0xd21   : > { %2850 = vmatprep.subr.mxu1 %v8875_v63  ;;  %v7242_v63 = vld [vmem:[#allocation7 + $0x7a0] sm:$0xff] }
 0xd22   : > { %2851 = vmatpush2.msra.mxu1 %v8876_v35  ;;  %v7245_v35 = vld [vmem:[#allocation7 + $0x788] sm:$0xff] }
 0xd23   : > { %2852 = vmatprep.subr.mxu1 %v8877_v50  ;;  %8913 = vst [vmem:[#allocation101_spill] sm:$0xff] %v7245_v35  ;;  %v7248_v50 = vld [vmem:[#allocation7 + $0x780] sm:$0xff] }
 0xd24   : > { %2853 = vmatpush2.msra.mxu1 %v8878_v46  ;;  %8914 = vst [vmem:[#allocation100_spill] sm:$0xff] %v7248_v50  ;;  %v7251_v46 = vld [vmem:[#allocation7 + $0x768] sm:$0xff] }
 0xd25   : > { %2854 = vmatprep.subr.mxu1 %v8879_v52  ;;  %8915 = vst [vmem:[#allocation21_spill] sm:$0xff] %v7251_v46  ;;  %v7254_v52 = vld [vmem:[#allocation7 + $0x760] sm:$0xff] }
 0xd26   : > { %2855 = vmatpush2.msra.mxu1 %v8880_v55  ;;  %8916 = vst [vmem:[#allocation106_spill] sm:$0xff] %v7254_v52  ;;  %v7257_v55 = vld [vmem:[#allocation7 + $0x748] sm:$0xff] }
 0xd27   : > { %2856 = vmatprep.subr.mxu1 %v8881_v1  ;;  %8917 = vst [vmem:[#allocation104_spill] sm:$0xff] %v7257_v55  ;;  %v7260_v1 = vld [vmem:[#allocation7 + $0x740] sm:$0xff] }
 0xd28   : > { %2857 = vmatpush2.msra.mxu1 %v8882_v10  ;;  %8918 = vst [vmem:[#allocation38_spill] sm:$0xff] %v7260_v1  ;;  %v7263_v10 = vld [vmem:[#allocation7 + $0x728] sm:$0xff] }
 0xd29   : > { %2858 = vmatprep.subr.mxu1 %v8802_v8  ;;  %v8890_v8 = vld [vmem:[#allocation86_spill] sm:$0xff]  ;;  %8919 = vst [vmem:[#allocation39_spill] sm:$0xff] %v7263_v10 }
 0xd2a   : > { %2859 = vmatpush2.msra.mxu1 %v8883_v12  ;;  %v7266_v12 = vld [vmem:[#allocation7 + $0x720] sm:$0xff] }
 0xd2b   : > { %2860 = vmatprep.subr.mxu1 %v8884_v62  ;;  %8920 = vst [vmem:[#allocation40_spill] sm:$0xff] %v7266_v12  ;;  %v7269_v62 = vld [vmem:[#allocation7 + $0x708] sm:$0xff] }
 0xd2c   : > { %2861 = vmatpush2.msra.mxu1 %v8885_v54  ;;  %8921 = vst [vmem:[#allocation41_spill] sm:$0xff] %v7269_v62  ;;  %v7272_v54 = vld [vmem:[#allocation7 + $0x700] sm:$0xff] }
 0xd2d   : > { %2862 = vmatprep.subr.mxu1 %v8886_v51  ;;  %8922 = vst [vmem:[#allocation42_spill] sm:$0xff] %v7272_v54  ;;  %v7275_v51 = vld [vmem:[#allocation7 + $0x6e8] sm:$0xff] }
 0xd2e   : > { %2863 = vmatpush2.msra.mxu1 %v8807_v58  ;;  %v8891_v58 = vld [vmem:[#allocation96_spill] sm:$0xff]  ;;  %8923 = vst [vmem:[#allocation43_spill] sm:$0xff] %v7275_v51 }
 0xd2f   : > { %2864 = vmatprep.subr.mxu1 %v8808_v34  ;;  %v8892_v34 = vld [vmem:[#allocation20_spill] sm:$0xff] }
 0xd30   : > { %2865 = vmatpush2.msra.mxu1 %v8809_v0  ;;  %v8893_v0 = vld [vmem:[#allocation73_spill] sm:$0xff] }
 0xd31   : > { %2866 = vmatprep.subr.mxu1 %v8887_v2  ;;  %v7278_v2 = vld [vmem:[#allocation7 + $0x6e0] sm:$0xff] }
 0xd32   : > { %2867 = vmatpush2.msra.mxu1 %v8888_v16  ;;  %8924 = vst [vmem:[#allocation44_spill] sm:$0xff] %v7278_v2  ;;  %v7281_v16 = vld [vmem:[#allocation7 + $0x6c8] sm:$0xff] }
 0xd33   : > { %2868 = vmatprep.subr.mxu1 %v8889_v20  ;;  %8925 = vst [vmem:[#allocation45_spill] sm:$0xff] %v7281_v16  ;;  %v7284_v20 = vld [vmem:[#allocation7 + $0x6c0] sm:$0xff] }
 0xd34   : > { %2869 = vmatpush2.msra.mxu1 %v6776_v57  ;;  %v8894_v57 = vld [vmem:[#allocation75_spill] sm:$0xff]  ;;  %8926 = vst [vmem:[#allocation46_spill] sm:$0xff] %v7284_v20 }
 0xd35   : > { %2870 = vmatprep.subr.mxu1 %v8813_v60  ;;  %v8895_v60 = vld [vmem:[#allocation77_spill] sm:$0xff] }
 0xd36   : > { %2871 = vmatpush2.msra.mxu1 %v8814_v26  ;;  %v8896_v26 = vld [vmem:[#allocation79_spill] sm:$0xff] }
 0xd37   : > { %2872 = vmatprep.subr.mxu1 %v8890_v8  ;;  %v7287_v8 = vld [vmem:[#allocation7 + $0x6a8] sm:$0xff] }
 0xd38   : > { %2873 = vmatpush2.msra.mxu1 %v8816_v5  ;;  %v8897_v5 = vld [vmem:[#allocation81_spill] sm:$0xff]  ;;  %8927 = vst [vmem:[#allocation65_spill] sm:$0xff] %v7287_v8 }
 0xd39   : > { %2874 = vmatprep.subr.mxu1 %v8891_v58  ;;  %v7290_v58 = vld [vmem:[#allocation7 + $0x6a0] sm:$0xff] }
 0xd3a   : > { %2875 = vmatpush2.msra.mxu1 %v8892_v34  ;;  %8928 = vst [vmem:[#allocation70_spill] sm:$0xff] %v7290_v58  ;;  %v7293_v34 = vld [vmem:[#allocation7 + $0x688] sm:$0xff] }
 0xd3b   : > { %3002 = vmatprep.subr.mxu1 %v8893_v0  ;;  %8929 = vst [vmem:[#allocation72_spill] sm:$0xff] %v7293_v34 }
 0xdbb   : > { %v3912_v24 = vpop.f32.mrf.mxu1 }
 0xdbd   : > { %v2726_v29 = vpop.f32.mrf.mxu1 }
 0xdbe   : > { %2800 = vmatmul.mubr.f32.vlgmr.msra.gmra.mxu0 %v2726_v29  ;;  %2877 = vmatmul.mubr.f32.vlgmr.msra.gmra.mxu1 %v2726_v29  ;;  %v7299_v29 = vld [vmem:[#allocation7 + $0x668] sm:$0xff] }
 0xdbf   : > { %2805 = vmatprep.mubr.f32.mxu0 %v7104_v15  ;;  %2882 = vmatprep.mubr.f32.mxu1 %v7104_v15  ;;  %8931 = vst [vmem:[#allocation82_spill] sm:$0xff] %v7299_v29 }
 0xdc0   : > { %3003 = vmatpush1.msra.mxu1 %v8894_v57 }
 0xdc1   : > { %3004 = vmatprep.subr.mxu1 %v8895_v60 }
 0xdc2   : > { %2806 = vmatmul.mubr.f32.gmra.mxu0 %v3912_v24  ;;  %2883 = vmatmul.mubr.f32.gmra.mxu1 %v3912_v24  ;;  %v7296_v24 = vld [vmem:[#allocation7 + $0x680] sm:$0xff] }
 0xdc3   : > { %3917 = vmatprep.mubr.msk.f32.mxu0 %vm399_vm0, %v8896_v26  ;;  %3005 = vmatpush1.msra.mxu1 %v8897_v5  ;;  %8930 = vst [vmem:[#allocation74_spill] sm:$0xff] %v7296_v24 }
 0xdc4   : > { %3006 = vmatprep.subr.mxu1 %v8898_v28 }
 0xdc5   : > { %3007 = vmatpush1.msra.mxu1 %v8899_v18 }
 0xdc6   : > { %3008 = vmatprep.subr.mxu1 %v8900_v43 }
 0xdc7   : > { %3009 = vmatpush1.msra.mxu1 %v8901_v19 }
 0xdc8   : > { %3010 = vmatprep.subr.mxu1 %v8902_v13 }
 0xdc9   : > { %3011 = vmatpush1.msra.mxu1 %v8903_v11 }
 0xdca   : > { %3012 = vmatprep.subr.mxu1 %v8904_v9 }
 0xdcb   : > { %3013 = vmatpush1.msra.mxu1 %v8905_v17 }
 0xdcc   : > { %3014 = vmatprep.subr.mxu1 %v8906_v59 }
 0xdcd   : > { %3015 = vmatpush1.msra.mxu1 %v8907_v23 }
 0xdce   : > { %3016 = vmatprep.subr.mxu1 %v8908_v14 }
 0xdcf   : > { %3017 = vmatpush1.msra.mxu1 %v8909_v6 }
 0xdd0   : > { %3018 = vmatprep.subr.mxu1 %v8910_v22 }
 0xdd1   : > { %3019 = vmatpush1.msra.mxu1 %v8911_v30 }
 0xdd2   : > { %3020 = vmatprep.subr.mxu1 %v8912_v38 }
 0xdd3   : > { %3021 = vmatpush1.msra.mxu1 %v7034_v61 }
 0xdd4   : > { %3022 = vmatprep.subr.mxu1 %v7037_v48 }
 0xdd5   : > { %3023 = vmatpush1.msra.mxu1 %v7040_v4 }
 0xdd6   : > { %3024 = vmatprep.subr.mxu1 %v7043_v7 }
 0xdd7   : > { %3025 = vmatpush1.msra.mxu1 %v7046_v56 }
 0xdd8   : > { %3026 = vmatprep.subr.mxu1 %v7049_v47 }
 0xdd9   : > { %3027 = vmatpush1.msra.mxu1 %v7206_v39 }
 0xdda   : > { %3028 = vmatprep.subr.mxu1 %v7209_v40 }
 0xddb   : > { %3029 = vmatpush1.msra.mxu1 %v7212_v44 }
 0xddc   : > { %3030 = vmatprep.subr.mxu1 %v7215_v42 }
 0xddd   : > { %3031 = vmatpush1.msra.mxu1 %v7218_v45 }
 0xdde   : > { %3032 = vmatprep.subr.mxu1 %v7221_v33 }
 0xddf   : > { %3033 = vmatpush1.msra.mxu1 %v7224_v41 }
 0xde0   : > { %3034 = vmatprep.subr.mxu1 %v7227_v36 }
 0xde1   : > { %3035 = vmatpush2.msra.mxu1 %v7230_v37 }
 0xde2   : > { %3036 = vmatprep.subr.mxu1 %v7233_v53 }
 0xde3   : > { %3037 = vmatpush2.msra.mxu1 %v7236_v31 }
 0xde4   : > { %3038 = vmatprep.subr.mxu1 %v7239_v32 }
 0xde5   : > { %3039 = vmatpush2.msra.mxu1 %v7242_v63 }
 0xde6   : > { %3040 = vmatprep.subr.mxu1 %v7245_v35 }
 0xde7   : > { %3041 = vmatpush2.msra.mxu1 %v7248_v50 }
 0xde8   : > { %3042 = vmatprep.subr.mxu1 %v7251_v46 }
 0xde9   : > { %3043 = vmatpush2.msra.mxu1 %v7254_v52 }
 0xdea   : > { %3044 = vmatprep.subr.mxu1 %v7257_v55 }
 0xdeb   : > { %3045 = vmatpush2.msra.mxu1 %v7260_v1 }
 0xdec   : > { %3046 = vmatprep.subr.mxu1 %v7263_v10 }
 0xded   : > { %3047 = vmatpush2.msra.mxu1 %v7266_v12 }
 0xdee   : > { %3048 = vmatprep.subr.mxu1 %v7269_v62  ;;  %v8939_v62 = vld [vmem:[#allocation71_spill] sm:$0xff] }
 0xdef   : > { %3049 = vmatpush2.msra.mxu1 %v7272_v54 }
 0xdf0   : > { %3050 = vmatprep.subr.mxu1 %v7275_v51 }
 0xdf1   : > { %3051 = vmatpush2.msra.mxu1 %v7278_v2 }
 0xdf2   : > { %3052 = vmatprep.subr.mxu1 %v7281_v16 }
 0xdf3   : > { %3053 = vmatpush2.msra.mxu1 %v7284_v20  ;;  %v7302_v20 = vld [vmem:[#allocation7 + $0x660] sm:$0xff] }
 0xdf4   : > { %3054 = vmatprep.subr.mxu1 %v7287_v8  ;;  %8932 = vst [vmem:[#allocation84_spill] sm:$0xff] %v7302_v20  ;;  %v7305_v8 = vld [vmem:[#allocation7 + $0x648] sm:$0xff] }
 0xdf5   : > { %3055 = vmatpush2.msra.mxu1 %v7290_v58  ;;  %8933 = vst [vmem:[#allocation90_spill] sm:$0xff] %v7305_v8  ;;  %v7308_v58 = vld [vmem:[#allocation7 + $0x640] sm:$0xff] }
 0xdf6   : > { %3056 = vmatprep.subr.mxu1 %v7293_v34  ;;  %8934 = vst [vmem:[#allocation30_spill] sm:$0xff] %v7308_v58  ;;  %v7311_v34 = vld [vmem:[#allocation7 + $0x628] sm:$0xff] }
 0xdf7   : > { %3057 = vmatpush2.msra.mxu1 %v7296_v24  ;;  %8935 = vst [vmem:[#allocation22_spill] sm:$0xff] %v7311_v34  ;;  %v8936_v24 = vld [vmem:[#allocation92_spill] sm:$0xff] }
 0xdf8   : > { %3058 = vmatprep.subr.mxu1 %v7299_v29  ;;  %v8937_v29 = vld [vmem:[#allocation98_spill] sm:$0xff] }
 0xdf9   : > { %3059 = vmatpush2.msra.mxu1 %v7302_v20  ;;  %v8938_v20 = vld [vmem:[#allocation116_spill] sm:$0xff] }
 0xdfa   : > { %3060 = vmatprep.subr.mxu1 %v7305_v8 }
 0xdfb   : > { %3061 = vmatpush2.msra.mxu1 %v7308_v58  ;;  %v8940_v58 = vld [vmem:[#allocation102_spill] sm:$0xff] }
 0xdfc   : > { %3062 = vmatprep.subr.mxu1 %v7311_v34  ;;  %v8941_v34 = vld [vmem:[#allocation105_spill] sm:$0xff] }
 0xdfd   : > { %3063 = vmatpush2.msra.mxu1 %v8852_v49 }
 0xdfe   : > { %3064 = vmatprep.subr.mxu1 %v8936_v24 }
 0xdff   : > { %3065 = vmatpush2.msra.mxu1 %v8937_v29 }
 0xe7e   : > { %v2801_v16 = vpop.f32.mrf.mxu0 }
 0xe7f   : > { %v2802_v2 = vadd.f32 %v2801_v16, %v8938_v20 }
 0xe80   : > { %v2803_v51 = vpop.f32.mrf.mxu0 }
 0xe81   : > { %v3774_v54 = vmul.f32 -1.442695, %v2802_v2  ;;  %v2804_v10 = vadd.f32 %v2803_v51, %v8940_v58  ;;  %v2878_v2 = vpop.f32.mrf.mxu1  ;;  %v8942_v58 = vld [vmem:[#allocation103_spill] sm:$0xff] }
 0xe82   : > { %v2807_v8 = vpop.f32.mrf.mxu0 }
 0xe83   : > { %4202 = vpow2.f32 %v3774_v54  ;;  %v2808_v12 = vadd.f32 %v2807_v8, %v8939_v62  ;;  %v3776_v52 = vmul.f32 -1.442695, %v2804_v10  ;;  %v2880_v54 = vpop.f32.mrf.mxu1 }
 0xe84   : > { %v2809_v55 = vpop.f32.mrf.mxu0 }
 0xe85   : > { %v3775_v1 = vmul.f32 -1.442695, %v2808_v12  ;;  %v2810_v49 = vadd.f32 %v2809_v55, %v8941_v34  ;;  %v2884_v62 = vpop.f32.mrf.mxu1 }
 0xe87   : > { %4204 = vpow2.f32 %v3775_v1  ;;  %v3777_v24 = vmul.f32 -1.442695, %v2810_v49  ;;  %v2881_v1 = vadd.f32 %v2880_v54, %v8942_v58  ;;  %v2886_v10 = vpop.f32.mrf.mxu1 }
 0xe88   : > { %4206 = vpow2.f32 %v3776_v52  ;;  %v2879_v52 = vadd.f32 %v2878_v2, %v8767_v21 }
 0xe89   : > { %4208 = vpow2.f32 %v3777_v24 }
 0xe90   : > { %v4203_v29 = vpop.eup %4202 }
 0xe91   : > { %v2895_v46 = vadd.f32 1.0, %v4203_v29 }
 0xe93   : > { %4210 = vrcp.f32 %v2895_v46  ;;  %v2887_v46 = vadd.f32 %v2886_v10, %v8768_v27 }
 0xe94   : > { %v4205_v16 = vpop.eup %4204 }
 0xe95   : > { %v2896_v20 = vadd.f32 1.0, %v4205_v16  ;;  %v4207_v8 = vpop.eup %4206 }
 0xe96   : > { %v4209_v51 = vpop.eup %4208  ;;  %v2907_v12 = vadd.f32 1.0, %v4207_v8 }
 0xe97   : > { %4212 = vrcp.f32 %v2896_v20  ;;  %v2908_v55 = vadd.f32 1.0, %v4209_v51  ;;  %v2885_v20 = vadd.f32 %v2884_v62, %v8769_v3 }
 0xe98   : > { %4214 = vrcp.f32 %v2907_v12 }
 0xe99   : > { %4216 = vrcp.f32 %v2908_v55 }
 0xea0   : > { %v4211_v50 = vpop.eup %4210 }
 0xea1   : > { %v2913_v49 = vmul.f32 %v4211_v50, %v2881_v1 }
 0xea3   : > { %v2915_v24 = vadd.f32 %v2913_v49, %v2879_v52  ;;  %v7354_v52 = vld [vmem:[#allocation7 + $0x5b8] sm:$0xff]  ;;  %v7357_v49 = vld [vmem:[#allocation7 + $0x5b0] sm:$0xff] }
 0xea4   : > { %v4213_v29 = vpop.eup %4212 }
 0xea5   : > { %4218 = vtanh.f32 %v2915_v24  ;;  %v2914_v16 = vmul.f32 %v4213_v29, %v2887_v46  ;;  %v4215_v8 = vpop.eup %4214  ;;  %v7360_v24 = vld [vmem:[#allocation7 + $0x598] sm:$0xff]  ;;  %v7363_v46 = vld [vmem:[#allocation7 + $0x590] sm:$0xff] }
 0xea6   : > { %v4217_v54 = vpop.eup %4216  ;;  %v2919_v51 = vsub.f32 1.0, %v4215_v8  ;;  %v2923_v2 = vmul.f32 %v4215_v8, %v7100_v25  ;;  %v7337_v25 = vld [vmem:[%s5032_s17 + $0x8] sm:$0xff]  ;;  %v7375_v8 = vld [vmem:[#allocation7 + $0x550] sm:$0xff] }
 0xea7   : > { %v2916_v34 = vadd.f32 %v2914_v16, %v2885_v20  ;;  %v2920_v12 = vsub.f32 1.0, %v4217_v54  ;;  %v2924_v62 = vmul.f32 %v4217_v54, %v7104_v15  ;;  %v7345_v15 = vld [vmem:[#allocation7 + $0x5f0] sm:$0xff]  ;;  %v7366_v29 = vld [vmem:[#allocation7 + $0x578] sm:$0xff] }
 0xea8   : > { %v7369_v20 = vld [vmem:[#allocation7 + $0x570] sm:$0xff]  ;;  %v7372_v16 = vld [vmem:[#allocation7 + $0x558] sm:$0xff] }
 0xea9   : > { %4220 = vtanh.f32 %v2916_v34  ;;  %v7351_v34 = vld [vmem:[#allocation7 + $0x5d0] sm:$0xff]  ;;  %v7378_v54 = vld [vmem:[#allocation7 + $0x538] sm:$0xff] }
 0xeb2   : > { %v4219_v58 = vpop.eup %4218 }
 0xeb3   : > { %v2921_v35 = vmul.f32 %v4219_v58, %v2919_v51  ;;  %v7348_v58 = vld [vmem:[#allocation7 + $0x5d8] sm:$0xff]  ;;  %v7381_v51 = vld [vmem:[#allocation7 + $0x530] sm:$0xff] }
 0xeb4   : > { %8943 = vst [vmem:[#allocation23_spill] sm:$0xff] %v7381_v51 }
 0xeb5   : > { %v7326_v50 = vadd.f32 %v2923_v2, %v2921_v35  ;;  %v7341_v35 = vld [vmem:[#allocation7 + $0x5f8] sm:$0xff] }
 0xeb6   : > { %v4221_v1 = vpop.eup %4220  ;;  %v7384_v2 = vld [vmem:[#allocation7 + $0x518] sm:$0xff] }
 0xeb7   : > { %3066 = vmatprep.mubr.f32.mxu1 %v7326_v50  ;;  %v2922_v55 = vmul.f32 %v4221_v1, %v2920_v12  ;;  %8944 = vst [vmem:[#allocation24_spill] sm:$0xff] %v7384_v2  ;;  %v7387_v12 = vld [vmem:[#allocation7 + $0x510] sm:$0xff]  ;;  %v7390_v1 = vld [vmem:[#allocation7 + $0x4f8] sm:$0xff] }
 0xeb8   : > { %8945 = vst [vmem:[#allocation25_spill] sm:$0xff] %v7387_v12  ;;  %8946 = vst [vmem:[#allocation26_spill] sm:$0xff] %v7390_v1 }
 0xeb9   : > { %v7330_v10 = vadd.f32 %v2924_v62, %v2922_v55  ;;  %v7393_v55 = vld [vmem:[#allocation7 + $0x4f0] sm:$0xff]  ;;  %v7396_v62 = vld [vmem:[#allocation7 + $0x4d8] sm:$0xff] }
 0xeba   : > { %8947 = vst [vmem:[#allocation27_spill] sm:$0xff] %v7393_v55  ;;  %8948 = vst [vmem:[#allocation28_spill] sm:$0xff] %v7396_v62 }
 0xebb   : > { %3913 = vmatprep.subr.mxu0 %v7330_v10 }
 0xebc   : > { %3914 = vmatpush3.msra.mxu0 %v7330_v10 }
 0xebd   : > { %3915 = vmatprep.subr.mxu0 %v7326_v50 }
 0xebe   : > { %3916 = vmatpush3.msra.mxu0 %v7326_v50 }
 0xebf   : > { %3918 = vmatmul.mubr.msk.f32.vlgmr.msra.gmra.mxu0 %vm399_vm0, %v7337_v25  ;;  %3079 = vmatprep.subr.mxu0 %v7341_v35 }
 0xec0   : > { %3143 = vmatprep.mubr.f32.mxu0 %v7326_v50  ;;  %3080 = vmatpush1.msra.mxu0 %v7345_v15 }
 0xec1   : > { %3081 = vmatprep.subr.mxu0 %v7348_v58 }
 0xec2   : > { %3082 = vmatpush1.msra.mxu0 %v7351_v34 }
 0xec3   : > { %3083 = vmatprep.subr.mxu0 %v7354_v52 }
 0xec4   : > { %3084 = vmatpush1.msra.mxu0 %v7357_v49 }
 0xec5   : > { %3085 = vmatprep.subr.mxu0 %v7360_v24 }
 0xec6   : > { %3086 = vmatpush1.msra.mxu0 %v7363_v46 }
 0xec7   : > { %3087 = vmatprep.subr.mxu0 %v7366_v29 }
 0xec8   : > { %3088 = vmatpush1.msra.mxu0 %v7369_v20 }
 0xec9   : > { %3089 = vmatprep.subr.mxu0 %v7372_v16 }
 0xeca   : > { %3090 = vmatpush1.msra.mxu0 %v7375_v8 }
 0xecb   : > { %3091 = vmatprep.subr.mxu0 %v7378_v54 }
 0xecc   : > { %3092 = vmatpush1.msra.mxu0 %v7381_v51  ;;  %v7399_v51 = vld [vmem:[#allocation7 + $0x4d0] sm:$0xff] }
 0xecd   : > { %3093 = vmatprep.subr.mxu0 %v7384_v2  ;;  %8949 = vst [vmem:[#allocation31_spill] sm:$0xff] %v7399_v51  ;;  %v7402_v2 = vld [vmem:[#allocation7 + $0x4b8] sm:$0xff] }
 0xece   : > { %3094 = vmatpush1.msra.mxu0 %v7387_v12  ;;  %8950 = vst [vmem:[#allocation32_spill] sm:$0xff] %v7402_v2  ;;  %v7405_v12 = vld [vmem:[#allocation7 + $0x4b0] sm:$0xff] }
 0xecf   : > { %3095 = vmatprep.subr.mxu0 %v7390_v1  ;;  %8951 = vst [vmem:[#allocation33_spill] sm:$0xff] %v7405_v12  ;;  %v7408_v1 = vld [vmem:[#allocation7 + $0x498] sm:$0xff] }
 0xed0   : > { %3096 = vmatpush1.msra.mxu0 %v7393_v55  ;;  %8952 = vst [vmem:[#allocation34_spill] sm:$0xff] %v7408_v1  ;;  %v7411_v55 = vld [vmem:[#allocation7 + $0x490] sm:$0xff] }
 0xed1   : > { %3097 = vmatprep.subr.mxu0 %v7396_v62  ;;  %8953 = vst [vmem:[#allocation35_spill] sm:$0xff] %v7411_v55  ;;  %v7414_v62 = vld [vmem:[#allocation7 + $0x478] sm:$0xff] }
 0xed2   : > { %3098 = vmatpush1.msra.mxu0 %v7399_v51  ;;  %8954 = vst [vmem:[#allocation36_spill] sm:$0xff] %v7414_v62  ;;  %v7417_v51 = vld [vmem:[#allocation7 + $0x470] sm:$0xff] }
 0xed3   : > { %3099 = vmatprep.subr.mxu0 %v7402_v2  ;;  %8955 = vst [vmem:[#allocation37_spill] sm:$0xff] %v7417_v51  ;;  %v7420_v2 = vld [vmem:[#allocation7 + $0x458] sm:$0xff] }
 0xed4   : > { %3100 = vmatpush1.msra.mxu0 %v7405_v12  ;;  %8956 = vst [vmem:[#allocation88_spill] sm:$0xff] %v7420_v2  ;;  %v7423_v12 = vld [vmem:[#allocation7 + $0x450] sm:$0xff] }
 0xed5   : > { %3101 = vmatprep.subr.mxu0 %v7408_v1  ;;  %8957 = vst [vmem:[#allocation47_spill] sm:$0xff] %v7423_v12  ;;  %v7426_v1 = vld [vmem:[#allocation7 + $0x438] sm:$0xff] }
 0xed6   : > { %3102 = vmatpush1.msra.mxu0 %v7411_v55  ;;  %8958 = vst [vmem:[#allocation48_spill] sm:$0xff] %v7426_v1  ;;  %v7429_v55 = vld [vmem:[#allocation7 + $0x430] sm:$0xff] }
 0xed7   : > { %3103 = vmatprep.subr.mxu0 %v7414_v62  ;;  %8959 = vst [vmem:[#allocation49_spill] sm:$0xff] %v7429_v55  ;;  %v7432_v62 = vld [vmem:[#allocation7 + $0x418] sm:$0xff] }
 0xed8   : > { %3104 = vmatpush1.msra.mxu0 %v7417_v51  ;;  %8960 = vst [vmem:[#allocation50_spill] sm:$0xff] %v7432_v62  ;;  %v7435_v51 = vld [vmem:[#allocation7 + $0x410] sm:$0xff] }
 0xed9   : > { %3105 = vmatprep.subr.mxu0 %v7420_v2  ;;  %8961 = vst [vmem:[#allocation51_spill] sm:$0xff] %v7435_v51  ;;  %v7438_v2 = vld [vmem:[#allocation7 + $0x7f8] sm:$0xff] }
 0xeda   : > { %3106 = vmatpush1.msra.mxu0 %v7423_v12  ;;  %8962 = vst [vmem:[#allocation52_spill] sm:$0xff] %v7438_v2  ;;  %v7441_v12 = vld [vmem:[#allocation7 + $0x7f0] sm:$0xff] }
 0xedb   : > { %3107 = vmatprep.subr.mxu0 %v7426_v1  ;;  %8963 = vst [vmem:[#allocation53_spill] sm:$0xff] %v7441_v12  ;;  %v7444_v1 = vld [vmem:[#allocation7 + $0x7d8] sm:$0xff] }
 0xedc   : > { %3108 = vmatpush1.msra.mxu0 %v7429_v55  ;;  %8964 = vst [vmem:[#allocation54_spill] sm:$0xff] %v7444_v1  ;;  %v7447_v55 = vld [vmem:[#allocation7 + $0x7d0] sm:$0xff] }
 0xedd   : > { %3109 = vmatprep.subr.mxu0 %v7432_v62  ;;  %8965 = vst [vmem:[#allocation55_spill] sm:$0xff] %v7447_v55  ;;  %v7450_v62 = vld [vmem:[#allocation7 + $0x7b8] sm:$0xff] }
 0xede   : > { %3110 = vmatpush1.msra.mxu0 %v7435_v51  ;;  %8966 = vst [vmem:[#allocation108_spill] sm:$0xff] %v7450_v62  ;;  %v7453_v51 = vld [vmem:[#allocation7 + $0x7b0] sm:$0xff] }
 0xedf   : > { %3111 = vmatprep.subr.mxu0 %v7438_v2  ;;  %8967 = vst [vmem:[#allocation110_spill] sm:$0xff] %v7453_v51  ;;  %v7456_v2 = vld [vmem:[#allocation7 + $0x798] sm:$0xff] }
 0xee0   : > { %3112 = vmatpush2.msra.mxu0 %v7441_v12  ;;  %8968 = vst [vmem:[#allocation109_spill] sm:$0xff] %v7456_v2  ;;  %v7459_v12 = vld [vmem:[#allocation7 + $0x790] sm:$0xff] }
 0xee1   : > { %3113 = vmatprep.subr.mxu0 %v7444_v1  ;;  %8969 = vst [vmem:[#allocation111_spill] sm:$0xff] %v7459_v12  ;;  %v7462_v1 = vld [vmem:[#allocation7 + $0x778] sm:$0xff] }
 0xee2   : > { %3114 = vmatpush2.msra.mxu0 %v7447_v55  ;;  %8970 = vst [vmem:[#allocation112_spill] sm:$0xff] %v7462_v1  ;;  %v7465_v55 = vld [vmem:[#allocation7 + $0x770] sm:$0xff] }
 0xee3   : > { %3115 = vmatprep.subr.mxu0 %v7450_v62  ;;  %8971 = vst [vmem:[#allocation56_spill] sm:$0xff] %v7465_v55  ;;  %v7468_v62 = vld [vmem:[#allocation7 + $0x758] sm:$0xff] }
 0xee4   : > { %3116 = vmatpush2.msra.mxu0 %v7453_v51  ;;  %8972 = vst [vmem:[#allocation57_spill] sm:$0xff] %v7468_v62  ;;  %v7471_v51 = vld [vmem:[#allocation7 + $0x750] sm:$0xff] }
 0xee5   : > { %3117 = vmatprep.subr.mxu0 %v7456_v2  ;;  %8973 = vst [vmem:[#allocation58_spill] sm:$0xff] %v7471_v51  ;;  %v7474_v2 = vld [vmem:[#allocation7 + $0x738] sm:$0xff] }
 0xee6   : > { %3118 = vmatpush2.msra.mxu0 %v7459_v12  ;;  %8974 = vst [vmem:[#allocation59_spill] sm:$0xff] %v7474_v2  ;;  %v7477_v12 = vld [vmem:[#allocation7 + $0x730] sm:$0xff] }
 0xee7   : > { %3119 = vmatprep.subr.mxu0 %v7462_v1  ;;  %8975 = vst [vmem:[#allocation60_spill] sm:$0xff] %v7477_v12  ;;  %v7480_v1 = vld [vmem:[#allocation7 + $0x718] sm:$0xff] }
 0xee8   : > { %3120 = vmatpush2.msra.mxu0 %v7465_v55  ;;  %8976 = vst [vmem:[#allocation61_spill] sm:$0xff] %v7480_v1  ;;  %v7483_v55 = vld [vmem:[#allocation7 + $0x710] sm:$0xff] }
 0xee9   : > { %3121 = vmatprep.subr.mxu0 %v7468_v62  ;;  %8977 = vst [vmem:[#allocation62_spill] sm:$0xff] %v7483_v55  ;;  %v7486_v62 = vld [vmem:[#allocation7 + $0x6f8] sm:$0xff] }
 0xeea   : > { %3122 = vmatpush2.msra.mxu0 %v7471_v51  ;;  %8978 = vst [vmem:[#allocation63_spill] sm:$0xff] %v7486_v62  ;;  %v7489_v51 = vld [vmem:[#allocation7 + $0x6f0] sm:$0xff] }
 0xeeb   : > { %3123 = vmatprep.subr.mxu0 %v7474_v2  ;;  %8979 = vst [vmem:[#allocation64_spill] sm:$0xff] %v7489_v51  ;;  %v7492_v2 = vld [vmem:[#allocation7 + $0x6d8] sm:$0xff] }
 0xeec   : > { %3124 = vmatpush2.msra.mxu0 %v7477_v12  ;;  %8980 = vst [vmem:[#allocation66_spill] sm:$0xff] %v7492_v2  ;;  %v7495_v12 = vld [vmem:[#allocation7 + $0x6d0] sm:$0xff] }
 0xeed   : > { %3125 = vmatprep.subr.mxu0 %v7480_v1  ;;  %8981 = vst [vmem:[#allocation67_spill] sm:$0xff] %v7495_v12  ;;  %v7498_v1 = vld [vmem:[#allocation7 + $0x6b8] sm:$0xff] }
 0xeee   : > { %3126 = vmatpush2.msra.mxu0 %v7483_v55  ;;  %8982 = vst [vmem:[#allocation68_spill] sm:$0xff] %v7498_v1  ;;  %v7501_v55 = vld [vmem:[#allocation7 + $0x6b0] sm:$0xff] }
 0xeef   : > { %3127 = vmatprep.subr.mxu0 %v7486_v62  ;;  %8983 = vst [vmem:[#allocation69_spill] sm:$0xff] %v7501_v55  ;;  %v7504_v62 = vld [vmem:[#allocation7 + $0x698] sm:$0xff] }
 0xef0   : > { %3128 = vmatpush2.msra.mxu0 %v7489_v51  ;;  %8984 = vst [vmem:[#allocation76_spill] sm:$0xff] %v7504_v62  ;;  %v7507_v51 = vld [vmem:[#allocation7 + $0x690] sm:$0xff] }
 0xef1   : > { %3129 = vmatprep.subr.mxu0 %v7492_v2  ;;  %8985 = vst [vmem:[#allocation78_spill] sm:$0xff] %v7507_v51  ;;  %v7510_v2 = vld [vmem:[#allocation7 + $0x678] sm:$0xff] }
 0xef2   : > { %3130 = vmatpush2.msra.mxu0 %v7495_v12  ;;  %8986 = vst [vmem:[#allocation80_spill] sm:$0xff] %v7510_v2  ;;  %v7513_v12 = vld [vmem:[#allocation7 + $0x670] sm:$0xff] }
 0xef3   : > { %3131 = vmatprep.subr.mxu0 %v7498_v1  ;;  %8987 = vst [vmem:[#allocation86_spill] sm:$0xff] %v7513_v12  ;;  %v7516_v1 = vld [vmem:[#allocation7 + $0x658] sm:$0xff] }
 0xef4   : > { %3132 = vmatpush2.msra.mxu0 %v7501_v55  ;;  %8988 = vst [vmem:[#allocation96_spill] sm:$0xff] %v7516_v1  ;;  %v7519_v55 = vld [vmem:[#allocation7 + $0x650] sm:$0xff] }
 0xef5   : > { %3133 = vmatprep.subr.mxu0 %v7504_v62  ;;  %8989 = vst [vmem:[#allocation20_spill] sm:$0xff] %v7519_v55  ;;  %v7522_v62 = vld [vmem:[#allocation7 + $0x638] sm:$0xff] }
 0xef6   : > { %3134 = vmatpush2.msra.mxu0 %v7507_v51  ;;  %v7525_v51 = vld [vmem:[#allocation7 + $0x630] sm:$0xff] }
 0xef7   : > { %3135 = vmatprep.subr.mxu0 %v7510_v2  ;;  %v7528_v2 = vld [vmem:[#allocation7 + $0x618] sm:$0xff] }
 0xef8   : > { %3136 = vmatpush2.msra.mxu0 %v7513_v12  ;;  %v7531_v12 = vld [vmem:[#allocation7 + $0x610] sm:$0xff] }
 0xef9   : > { %3137 = vmatprep.subr.mxu0 %v7516_v1 }
 0xefa   : > { %3138 = vmatpush2.msra.mxu0 %v7519_v55 }
 0xefb   : > { %3139 = vmatprep.subr.mxu0 %v7522_v62 }
 0xefc   : > { %3140 = vmatpush2.msra.mxu0 %v7525_v51 }
 0xefd   : > { %3141 = vmatprep.subr.mxu0 %v7528_v2 }
 0xefe   : > { %3142 = vmatpush2.msra.mxu0 %v7531_v12 }
 0xeff   : > { %3269 = vmatprep.subr.mxu0 %v8893_v0  ;;  %v8996_v0 = vld [vmem:[#allocation39_spill] sm:$0xff] }
 0xf7f   : > { %v3919_v1 = vpop.f32.mrf.mxu0 }
 0xf81   : > { %v2993_v55 = vpop.f32.mrf.mxu0 }
 0xf82   : > { %3067 = vmatmul.mubr.f32.vlgmr.msra.gmra.mxu1 %v2993_v55  ;;  %3144 = vmatmul.mubr.f32.vlgmr.msra.gmra.mxu0 %v2993_v55 }
 0xf83   : > { %3072 = vmatprep.mubr.f32.mxu1 %v7330_v10  ;;  %3149 = vmatprep.mubr.f32.mxu0 %v7330_v10 }
 0xf84   : > { %3270 = vmatpush1.msra.mxu0 %v8894_v57  ;;  %v8997_v57 = vld [vmem:[#allocation40_spill] sm:$0xff] }
 0xf85   : > { %3271 = vmatprep.subr.mxu0 %v8895_v60  ;;  %v8998_v60 = vld [vmem:[#allocation41_spill] sm:$0xff] }
 0xf86   : > { %3073 = vmatmul.mubr.f32.gmra.mxu1 %v3919_v1  ;;  %3150 = vmatmul.mubr.f32.gmra.mxu0 %v3919_v1 }
 0xf87   : > { %3924 = vmatprep.mubr.msk.f32.mxu1 %vm399_vm0, %v8896_v26  ;;  %3272 = vmatpush1.msra.mxu0 %v8897_v5  ;;  %v8999_v26 = vld [vmem:[#allocation42_spill] sm:$0xff]  ;;  %v9000_v5 = vld [vmem:[#allocation43_spill] sm:$0xff] }
 0xf88   : > { %3273 = vmatprep.subr.mxu0 %v8898_v28  ;;  %v9001_v28 = vld [vmem:[#allocation44_spill] sm:$0xff] }
 0xf89   : > { %3274 = vmatpush1.msra.mxu0 %v8899_v18  ;;  %v9002_v18 = vld [vmem:[#allocation45_spill] sm:$0xff] }
 0xf8a   : > { %3275 = vmatprep.subr.mxu0 %v8900_v43  ;;  %v9003_v43 = vld [vmem:[#allocation46_spill] sm:$0xff] }
 0xf8b   : > { %3276 = vmatpush1.msra.mxu0 %v8901_v19  ;;  %v9004_v19 = vld [vmem:[#allocation65_spill] sm:$0xff] }
 0xf8c   : > { %3277 = vmatprep.subr.mxu0 %v8902_v13  ;;  %v9005_v13 = vld [vmem:[#allocation70_spill] sm:$0xff] }
 0xf8d   : > { %3278 = vmatpush1.msra.mxu0 %v8903_v11  ;;  %v9006_v11 = vld [vmem:[#allocation72_spill] sm:$0xff] }
 0xf8e   : > { %3279 = vmatprep.subr.mxu0 %v8904_v9  ;;  %v9007_v9 = vld [vmem:[#allocation74_spill] sm:$0xff] }
 0xf8f   : > { %3280 = vmatpush1.msra.mxu0 %v8905_v17  ;;  %v9008_v17 = vld [vmem:[#allocation82_spill] sm:$0xff] }
 0xf90   : > { %3281 = vmatprep.subr.mxu0 %v8906_v59  ;;  %v9009_v59 = vld [vmem:[#allocation84_spill] sm:$0xff] }
 0xf91   : > { %3282 = vmatpush1.msra.mxu0 %v8907_v23  ;;  %v9010_v23 = vld [vmem:[#allocation90_spill] sm:$0xff] }
 0xf92   : > { %3283 = vmatprep.subr.mxu0 %v8908_v14  ;;  %v9011_v14 = vld [vmem:[#allocation30_spill] sm:$0xff] }
 0xf93   : > { %3284 = vmatpush1.msra.mxu0 %v8909_v6  ;;  %v9012_v6 = vld [vmem:[#allocation22_spill] sm:$0xff] }
 0xf94   : > { %3285 = vmatprep.subr.mxu0 %v8910_v22  ;;  %v4529_v22 = vld [vmem:[#allocation7 + $0x620] sm:$0xff] }
 0xf95   : > { %3286 = vmatpush1.msra.mxu0 %v8911_v30  ;;  %v4530_v30 = vld [vmem:[#allocation7 + $0x608] sm:$0xff] }
 0xf96   : > { %3287 = vmatprep.subr.mxu0 %v8912_v38  ;;  %v4531_v38 = vld [vmem:[#allocation7 + $0x600] sm:$0xff] }
 0xf97   : > { %3288 = vmatpush1.msra.mxu0 %v7034_v61  ;;  %v8995_v61 = vld [vmem:[#allocation38_spill] sm:$0xff] }
 0xf98   : > { %3289 = vmatprep.subr.mxu0 %v7037_v48  ;;  %v8991_v48 = vld [vmem:[#allocation100_spill] sm:$0xff] }
 0xf99   : > { %3290 = vmatpush1.msra.mxu0 %v7040_v4  ;;  %v8994_v4 = vld [vmem:[#allocation104_spill] sm:$0xff] }
 0xf9a   : > { %3291 = vmatprep.subr.mxu0 %v7043_v7  ;;  %v8993_v7 = vld [vmem:[#allocation106_spill] sm:$0xff] }
 0xf9b   : > { %3292 = vmatpush1.msra.mxu0 %v7046_v56  ;;  %v8992_v56 = vld [vmem:[#allocation21_spill] sm:$0xff] }
 0xf9c   : > { %3293 = vmatprep.subr.mxu0 %v7049_v47  ;;  %v8990_v47 = vld [vmem:[#allocation101_spill] sm:$0xff] }
 0xf9d   : > { %3294 = vmatpush1.msra.mxu0 %v7206_v39 }
 0xf9e   : > { %3295 = vmatprep.subr.mxu0 %v7209_v40  ;;  %v9013_v40 = vld [vmem:[#allocation116_spill] sm:$0xff] }
 0xf9f   : > { %3296 = vmatpush1.msra.mxu0 %v7212_v44 }
 0xfa0   : > { %3297 = vmatprep.subr.mxu0 %v7215_v42 }
 0xfa1   : > { %3298 = vmatpush1.msra.mxu0 %v7218_v45 }
 0xfa2   : > { %3299 = vmatprep.subr.mxu0 %v7221_v33 }
 0xfa3   : > { %3300 = vmatpush1.msra.mxu0 %v7224_v41  ;;  %v9014_v41 = vld [vmem:[#allocation71_spill] sm:$0xff] }
 0xfa4   : > { %3301 = vmatprep.subr.mxu0 %v7227_v36 }
 0xfa5   : > { %3302 = vmatpush2.msra.mxu0 %v7230_v37  ;;  %v9015_v37 = vld [vmem:[#allocation102_spill] sm:$0xff] }
 0xfa6   : > { %3303 = vmatprep.subr.mxu0 %v7233_v53 }
 0xfa7   : > { %3304 = vmatpush2.msra.mxu0 %v7236_v31 }
 0xfa8   : > { %3305 = vmatprep.subr.mxu0 %v7239_v32 }
 0xfa9   : > { %3306 = vmatpush2.msra.mxu0 %v7242_v63  ;;  %v9016_v63 = vld [vmem:[#allocation105_spill] sm:$0xff] }
 0xfaa   : > { %3307 = vmatprep.subr.mxu0 %v8990_v47 }
 0xfab   : > { %3308 = vmatpush2.msra.mxu0 %v8991_v48 }
 0xfac   : > { %3309 = vmatprep.subr.mxu0 %v8992_v56 }
 0xfad   : > { %3310 = vmatpush2.msra.mxu0 %v8993_v7 }
 0xfae   : > { %3311 = vmatprep.subr.mxu0 %v8994_v4 }
 0xfaf   : > { %3312 = vmatpush2.msra.mxu0 %v8995_v61 }
 0xfb0   : > { %3313 = vmatprep.subr.mxu0 %v8996_v0 }
 0xfb1   : > { %3314 = vmatpush2.msra.mxu0 %v8997_v57 }
 0xfb2   : > { %3315 = vmatprep.subr.mxu0 %v8998_v60 }
 0xfb3   : > { %3316 = vmatpush2.msra.mxu0 %v8999_v26 }
 0xfb4   : > { %3317 = vmatprep.subr.mxu0 %v9000_v5 }
 0xfb5   : > { %3318 = vmatpush2.msra.mxu0 %v9001_v28  ;;  %v9017_v28 = vld [vmem:[#allocation103_spill] sm:$0xff] }
 0xfb6   : > { %3319 = vmatprep.subr.mxu0 %v9002_v18 }
 0xfb7   : > { %3320 = vmatpush2.msra.mxu0 %v9003_v43 }
 0xfb8   : > { %3321 = vmatprep.subr.mxu0 %v9004_v19 }
 0xfb9   : > { %3322 = vmatpush2.msra.mxu0 %v9005_v13 }
 0xfba   : > { %3323 = vmatprep.subr.mxu0 %v9006_v11 }
 0xfbb   : > { %3324 = vmatpush2.msra.mxu0 %v9007_v9 }
 0xfbc   : > { %3325 = vmatprep.subr.mxu0 %v9008_v17 }
 0xfbd   : > { %3326 = vmatpush2.msra.mxu0 %v9009_v59 }
 0xfbe   : > { %3327 = vmatprep.subr.mxu0 %v9010_v23 }
 0xfbf   : > { %3328 = vmatpush2.msra.mxu0 %v9011_v14 }
 0xfc0   : > { %3329 = vmatprep.subr.mxu0 %v9012_v6 }
 0xfc1   : > { %3330 = vmatpush2.msra.mxu0 %v4529_v22 }
 0xfc2   : > { %3331 = vmatprep.subr.mxu0 %v4530_v30 }
 0xfc3   : > { %3332 = vmatpush2.msra.mxu0 %v4531_v38 }
0x1042   : > { %v3068_v39 = vpop.f32.mrf.mxu1  ;;  %v3145_v4 = vpop.f32.mrf.mxu0 }
0x1043   : > { %v3069_v44 = vadd.f32 %v3068_v39, %v9013_v40  ;;  %v3146_v11 = vadd.f32 %v3145_v4, %v8767_v21  ;;  %v9039_v4 = vld [vmem:[#allocation54_spill] sm:$0xff] }
0x1044   : > { %v3070_v42 = vpop.f32.mrf.mxu1  ;;  %v3147_v0 = vpop.f32.mrf.mxu0 }
0x1045   : > { %v3780_v45 = vmul.f32 -1.442695, %v3069_v44  ;;  %v3071_v53 = vadd.f32 %v3070_v42, %v9015_v37  ;;  %v3148_v18 = vadd.f32 %v3147_v0, %v9017_v28  ;;  %v9041_v0 = vld [vmem:[#allocation108_spill] sm:$0xff] }
0x1046   : > { %v3074_v33 = vpop.f32.mrf.mxu1  ;;  %v3151_v60 = vpop.f32.mrf.mxu0 }
0x1047   : > { %4222 = vpow2.f32 %v3780_v45  ;;  %v3075_v36 = vadd.f32 %v3074_v33, %v9014_v41  ;;  %v3782_v55 = vmul.f32 -1.442695, %v3071_v53  ;;  %v3152_v14 = vadd.f32 %v3151_v60, %v8769_v3  ;;  %v9043_v60 = vld [vmem:[#allocation109_spill] sm:$0xff] }
0x1048   : > { %v3076_v32 = vpop.f32.mrf.mxu1  ;;  %v3153_v13 = vpop.f32.mrf.mxu0 }
0x1049   : > { %v3781_v31 = vmul.f32 -1.442695, %v3075_v36  ;;  %v3077_v1 = vadd.f32 %v3076_v32, %v9016_v63  ;;  %v3154_v59 = vadd.f32 %v3153_v13, %v8768_v27  ;;  %v9049_v13 = vld [vmem:[#allocation59_spill] sm:$0xff] }
0x104b   : > { %4224 = vpow2.f32 %v3781_v31  ;;  %v3783_v47 = vmul.f32 -1.442695, %v3077_v1 }
0x104c   : > { %4226 = vpow2.f32 %v3782_v55  ;;  %v9034_v55 = vld [vmem:[#allocation49_spill] sm:$0xff] }
0x104d   : > { %4228 = vpow2.f32 %v3783_v47  ;;  %v9035_v47 = vld [vmem:[#allocation50_spill] sm:$0xff] }
0x1054   : > { %v4223_v48 = vpop.eup %4222 }
0x1055   : > { %v3162_v56 = vadd.f32 1.0, %v4223_v48  ;;  %v9036_v48 = vld [vmem:[#allocation51_spill] sm:$0xff] }
0x1057   : > { %4230 = vrcp.f32 %v3162_v56  ;;  %v9037_v56 = vld [vmem:[#allocation52_spill] sm:$0xff] }
0x1058   : > { %v4225_v7 = vpop.eup %4224 }
0x1059   : > { %v3163_v61 = vadd.f32 1.0, %v4225_v7  ;;  %v4227_v57 = vpop.eup %4226  ;;  %v9038_v7 = vld [vmem:[#allocation53_spill] sm:$0xff] }
0x105a   : > { %v4229_v26 = vpop.eup %4228  ;;  %v3174_v5 = vadd.f32 1.0, %v4227_v57  ;;  %v9042_v57 = vld [vmem:[#allocation110_spill] sm:$0xff] }
0x105b   : > { %4232 = vrcp.f32 %v3163_v61  ;;  %v3175_v19 = vadd.f32 1.0, %v4229_v26  ;;  %v9040_v61 = vld [vmem:[#allocation55_spill] sm:$0xff] }
0x105c   : > { %4234 = vrcp.f32 %v3174_v5  ;;  %v9044_v26 = vld [vmem:[#allocation111_spill] sm:$0xff]  ;;  %v9045_v5 = vld [vmem:[#allocation112_spill] sm:$0xff] }
0x105d   : > { %4236 = vrcp.f32 %v3175_v19  ;;  %v9048_v19 = vld [vmem:[#allocation58_spill] sm:$0xff] }
0x1064   : > { %v4231_v43 = vpop.eup %4230 }
0x1065   : > { %v3180_v9 = vmul.f32 %v4231_v43, %v3148_v18  ;;  %v9046_v18 = vld [vmem:[#allocation56_spill] sm:$0xff]  ;;  %v9047_v43 = vld [vmem:[#allocation57_spill] sm:$0xff] }
0x1067   : > { %v3182_v17 = vadd.f32 %v3180_v9, %v3146_v11  ;;  %v9050_v11 = vld [vmem:[#allocation60_spill] sm:$0xff]  ;;  %v9051_v9 = vld [vmem:[#allocation61_spill] sm:$0xff] }
0x1068   : > { %v4233_v23 = vpop.eup %4232 }
0x1069   : > { %4238 = vtanh.f32 %v3182_v17  ;;  %v3181_v6 = vmul.f32 %v4233_v23, %v3154_v59  ;;  %v4235_v30 = vpop.eup %4234  ;;  %v9052_v17 = vld [vmem:[#allocation62_spill] sm:$0xff]  ;;  %v9053_v59 = vld [vmem:[#allocation63_spill] sm:$0xff]  ;;  %v9054_v23 = vld [vmem:[#allocation64_spill] sm:$0xff] }
0x106a   : > { %v4237_v38 = vpop.eup %4236  ;;  %v3186_v39 = vsub.f32 1.0, %v4235_v30  ;;  %v3190_v45 = vmul.f32 %v4235_v30, %v7326_v50  ;;  %v9018_v50 = vld [vmem:[#allocation23_spill] sm:$0xff]  ;;  %v9058_v30 = vld [vmem:[#allocation69_spill] sm:$0xff] }
0x106b   : > { %v3183_v22 = vadd.f32 %v3181_v6, %v3152_v14  ;;  %v3187_v36 = vsub.f32 1.0, %v4237_v38  ;;  %v3191_v32 = vmul.f32 %v4237_v38, %v7330_v10  ;;  %v9019_v10 = vld [vmem:[#allocation24_spill] sm:$0xff]  ;;  %v9055_v14 = vld [vmem:[#allocation66_spill] sm:$0xff]  ;;  %v9056_v6 = vld [vmem:[#allocation67_spill] sm:$0xff] }
0x106c   : > { %v9059_v38 = vld [vmem:[#allocation76_spill] sm:$0xff] }
0x106d   : > { %4240 = vtanh.f32 %v3183_v22  ;;  %v9057_v22 = vld [vmem:[#allocation68_spill] sm:$0xff] }
0x1076   : > { %v4239_v44 = vpop.eup %4238 }
0x1077   : > { %v3188_v42 = vmul.f32 %v4239_v44, %v3186_v39  ;;  %v9060_v39 = vld [vmem:[#allocation78_spill] sm:$0xff]  ;;  %v9061_v44 = vld [vmem:[#allocation80_spill] sm:$0xff] }
0x1079   : > { %v7608_v33 = vadd.f32 %v3190_v45, %v3188_v42  ;;  %v9062_v42 = vld [vmem:[#allocation86_spill] sm:$0xff]  ;;  %v9063_v45 = vld [vmem:[#allocation96_spill] sm:$0xff] }
0x107a   : > { %v4241_v53 = vpop.eup %4240 }
0x107b   : > { %3333 = vmatprep.mubr.f32.mxu0 %v7608_v33  ;;  %v3189_v31 = vmul.f32 %v4241_v53, %v3187_v36  ;;  %v9064_v36 = vld [vmem:[#allocation20_spill] sm:$0xff] }
0x107d   : > { %v7612_v1 = vadd.f32 %v3191_v32, %v3189_v31  ;;  %v3476_v32 = vld [vmem:[#allocation11 + $0x78] sm:$0xff] }
0x107e   : > { %3927 = vmatprep.subr.mxu0 %v3476_v32 }
0x107f   : > { %3920 = vmatprep.subr.mxu1 %v7612_v1 }
0x1080   : > { %3921 = vmatpush3.msra.mxu1 %v7612_v1 }
0x1081   : > { %3922 = vmatprep.subr.mxu1 %v7608_v33 }
0x1082   : > { %3923 = vmatpush3.msra.mxu1 %v7608_v33 }
0x1083   : > { %3925 = vmatmul.mubr.msk.f32.vlgmr.msra.gmra.mxu1 %vm399_vm0, %v7337_v25  ;;  %3346 = vmatprep.subr.mxu1 %v7341_v35  ;;  %v9020_v25 = vld [vmem:[#allocation25_spill] sm:$0xff]  ;;  %v9021_v35 = vld [vmem:[#allocation26_spill] sm:$0xff] }
0x1084   : > { %3410 = vmatprep.mubr.f32.mxu1 %v7608_v33  ;;  %3347 = vmatpush1.msra.mxu1 %v7345_v15  ;;  %v9022_v15 = vld [vmem:[#allocation27_spill] sm:$0xff] }
0x1085   : > { %3348 = vmatprep.subr.mxu1 %v7348_v58  ;;  %v9023_v58 = vld [vmem:[#allocation28_spill] sm:$0xff] }
0x1086   : > { %3349 = vmatpush1.msra.mxu1 %v7351_v34  ;;  %v9024_v34 = vld [vmem:[#allocation31_spill] sm:$0xff] }
0x1087   : > { %3350 = vmatprep.subr.mxu1 %v7354_v52  ;;  %v9025_v52 = vld [vmem:[#allocation32_spill] sm:$0xff] }
0x1088   : > { %3351 = vmatpush1.msra.mxu1 %v7357_v49  ;;  %v9026_v49 = vld [vmem:[#allocation33_spill] sm:$0xff] }
0x1089   : > { %3352 = vmatprep.subr.mxu1 %v7360_v24  ;;  %v9027_v24 = vld [vmem:[#allocation34_spill] sm:$0xff] }
0x108a   : > { %3353 = vmatpush1.msra.mxu1 %v7363_v46  ;;  %v9028_v46 = vld [vmem:[#allocation35_spill] sm:$0xff] }
0x108b   : > { %3354 = vmatprep.subr.mxu1 %v7366_v29  ;;  %v9029_v29 = vld [vmem:[#allocation36_spill] sm:$0xff] }
0x108c   : > { %3355 = vmatpush1.msra.mxu1 %v7369_v20  ;;  %v9030_v20 = vld [vmem:[#allocation37_spill] sm:$0xff] }
0x108d   : > { %3356 = vmatprep.subr.mxu1 %v7372_v16  ;;  %v9031_v16 = vld [vmem:[#allocation88_spill] sm:$0xff] }
0x108e   : > { %3357 = vmatpush1.msra.mxu1 %v7375_v8  ;;  %v9032_v8 = vld [vmem:[#allocation47_spill] sm:$0xff] }
0x108f   : > { %3358 = vmatprep.subr.mxu1 %v7378_v54  ;;  %v9033_v54 = vld [vmem:[#allocation48_spill] sm:$0xff] }
0x1090   : > { %3359 = vmatpush1.msra.mxu1 %v9018_v50  ;;  %v3471_v50 = vld [vmem:[#allocation11 + $0x50] sm:$0xff] }
0x1091   : > { %3360 = vmatprep.subr.mxu1 %v9019_v10  ;;  %v3470_v10 = vld [vmem:[#allocation11 + $0x48] sm:$0xff] }
0x1092   : > { %3361 = vmatpush1.msra.mxu1 %v9020_v25  ;;  %v3469_v25 = vld [vmem:[#allocation11 + $0x40] sm:$0xff] }
0x1093   : > { %3362 = vmatprep.subr.mxu1 %v9021_v35  ;;  %v3468_v35 = vld [vmem:[#allocation11 + $0x38] sm:$0xff] }
0x1094   : > { %3363 = vmatpush1.msra.mxu1 %v9022_v15  ;;  %v3467_v15 = vld [vmem:[#allocation11 + $0x30] sm:$0xff] }
0x1095   : > { %3364 = vmatprep.subr.mxu1 %v9023_v58  ;;  %v3466_v58 = vld [vmem:[#allocation11 + $0x28] sm:$0xff] }
0x1096   : > { %3365 = vmatpush1.msra.mxu1 %v9024_v34  ;;  %v3465_v34 = vld [vmem:[#allocation11 + $0x20] sm:$0xff] }
0x1097   : > { %3366 = vmatprep.subr.mxu1 %v9025_v52  ;;  %v3464_v52 = vld [vmem:[#allocation11 + $0x18] sm:$0xff] }
0x1098   : > { %3367 = vmatpush1.msra.mxu1 %v9026_v49  ;;  %v3463_v49 = vld [vmem:[#allocation11 + $0x10] sm:$0xff] }
0x1099   : > { %3368 = vmatprep.subr.mxu1 %v9027_v24  ;;  %v3462_v24 = vld [vmem:[#allocation11 + $0x8] sm:$0xff] }
0x109a   : > { %3369 = vmatpush1.msra.mxu1 %v9028_v46  ;;  %v3461_v46 = vld [vmem:[#allocation11] sm:$0xff] }
0x109b   : > { %3370 = vmatprep.subr.mxu1 %v9029_v29 }
0x109c   : > { %3371 = vmatpush1.msra.mxu1 %v9030_v20 }
0x109d   : > { %3372 = vmatprep.subr.mxu1 %v9031_v16 }
0x109e   : > { %3373 = vmatpush1.msra.mxu1 %v9032_v8 }
0x109f   : > { %3374 = vmatprep.subr.mxu1 %v9033_v54 }
0x10a0   : > { %3375 = vmatpush1.msra.mxu1 %v9034_v55 }
0x10a1   : > { %3376 = vmatprep.subr.mxu1 %v9035_v47 }
0x10a2   : > { %3377 = vmatpush1.msra.mxu1 %v9036_v48 }
0x10a3   : > { %3378 = vmatprep.subr.mxu1 %v9037_v56 }
0x10a4   : > { %3379 = vmatpush2.msra.mxu1 %v9038_v7 }
0x10a5   : > { %3380 = vmatprep.subr.mxu1 %v9039_v4 }
0x10a6   : > { %3381 = vmatpush2.msra.mxu1 %v9040_v61 }
0x10a7   : > { %3382 = vmatprep.subr.mxu1 %v9041_v0 }
0x10a8   : > { %3383 = vmatpush2.msra.mxu1 %v9042_v57 }
0x10a9   : > { %3384 = vmatprep.subr.mxu1 %v9043_v60 }
0x10aa   : > { %3385 = vmatpush2.msra.mxu1 %v9044_v26 }
0x10ab   : > { %3386 = vmatprep.subr.mxu1 %v9045_v5 }
0x10ac   : > { %3387 = vmatpush2.msra.mxu1 %v9046_v18 }
0x10ad   : > { %3388 = vmatprep.subr.mxu1 %v9047_v43 }
0x10ae   : > { %3389 = vmatpush2.msra.mxu1 %v9048_v19 }
0x10af   : > { %3390 = vmatprep.subr.mxu1 %v9049_v13 }
0x10b0   : > { %3391 = vmatpush2.msra.mxu1 %v9050_v11 }
0x10b1   : > { %3392 = vmatprep.subr.mxu1 %v9051_v9 }
0x10b2   : > { %3393 = vmatpush2.msra.mxu1 %v9052_v17 }
0x10b3   : > { %3394 = vmatprep.subr.mxu1 %v9053_v59 }
0x10b4   : > { %3395 = vmatpush2.msra.mxu1 %v9054_v23 }
0x10b5   : > { %3396 = vmatprep.subr.mxu1 %v9055_v14 }
0x10b6   : > { %3397 = vmatpush2.msra.mxu1 %v9056_v6 }
0x10b7   : > { %3398 = vmatprep.subr.mxu1 %v9057_v22 }
0x10b8   : > { %3399 = vmatpush2.msra.mxu1 %v9058_v30 }
0x10b9   : > { %3400 = vmatprep.subr.mxu1 %v9059_v38 }
0x10ba   : > { %3401 = vmatpush2.msra.mxu1 %v9060_v39 }
0x10bb   : > { %3402 = vmatprep.subr.mxu1 %v9061_v44 }
0x10bc   : > { %3403 = vmatpush2.msra.mxu1 %v9062_v42 }
0x10bd   : > { %3404 = vmatprep.subr.mxu1 %v9063_v45 }
0x10be   : > { %3405 = vmatpush2.msra.mxu1 %v9064_v36 }
0x10bf   : > { %3406 = vmatprep.subr.mxu1 %v7522_v62  ;;  %v3475_v62 = vld [vmem:[#allocation11 + $0x70] sm:$0xff] }
0x10c0   : > { %3407 = vmatpush2.msra.mxu1 %v7525_v51  ;;  %v3474_v51 = vld [vmem:[#allocation11 + $0x68] sm:$0xff] }
0x10c1   : > { %3408 = vmatprep.subr.mxu1 %v7528_v2  ;;  %v3473_v2 = vld [vmem:[#allocation11 + $0x60] sm:$0xff] }
0x10c2   : > { %3409 = vmatpush2.msra.mxu1 %v7531_v12  ;;  %v3472_v12 = vld [vmem:[#allocation11 + $0x58] sm:$0xff] }
0x1143   : > { %v3926_v53 = vpop.f32.mrf.mxu1 }
0x1145   : > { %v3260_v31 = vpop.f32.mrf.mxu1 }
0x1146   : > { %3334 = vmatmul.mubr.f32.vlgmr.msra.gmra.mxu0 %v3260_v31  ;;  %3411 = vmatmul.mubr.f32.vlgmr.msra.gmra.mxu1 %v3260_v31 }
0x1147   : > { %3339 = vmatprep.mubr.f32.mxu0 %v7612_v1  ;;  %3416 = vmatprep.mubr.f32.mxu1 %v7612_v1 }
0x1148   : > { %3928 = vmatpush3.msra.mxu0 %v3476_v32  ;;  %v3790_v32 = vld [vmem:[%s7755_s6] ss:$0 sm:$0xff] }
0x1149   : > { %3929 = vmatprep.subr.mxu0 %v3475_v62 }
0x114a   : > { %3340 = vmatmul.mubr.f32.gmra.mxu0 %v3926_v53  ;;  %3417 = vmatmul.mubr.f32.gmra.mxu1 %v3926_v53 }
0x114b   : > { %3930 = vmatpush3.msra.mxu0 %v3475_v62 }
0x114c   : > { %3931 = vmatprep.subr.mxu0 %v3474_v51 }
0x114d   : > { %3932 = vmatpush3.msra.mxu0 %v3474_v51 }
0x114e   : > { %3933 = vmatprep.subr.mxu0 %v3473_v2 }
0x114f   : > { %3934 = vmatpush3.msra.mxu0 %v3473_v2 }
0x1150   : > { %3935 = vmatprep.subr.mxu0 %v3472_v12 }
0x1151   : > { %3936 = vmatpush3.msra.mxu0 %v3472_v12 }
0x1152   : > { %3937 = vmatprep.subr.mxu0 %v3471_v50 }
0x1153   : > { %3938 = vmatpush3.msra.mxu0 %v3471_v50 }
0x1154   : > { %3939 = vmatprep.subr.mxu0 %v3470_v10 }
0x1155   : > { %3940 = vmatpush3.msra.mxu0 %v3470_v10 }
0x1156   : > { %3941 = vmatprep.subr.mxu0 %v3469_v25 }
0x1157   : > { %3942 = vmatpush3.msra.mxu0 %v3469_v25 }
0x1158   : > { %3943 = vmatprep.subr.mxu0 %v3468_v35 }
0x1159   : > { %3944 = vmatpush3.msra.mxu0 %v3468_v35 }
0x115a   : > { %3945 = vmatprep.subr.mxu0 %v3467_v15 }
0x115b   : > { %3946 = vmatpush3.msra.mxu0 %v3467_v15 }
0x115c   : > { %3947 = vmatprep.subr.mxu0 %v3466_v58 }
0x115d   : > { %3948 = vmatpush3.msra.mxu0 %v3466_v58 }
0x115e   : > { %3949 = vmatprep.subr.mxu0 %v3465_v34 }
0x115f   : > { %3950 = vmatpush3.msra.mxu0 %v3465_v34 }
0x1160   : > { %3951 = vmatprep.subr.mxu0 %v3464_v52 }
0x1161   : > { %3952 = vmatpush3.msra.mxu0 %v3464_v52 }
0x1162   : > { %3953 = vmatprep.subr.mxu0 %v3463_v49 }
0x1163   : > { %3954 = vmatpush3.msra.mxu0 %v3463_v49 }
0x1164   : > { %3955 = vmatprep.subr.mxu0 %v3462_v24 }
0x1165   : > { %3956 = vmatpush3.msra.mxu0 %v3462_v24 }
0x1166   : > { %3957 = vmatprep.subr.mxu0 %v3461_v46 }
0x1167   : > { %3958 = vmatpush3.msra.mxu0 %v3461_v46 }
0x1206   : > { %v3335_v29 = vpop.f32.mrf.mxu0  ;;  %v3412_v60 = vpop.f32.mrf.mxu1 }
0x1207   : > { %v3336_v20 = vadd.f32 %v3335_v29, %v9013_v40  ;;  %v3413_v9 = vadd.f32 %v3412_v60, %v8767_v21 }
0x1208   : > { %v3337_v16 = vpop.f32.mrf.mxu0  ;;  %v3414_v5 = vpop.f32.mrf.mxu1 }
0x1209   : > { %v3786_v8 = vmul.f32 -1.442695, %v3336_v20  ;;  %v3338_v47 = vadd.f32 %v3337_v16, %v9015_v37  ;;  %v3415_v19 = vadd.f32 %v3414_v5, %v9017_v28 }
0x120a   : > { %v3341_v54 = vpop.f32.mrf.mxu0  ;;  %v3418_v18 = vpop.f32.mrf.mxu1 }
0x120b   : > { %4242 = vpow2.f32 %v3786_v8  ;;  %v3342_v55 = vadd.f32 %v3341_v54, %v9014_v41  ;;  %v3788_v4 = vmul.f32 -1.442695, %v3338_v47  ;;  %v3419_v6 = vadd.f32 %v3418_v18, %v8769_v3 }
0x120c   : > { %v3343_v56 = vpop.f32.mrf.mxu0  ;;  %v3420_v11 = vpop.f32.mrf.mxu1 }
0x120d   : > { %v3787_v48 = vmul.f32 -1.442695, %v3342_v55  ;;  %v3344_v7 = vadd.f32 %v3343_v56, %v9016_v63  ;;  %v3421_v23 = vadd.f32 %v3420_v11, %v8768_v27 }
0x120f   : > { %4244 = vpow2.f32 %v3787_v48  ;;  %v3789_v61 = vmul.f32 -1.442695, %v3344_v7 }
0x1210   : > { %4246 = vpow2.f32 %v3788_v4 }
0x1211   : > { %4248 = vpow2.f32 %v3789_v61 }
0x1218   : > { %v4243_v0 = vpop.eup %4242 }
0x1219   : > { %v3429_v57 = vadd.f32 1.0, %v4243_v0 }
0x121b   : > { %4250 = vrcp.f32 %v3429_v57 }
0x121c   : > { %v4245_v40 = vpop.eup %4244 }
0x121d   : > { %v3430_v26 = vadd.f32 1.0, %v4245_v40  ;;  %v4247_v41 = vpop.eup %4246 }
0x121e   : > { %v4249_v37 = vpop.eup %4248  ;;  %v3441_v43 = vadd.f32 1.0, %v4247_v41 }
0x121f   : > { %4252 = vrcp.f32 %v3430_v26  ;;  %v3442_v63 = vadd.f32 1.0, %v4249_v37 }
0x1220   : > { %4254 = vrcp.f32 %v3441_v43 }
0x1221   : > { %4256 = vrcp.f32 %v3442_v63 }
0x1228   : > { %v4251_v13 = vpop.eup %4250 }
0x1229   : > { %v3447_v17 = vmul.f32 %v4251_v13, %v3415_v19 }
0x122b   : > { %v3449_v59 = vadd.f32 %v3447_v17, %v3413_v9 }
0x122c   : > { %v4253_v14 = vpop.eup %4252 }
0x122d   : > { %4258 = vtanh.f32 %v3449_v59  ;;  %v3448_v22 = vmul.f32 %v4253_v14, %v3421_v23  ;;  %v4255_v28 = vpop.eup %4254 }
0x122e   : > { %v4257_v38 = vpop.eup %4256  ;;  %v3453_v39 = vsub.f32 1.0, %v4255_v28  ;;  %v3457_v42 = vmul.f32 %v4255_v28, %v7608_v33 }
0x122f   : > { %v3450_v30 = vadd.f32 %v3448_v22, %v3419_v6  ;;  %v3454_v36 = vsub.f32 1.0, %v4257_v38  ;;  %v3458_v3 = vmul.f32 %v4257_v38, %v7612_v1 }
0x1231   : > { %4260 = vtanh.f32 %v3450_v30 }
0x123a   : > { %v4259_v44 = vpop.eup %4258 }
0x123b   : > { %v3455_v21 = vmul.f32 %v4259_v44, %v3453_v39 }
0x123d   : > { %v3459_v45 = vadd.f32 %v3457_v42, %v3455_v21 }
0x123e   : > { %v4261_v27 = vpop.eup %4260 }
0x123f   : > { %3959 = vmatprep.mubr.f32.mxu0 %v3459_v45  ;;  %v3456_v53 = vmul.f32 %v4261_v27, %v3454_v36 }
0x1241   : > { %v3460_v31 = vadd.f32 %v3458_v3, %v3456_v53 }
0x1243   : > { %3960 = vmatmul.mubr.f32.vlgmr.msra.gmra.mxu0 %v3460_v31 }
0x1303   : > { %v3961_v62 = vpop.f32.mrf.mxu0 }
0x1304   : > { %v3556_v33 = vadd.f32 %v3961_v62, %v3790_v32 }
0x1305   : > { %v3550_v51 = vpop.f32.mrf.mxu0 }
0x1306   : > { %3560 = vst [vmem:[%s394_s21 + $0x8] sm:$0xff] %v3556_v33  ;;  %v3551_v1 = vadd.f32 %v3790_v32, %v3550_v51 }
0x1308   : > { %3559 = vst [vmem:[%s394_s21] sm:$0xff] %v3551_v1 }
0x1309   : > { %4705 = shalt.err (!%p4702_p4)
}
0x130a   : > { %s4706_s13 = scalar_lea.hbm %s7707_s2, 256  ;;  %s4710_s20 = scalar_lea.hbm %s7756_s7, 1024 }
0x130b   : > { %p4707_p10 = scmp.ne.s32.totalorder %s7707_s2, %s4706_s13  ;;  %p4711_p5 = scmp.lt.s32.totalorder %s7707_s2, %s7756_s7 }
0x130c   : > { %p4712_p9 = scmp.lt.s32.totalorder %s4710_s20, %s4706_s13 }
0x130d   : > { %p4708_p11 = pnand %p4707_p10, %p4932_p7 }
0x130e   : > { %p4713_p12 = por %p4712_p9, %p4711_p5 }
0x130f   : > { %p4709_p6 = pneg %p4708_p11 }
0x1311   : > { %p4714_p3 = pnand %p4713_p12, %p4709_p6 }
0x1313   : > { %4717 = shalt.err (!%p4714_p3)
}
0x1314   : > { %s4787_s3 = smov 128   ;;  %s4788_s21 = smov 8  }
0x1315   : > { %3982 = dma.vmem_to_hbm [thread:$0]  (%p4932_p7), %s7702_s10, 256, %s7707_s2, %s3562_s18, %s4787_s3, %s4787_s3, %s4788_s21  }
0x1316 PF: > { %p4017_p1 = scmp.ge.s32.totalorder %s4772_s27, 2  ;;  %s3590_s4 = sand.u32 1, %s4760_s24  }
0x1317   : > { %p9065_p0 = scmp.ne.s32.totalorder %s8284_s8, 0  ;;  %s3591_s16 = scalar_lea.sflag [#allocation4], %s3590_s4 }
0x1319   : > { %p4005_p2 = pnand %p4017_p1, %p9065_p0 }
0x131b   : > { %p4006_p8 = pneg %p4005_p2 }
0x131d   : > { %4755 = dma.done.wait (%p4006_p8), %s3591_s16, 256  }
0x131e   : > { %4757 = vsyncadd (%p4006_p8), %s3591_s16, 4294967040  ;;  %p25_p13 = scmp.ge.s32.totalorder %s4919_s23, 6   ;;  %s9066_s24 = smov %s4764_s25 }
0x131f   : > { %s9067_s25 = smov %s4768_s26  ;;  %s9068_s26 = smov %s4928_s11 }
0x1320   : > { %s9069_s27 = smov %s4919_s23  ;;  %27 = sbr.rel (!%p25_p13) target bundleno = 14 (0xe), region = 125 }
0x1325   :  { %3596 = vsyncpa [#allocation3], 1 }
0x1326   :  { %3598 = vsyncpa [#allocation3 + $0x1], 1 }
0x1327   :  { %3599 = vsyncpa [#allocation6], 1 }
0x1328   :  { %3601 = vsyncpa [#allocation6 + $0x1], 1 }
0x1329   :  { %3602 = vsyncpa [#allocation9], 1 }
0x132a   :  { %3603 = vsyncpa [#allocation12], 1 }
0x132b   :  { %3604 = vsyncpa [#allocation4], 1 }
0x132c   :  { %3606 = vsyncpa [#allocation4 + $0x1], 1 }

</bundles_post_ra>
